<compile_context>
chip_gen: v6e
topology: v6e:2x2x1
jax: 0.10.0
libtpu: 0.0.40
codegen_flags: <defaults>
</compile_context>

<pallas_src>
import functools

import jax
import jax.numpy as jnp
from jax.experimental import pallas as pl
from jax.experimental.pallas import tpu as pltpu

EPS = 1e-5
ALPHA = 0.1  # LeakyReLU slope (module default leakyrelu_alpha=0.1)


# ----------------------------- small helpers ---------------------------------
def _round_up(x, m):
    return ((x + m - 1) // m) * m


def _leaky(x, alpha=ALPHA):
    return jnp.where(x >= 0, x, alpha * x)


# ----------------------------- in-kernel helpers -----------------------------
def _tap_accumulate(stack_ref, w_ref, yo, xo, *, tile_p, hb, wo, ho, cout):
    """Accumulate the 9 shifted taps (3x3 neighbourhood in the flattened
    N*Ho*Wo axis) of the staged [prev-halo | cur | next-halo] slab against the
    per-shift weight slabs.  Rows whose tap falls outside the image (or beyond
    the valid P rows, via the yo sentinel) are masked to zero, reproducing the
    conv zero-padding.  Returns (f32 accumulator, f32 row-validity mask)."""
    acc = jnp.zeros((tile_p, cout), jnp.float32)
    rowmask = None
    for dy in (-1, 0, 1):
        for dx in (-1, 0, 1):
            s = (dy + 1) * 3 + (dx + 1)
            valid = ((yo + dy >= 0) & (yo + dy < ho) &
                     (xo + dx >= 0) & (xo + dx < wo))
            maskf = jnp.where(valid, 1.0, 0.0)                # (tile_p, 1) f32
            if dy == 0 and dx == 0:
                rowmask = maskf                               # "real output row"
            slab = stack_ref[pl.ds(hb + dy * wo + dx, tile_p), :]
            slab = slab * maskf.astype(slab.dtype)
            acc = acc + jnp.dot(slab, w_ref[s],
                                preferred_element_type=jnp.float32)
    return acc, rowmask


def _tile_stats(acc, rowmask, tile_p, total_p):
    """Per-tile (sum, centered sum-of-squares) partials for two-pass BN.
    Centering about the per-tile mean keeps the host combine well-conditioned."""
    cnt = jnp.minimum(tile_p, total_p - pl.program_id(0) * tile_p)
    cnt = cnt.astype(jnp.float32)
    s = jnp.sum(acc, axis=0, keepdims=True)                   # (1, C)
    mean = s / cnt
    d = (acc - mean) * rowmask                                # padded rows -> 0
    cssq = jnp.sum(d * d, axis=0, keepdims=True)              # (1, C)
    return jnp.concatenate([s, cssq], axis=0).reshape(1, 2, -1)


# --------------------------------- kernels -----------------------------------
def pass1_kernel(xc_ref, xp_ref, xn_ref, yo_ref, xo_ref, w1_ref, wm_ref,
                 y1_ref, m_ref, st1_ref, stm_ref, stack_ref,
                 *, tile_p, hb, wo, ho, total_p, cb):
    """Branch conv1 (4x4 s2 p1, as 9 shifted taps on the space-to-depth slab)
    and the folded main path (avg-pool + 1x1 conv == center-tap matmul), both
    pre-BN, plus their per-tile BN partial stats."""
    stack_ref[pl.ds(0, hb), :] = xp_ref[...]
    stack_ref[pl.ds(hb, tile_p), :] = xc_ref[...]
    stack_ref[pl.ds(hb + tile_p, hb), :] = xn_ref[...]

    yo = yo_ref[...]
    xo = xo_ref[...]

    acc1, rowmask = _tap_accumulate(stack_ref, w1_ref, yo, xo,
                                    tile_p=tile_p, hb=hb, wo=wo, ho=ho, cout=cb)
    y1_ref[...] = acc1.astype(y1_ref.dtype)
    st1_ref[...] = _tile_stats(acc1, rowmask, tile_p, total_p)

    centre = stack_ref[pl.ds(hb, tile_p), :] * rowmask.astype(stack_ref.dtype)
    m = jnp.dot(centre, wm_ref[...], preferred_element_type=jnp.float32)
    m_ref[...] = m.astype(m_ref.dtype)
    stm_ref[...] = _tile_stats(m, rowmask, tile_p, total_p)


def pass2_kernel(y1c_ref, y1p_ref, y1n_ref, yo_ref, xo_ref, sc_ref, sh_ref,
                 w2_ref, y2_ref, st2_ref, stack_ref,
                 *, tile_p, hb, wo, ho, total_p, co):
    """Branch conv2 (3x3 s1 p1) with BN1 + LeakyReLU applied on the fly while
    staging y1 (so h1 never hits HBM), plus per-tile BN partial stats."""
    sc = sc_ref[...]
    sh = sh_ref[...]

    def bn_act(v):
        h = v.astype(jnp.float32) * sc + sh
        return jnp.where(h >= 0, h, ALPHA * h).astype(stack_ref.dtype)

    stack_ref[pl.ds(0, hb), :] = bn_act(y1p_ref[...])
    stack_ref[pl.ds(hb, tile_p), :] = bn_act(y1c_ref[...])
    stack_ref[pl.ds(hb + tile_p, hb), :] = bn_act(y1n_ref[...])

    yo = yo_ref[...]
    xo = xo_ref[...]
    acc, rowmask = _tap_accumulate(stack_ref, w2_ref, yo, xo,
                                   tile_p=tile_p, hb=hb, wo=wo, ho=ho, cout=co)
    y2_ref[...] = acc.astype(y2_ref.dtype)
    st2_ref[...] = _tile_stats(acc, rowmask, tile_p, total_p)


def pass3_kernel(m_ref, y2_ref, scm_ref, shm_ref, sc2_ref, sh2_ref, o_ref):
    """Apply BN (fused scale/shift) + LeakyReLU to both paths and add."""
    m = m_ref[...].astype(jnp.float32) * scm_ref[...] + shm_ref[...]
    h = y2_ref[...].astype(jnp.float32) * sc2_ref[...] + sh2_ref[...]
    o_ref[...] = _leaky(m) + _leaky(h)


# ------------------------------ host-side glue --------------------------------
def spectral_normalize(w, n_iter=1):
    # TODO(synk): PyTorch spectral_norm keeps a persistent randomly-initialized
    # u buffer and does one power iteration per forward; here u starts from a
    # deterministic vector (no persistent state), single iteration by default.
    cout = w.shape[0]
    wm = w.reshape(cout, -1).astype(jnp.float32)
    u0 = jnp.ones((cout,), jnp.float32) / jnp.sqrt(jnp.float32(cout))
    v0 = jnp.zeros((wm.shape[1],), jnp.float32)

    def body(_, uv):
        u, _ = uv
        v = wm.T @ u
        v = v / (jnp.linalg.norm(v) + 1e-12)
        u = wm @ v
        u = u / (jnp.linalg.norm(u) + 1e-12)
        return (u, v)

    u, v = jax.lax.fori_loop(0, n_iter, body, (u0, v0))
    sigma = u @ (wm @ v)
    return w / sigma


def im2col_nhwc(x, kh, kw, stride, pad):
    """(Reference only.)  x: (N,H,W,C) -> patches (N*Ho*Wo, kh*kw*C)."""
    N, H, W, C = x.shape
    xp = jnp.pad(x, ((0, 0), (pad, pad), (pad, pad), (0, 0)))
    Ho = (H + 2 * pad - kh) // stride + 1
    Wo = (W + 2 * pad - kw) // stride + 1
    cols = []
    for i in range(kh):
        for j in range(kw):
            cols.append(xp[:, i:i + stride * Ho:stride, j:j + stride * Wo:stride, :])
    p = jnp.stack(cols, axis=3)
    return p.reshape(N * Ho * Wo, kh * kw * C), (N, Ho, Wo)


def _compiler_config():
    """Per-generation VMEM limit: raise it on 128 MiB parts (v5e/v6e), stay
    conservative on v7x's 64 MiB, fall back to the known-good 32 MiB."""
    try:
        phys = int(pltpu.get_tpu_info().vmem_capacity_bytes)
    except Exception:
        phys = 0
    if phys >= 96 * 2**20:
        limit = 80 * 2**20
    elif phys >= 48 * 2**20:
        limit = 40 * 2**20
    else:
        limit = 32 * 2**20
    params = pltpu.CompilerParams(dimension_semantics=("parallel",),
                                  vmem_limit_bytes=limit)
    return params, limit


def _choose_tile_rows(P, HB, K1P, CB, CO, vmem_limit):
    """Pick the P-tile: multiple of the halo block HB, per-step working set
    within ~half the VMEM limit, >=8 grid steps when P allows it (v7x 2-TC
    sharding + pipelining), balancing row-padding waste vs per-step overhead."""
    budget = max(vmem_limit // 2, 4 * 2**20)
    # (bytes per tile row, fixed bytes) for the dominant resident buffers of
    # each pass; in/out blocks double-buffered, scratch single-buffered.
    passes = (
        (2 * K1P * 2 + 2 * CB * 2 + 2 * CO * 2 + K1P * 2 + 16,
         2 * (2 * HB * K1P + 9 * K1P * CB + K1P * CO) * 2),
        (2 * CB * 2 + 2 * CO * 2 + CB * 2 + 16,
         2 * (2 * HB * CB + 9 * CB * CO) * 2),
        (2 * CO * 2 * 2 + 2 * CO * 4, 8 * CO * 4),
    )
    max_rows = 4096
    for per_row, fixed in passes:
        avail = max(budget - fixed, per_row * HB)
        max_rows = min(max_rows, avail // per_row)
    max_rows = max((max_rows // HB) * HB, HB)
    if P >= 8 * HB:                       # keep >= 8 parallel grid steps
        max_rows = min(max_rows, max((P // 8) // HB * HB, HB))

    def cost(t):                          # padded rows + per-step overhead
        pp = -(-P // t) * t               # (~0.35us/step ~= 64 rows equivalent)
        return pp + (pp // t) * 64

    return min(range(HB, max_rows + 1, HB), key=lambda t: (cost(t), -t))


def _bn_scale_shift(stats, counts, gamma, beta, total, cpad):
    """Combine per-tile (sum, centered-ssq) partials with the robust parallel
    variance formula and fold with the affine params into one (scale, shift)."""
    s = stats[:, 0, :]                    # (G, C) per-tile sums
    cssq = stats[:, 1, :]                 # (G, C) per-tile centered ssq
    cnt = counts.reshape(-1, 1)           # (G, 1)
    mu = jnp.sum(s, axis=0, keepdims=True) / total
    mean_i = s / cnt
    m2 = jnp.sum(cssq + cnt * (mean_i - mu) ** 2, axis=0)
    var = jnp.maximum(m2 / total, 0.0)    # biased variance (BN forward)
    g = jnp.zeros((cpad,), jnp.float32).at[:gamma.shape[0]].set(gamma)
    b = jnp.zeros((cpad,), jnp.float32).at[:beta.shape[0]].set(beta)
    scale = g * jax.lax.rsqrt(var + EPS)
    shift = b - mu.reshape(-1) * scale
    return scale.reshape(1, cpad), shift.reshape(1, cpad)


def block_d_forward(x, params):
    N, Cin, H, W = x.shape
    assert H % 2 == 0 and W % 2 == 0
    w_main = spectral_normalize(params["w_main"])     # (Cout, Cin, 1, 1)
    w_b1 = spectral_normalize(params["w_b1"])         # (Cin, Cin, 4, 4)
    w_b2 = spectral_normalize(params["w_b2"])         # (Cout, Cin, 3, 3)
    Cout = w_main.shape[0]
    Ho, Wo = H // 2, W // 2
    P = N * Ho * Wo

    K1 = 4 * Cin
    K1P = _round_up(K1, 128)      # space-to-depth input channels (lane pad)
    CB = _round_up(Cin, 128)      # branch conv1 output channels (lane pad)
    CO = _round_up(Cout, 128)     # output channels (lane pad)
    HB = _round_up(Wo + 1, 8)     # halo rows needed for +-(Wo+1) row shifts

    compiler_params, vmem_limit = _compiler_config()
    TILE_P = _choose_tile_rows(P, HB, K1P, CB, CO, vmem_limit)
    PP = _round_up(P, TILE_P)
    G = PP // TILE_P
    RPH = TILE_P // HB
    NHB = PP // HB
    grid = (G,)

    # ---- host-side prep: ONE space-to-depth relayout of x, no im2col --------
    x_nhwc = x.transpose(0, 2, 3, 1)
    x_s2d = (x_nhwc.reshape(N, Ho, 2, Wo, 2, Cin)
             .transpose(0, 1, 3, 2, 4, 5)
             .reshape(P, K1))
    x_s2d = jnp.pad(x_s2d, ((0, PP - P), (0, K1P - K1))).astype(jnp.bfloat16)

    # per-output-row coordinates (for conv zero-padding masks in-kernel);
    # padded rows get an out-of-range yo sentinel so every tap is masked.
    pidx = jnp.arange(PP, dtype=jnp.int32)
    xo_arr = (pidx % Wo).astype(jnp.int32).reshape(PP, 1)
    yo_arr = jnp.where(pidx < P, (pidx // Wo) % Ho, Ho + 4)
    yo_arr = yo_arr.astype(jnp.int32).reshape(PP, 1)

    # ---- weights: per-shift slabs, lane-padded, bf16 -------------------------
    # 4x4 stride-2 pad-1 conv == 3x3 stride-1 pad-1 conv on the space-to-depth
    # input; each (dy,dx) shift uses the phase-compatible subset of the taps.
    w1_tap = jnp.zeros((9, K1P, CB), jnp.float32)
    for ky in range(4):
        dy, pr = (ky - 1) // 2, (ky - 1) % 2
        for kx in range(4):
            dx, pc = (kx - 1) // 2, (kx - 1) % 2
            s = (dy + 1) * 3 + (dx + 1)
            r0 = (pr * 2 + pc) * Cin
            w1_tap = w1_tap.at[s, r0:r0 + Cin, :Cin].set(w_b1[:, :, ky, kx].T)
    w1_tap = w1_tap.astype(jnp.bfloat16)

    # main path: 2x2 avg-pool folded into the 1x1 conv (all 4 phases, *0.25)
    wm = w_main.reshape(Cout, Cin).T
    wm_fold = jnp.zeros((K1P, CO), jnp.float32)
    wm_fold = wm_fold.at[:K1, :Cout].set(0.25 * jnp.tile(wm, (4, 1)))
    wm_fold = wm_fold.astype(jnp.bfloat16)

    w2_tap = jnp.zeros((9, CB, CO), jnp.float32)
    w2_tap = w2_tap.at[:, :Cin, :Cout].set(
        jnp.transpose(w_b2, (2, 3, 1, 0)).reshape(9, Cin, Cout))
    w2_tap = w2_tap.astype(jnp.bfloat16)

    counts = jnp.array([min(TILE_P, P - i * TILE_P) for i in range(G)],
                       jnp.float32)

    cur_map = lambda i: (i, 0)
    prev_map = lambda i: (jnp.maximum(i * RPH - 1, 0), 0)
    next_map = lambda i: (jnp.minimum((i + 1) * RPH, NHB - 1), 0)

    # ---- pass 1: branch conv1 + folded main path (pre-BN) + stats ------------
    kernel1 = functools.partial(pass1_kernel, tile_p=TILE_P, hb=HB, wo=Wo,
                                ho=Ho, total_p=P, cb=CB)
    y1, m_pre, st1, stm = pl.pallas_call(
        kernel1,
        grid=grid,
        in_specs=[
            pl.BlockSpec((TILE_P, K1P), cur_map),
            pl.BlockSpec((HB, K1P), prev_map),
            pl.BlockSpec((HB, K1P), next_map),
            pl.BlockSpec((TILE_P, 1), cur_map),
            pl.BlockSpec((TILE_P, 1), cur_map),
            pl.BlockSpec((9, K1P, CB), lambda i: (0, 0, 0)),
            pl.BlockSpec((K1P, CO), lambda i: (0, 0)),
        ],
        out_specs=(
            pl.BlockSpec((TILE_P, CB), cur_map),
            pl.BlockSpec((TILE_P, CO), cur_map),
            pl.BlockSpec((1, 2, CB), lambda i: (i, 0, 0)),
            pl.BlockSpec((1, 2, CO), lambda i: (i, 0, 0)),
        ),
        out_shape=(
            jax.ShapeDtypeStruct((PP, CB), jnp.bfloat16),
            jax.ShapeDtypeStruct((PP, CO), jnp.bfloat16),
            jax.ShapeDtypeStruct((G, 2, CB), jnp.float32),
            jax.ShapeDtypeStruct((G, 2, CO), jnp.float32),
        ),
        scratch_shapes=[pltpu.VMEM((TILE_P + 2 * HB, K1P), jnp.bfloat16)],
        compiler_params=compiler_params,
    )(x_s2d, x_s2d, x_s2d, yo_arr, xo_arr, w1_tap, wm_fold)

    sc1, sh1 = _bn_scale_shift(st1, counts, params["g_b1"], params["b_b1"], P, CB)
    scm, shm = _bn_scale_shift(stm, counts, params["g_m"], params["b_m"], P, CO)

    # ---- pass 2: BN1+LReLU on the fly, branch conv2 (3x3 s1 p1) + stats ------
    kernel2 = functools.partial(pass2_kernel, tile_p=TILE_P, hb=HB, wo=Wo,
                                ho=Ho, total_p=P, co=CO)
    y2, st2 = pl.pallas_call(
        kernel2,
        grid=grid,
        in_specs=[
            pl.BlockSpec((TILE_P, CB), cur_map),
            pl.BlockSpec((HB, CB), prev_map),
            pl.BlockSpec((HB, CB), next_map),
            pl.BlockSpec((TILE_P, 1), cur_map),
            pl.BlockSpec((TILE_P, 1), cur_map),
            pl.BlockSpec((1, CB), lambda i: (0, 0)),
            pl.BlockSpec((1, CB), lambda i: (0, 0)),
            pl.BlockSpec((9, CB, CO), lambda i: (0, 0, 0)),
        ],
        out_specs=(
            pl.BlockSpec((TILE_P, CO), cur_map),
            pl.BlockSpec((1, 2, CO), lambda i: (i, 0, 0)),
        ),
        out_shape=(
            jax.ShapeDtypeStruct((PP, CO), jnp.bfloat16),
            jax.ShapeDtypeStruct((G, 2, CO), jnp.float32),
        ),
        scratch_shapes=[pltpu.VMEM((TILE_P + 2 * HB, CB), jnp.bfloat16)],
        compiler_params=compiler_params,
    )(y1, y1, y1, yo_arr, xo_arr, sc1, sh1, w2_tap)

    sc2, sh2 = _bn_scale_shift(st2, counts, params["g_b2"], params["b_b2"], P, CO)

    # ---- pass 3: apply both BN+LReLU and residual add ------------------------
    out_flat = pl.pallas_call(
        pass3_kernel,
        grid=grid,
        in_specs=[
            pl.BlockSpec((TILE_P, CO), cur_map),
            pl.BlockSpec((TILE_P, CO), cur_map),
            pl.BlockSpec((1, CO), lambda i: (0, 0)),
            pl.BlockSpec((1, CO), lambda i: (0, 0)),
            pl.BlockSpec((1, CO), lambda i: (0, 0)),
            pl.BlockSpec((1, CO), lambda i: (0, 0)),
        ],
        out_specs=pl.BlockSpec((TILE_P, CO), cur_map),
        out_shape=jax.ShapeDtypeStruct((PP, CO), jnp.float32),
        compiler_params=compiler_params,
    )(m_pre, y2, scm, shm, sc2, sh2)

    # slice off row/channel padding, back to NCHW (outside the kernels)
    return out_flat[:P, :Cout].reshape(N, Ho, Wo, Cout).transpose(0, 3, 1, 2)


# ------------------------- pure-JAX reference (check) -------------------------
def reference(x, params):
    """Plain-JAX mirror of the forward (same bf16 rounding points: bf16 matmul
    operands + bf16 pre-BN intermediates, f32 batch statistics)."""
    N, Cin, H, W = x.shape
    w_main = spectral_normalize(params["w_main"])
    w_b1 = spectral_normalize(params["w_b1"])
    w_b2 = spectral_normalize(params["w_b2"])
    Cout = w_main.shape[0]
    Ho, Wo = H // 2, W // 2
    x_nhwc = x.transpose(0, 2, 3, 1)

    def bn_lrelu(y, g, b):
        mu = jnp.mean(y, axis=0, keepdims=True)
        var = jnp.mean((y - mu) ** 2, axis=0, keepdims=True)
        scale = g.reshape(1, -1) * jax.lax.rsqrt(var + EPS)
        shift = b.reshape(1, -1) - mu * scale
        yq = y.astype(jnp.bfloat16).astype(jnp.float32)   # kernels store bf16
        return _leaky(yq * scale + shift)

    # main path: 2x2 avg-pool folded into the 1x1 conv
    poolwin, _ = im2col_nhwc(x_nhwc, 2, 2, 2, 0)
    wm_fold = (0.25 * jnp.tile(w_main.reshape(Cout, Cin).T, (4, 1))).astype(jnp.bfloat16)
    m = jnp.dot(poolwin.astype(jnp.bfloat16), wm_fold, preferred_element_type=jnp.float32)
    m = bn_lrelu(m, params["g_m"], params["b_m"])

    # branch conv1 4x4 s2 p1 + BN + LReLU
    p1, _ = im2col_nhwc(x_nhwc, 4, 4, 2, 1)
    w1t = w_b1.transpose(2, 3, 1, 0).reshape(-1, Cin).astype(jnp.bfloat16)
    y1 = jnp.dot(p1.astype(jnp.bfloat16), w1t, preferred_element_type=jnp.float32)
    h1 = bn_lrelu(y1, params["g_b1"], params["b_b1"]).astype(jnp.bfloat16)

    # branch conv2 3x3 s1 p1 + BN + LReLU
    p2, _ = im2col_nhwc(h1.reshape(N, Ho, Wo, Cin), 3, 3, 1, 1)
    w2t = w_b2.transpose(2, 3, 1, 0).reshape(-1, Cout).astype(jnp.bfloat16)
    y2 = jnp.dot(p2, w2t, preferred_element_type=jnp.float32)
    h2 = bn_lrelu(y2, params["g_b2"], params["b_b2"])

    out = m + h2
    return out.reshape(N, Ho, Wo, Cout).transpose(0, 3, 1, 2)


# ----------------------------------- main ------------------------------------
if __name__ == "__main__":
    key = jax.random.PRNGKey(0)
    kx, km, k1, k2 = jax.random.split(key, 4)

    N, Cin, Cout, H, W = 2, 4, 8, 16, 16
    x = jax.random.normal(kx, (N, Cin, H, W), jnp.float32)

    params = dict(
        w_main=0.3 * jax.random.normal(km, (Cout, Cin, 1, 1), jnp.float32),
        w_b1=0.3 * jax.random.normal(k1, (Cin, Cin, 4, 4), jnp.float32),
        w_b2=0.3 * jax.random.normal(k2, (Cout, Cin, 3, 3), jnp.float32),
        # BatchNorm affine params at default init (gamma=1, beta=0)
        g_m=jnp.ones((Cout,), jnp.float32), b_m=jnp.zeros((Cout,), jnp.float32),
        g_b1=jnp.ones((Cin,), jnp.float32), b_b1=jnp.zeros((Cin,), jnp.float32),
        g_b2=jnp.ones((Cout,), jnp.float32), b_b2=jnp.zeros((Cout,), jnp.float32),
    )

    fwd = jax.jit(block_d_forward)
    out = jax.block_until_ready(fwd(x, params))
    ref = jax.block_until_ready(reference(x, params))

    assert out.shape == (N, Cout, H // 2, W // 2), out.shape
    assert bool(jnp.all(jnp.isfinite(out)))
    if not jnp.allclose(out, ref, atol=2e-2, rtol=2e-2):
        err = float(jnp.max(jnp.abs(out - ref)))
        raise AssertionError(f"Pallas output does not match JAX reference (max |err|={err})")

    print("KERNEL_OK")
</pallas_src>

<mosaic_0001>
module attributes {stable_mosaic.version = 11 : i64} {
  func.func @pass2_kernel(%arg0: i32, %arg1: memref<16x128xbf16, #tpu.memory_space<vmem>>, %arg2: memref<16x128xbf16, #tpu.memory_space<vmem>>, %arg3: memref<16x128xbf16, #tpu.memory_space<vmem>>, %arg4: memref<16x1xi32, #tpu.memory_space<vmem>>, %arg5: memref<16x1xi32, #tpu.memory_space<vmem>>, %arg6: memref<1x128xf32, #tpu.memory_space<vmem>>, %arg7: memref<1x128xf32, #tpu.memory_space<vmem>>, %arg8: memref<9x128x128xbf16, #tpu.memory_space<vmem>>, %arg9: memref<16x128xbf16, #tpu.memory_space<vmem>>, %arg10: memref<1x2x128xf32, #tpu.memory_space<vmem>>, %arg11: memref<48x128xbf16, #tpu.memory_space<vmem>>) attributes {dimension_semantics = [#tpu.dimension_semantics<parallel>], iteration_bounds = array<i64: 8>, scalar_prefetch = 0 : i64, scratch_operands = 1 : i64, tpu.core_type = #tpu.core_type<tc>, window_params = [{transform_indices = @transform_0, window_bounds = array<i64: 16, 128>}, {transform_indices = @transform_1, window_bounds = array<i64: 16, 128>}, {transform_indices = @transform_2, window_bounds = array<i64: 16, 128>}, {transform_indices = @transform_3, window_bounds = array<i64: 16, 1>}, {transform_indices = @transform_4, window_bounds = array<i64: 16, 1>}, {pipeline_mode = #tpu.pipeline_mode<synchronous>, transform_indices = @transform_5, window_bounds = array<i64: 1, 128>}, {pipeline_mode = #tpu.pipeline_mode<synchronous>, transform_indices = @transform_6, window_bounds = array<i64: 1, 128>}, {pipeline_mode = #tpu.pipeline_mode<synchronous>, transform_indices = @transform_7, window_bounds = array<i64: 9, 128, 128>}, {transform_indices = @transform_8, window_bounds = array<i64: 16, 128>}, {transform_indices = @transform_9, window_bounds = array<i64: 1, 2, 128>}]} {
    %c0 = arith.constant 0 : index
    %c0_0 = arith.constant 0 : index
    %0 = vector.load %arg6[%c0, %c0_0] : memref<1x128xf32, #tpu.memory_space<vmem>>, vector<1x128xf32>
    %c0_1 = arith.constant 0 : index
    %c0_2 = arith.constant 0 : index
    %1 = vector.load %arg7[%c0_1, %c0_2] : memref<1x128xf32, #tpu.memory_space<vmem>>, vector<1x128xf32>
    %c0_3 = arith.constant 0 : index
    %c0_4 = arith.constant 0 : index
    %2 = vector.load %arg2[%c0_3, %c0_4] : memref<16x128xbf16, #tpu.memory_space<vmem>>, vector<16x128xbf16>
    %3 = arith.extf %2 : vector<16x128xbf16> to vector<16x128xf32>
    %4 = vector.broadcast %0 : vector<1x128xf32> to vector<16x128xf32>
    %5 = arith.mulf %3, %4 : vector<16x128xf32>
    %6 = vector.broadcast %1 : vector<1x128xf32> to vector<16x128xf32>
    %7 = arith.addf %5, %6 : vector<16x128xf32>
    %cst = arith.constant 0.000000e+00 : f32
    %8 = vector.broadcast %cst : f32 to vector<16x128xf32>
    %9 = arith.cmpf oge, %7, %8 : vector<16x128xf32>
    %cst_5 = arith.constant 1.000000e-01 : f32
    %10 = vector.broadcast %cst_5 : f32 to vector<16x128xf32>
    %11 = arith.mulf %10, %7 : vector<16x128xf32>
    %12 = arith.select %9, %7, %11 : vector<16x128xi1>, vector<16x128xf32>
    %13 = arith.truncf %12 : vector<16x128xf32> to vector<16x128xbf16>
    %c0_6 = arith.constant 0 : index
    %c0_7 = arith.constant 0 : index
    %14 = vector.load %arg11[%c0_6, %c0_7] : memref<48x128xbf16, #tpu.memory_space<vmem>>, vector<16x128xbf16>
    tpu.vector_store %arg11[%c0_6, %c0_7], %13 {strides = array<i32>} : memref<48x128xbf16, #tpu.memory_space<vmem>>, vector<16x128xbf16>,
    %c0_8 = arith.constant 0 : index
    %c0_9 = arith.constant 0 : index
    %15 = vector.load %arg1[%c0_8, %c0_9] : memref<16x128xbf16, #tpu.memory_space<vmem>>, vector<16x128xbf16>
    %16 = arith.extf %15 : vector<16x128xbf16> to vector<16x128xf32>
    %17 = vector.broadcast %0 : vector<1x128xf32> to vector<16x128xf32>
    %18 = arith.mulf %16, %17 : vector<16x128xf32>
    %19 = vector.broadcast %1 : vector<1x128xf32> to vector<16x128xf32>
    %20 = arith.addf %18, %19 : vector<16x128xf32>
    %cst_10 = arith.constant 0.000000e+00 : f32
    %21 = vector.broadcast %cst_10 : f32 to vector<16x128xf32>
    %22 = arith.cmpf oge, %20, %21 : vector<16x128xf32>
    %cst_11 = arith.constant 1.000000e-01 : f32
    %23 = vector.broadcast %cst_11 : f32 to vector<16x128xf32>
    %24 = arith.mulf %23, %20 : vector<16x128xf32>
    %25 = arith.select %22, %20, %24 : vector<16x128xi1>, vector<16x128xf32>
    %26 = arith.truncf %25 : vector<16x128xf32> to vector<16x128xbf16>
    %c16 = arith.constant 16 : index
    %c0_12 = arith.constant 0 : index
    %27 = vector.load %arg11[%c16, %c0_12] : memref<48x128xbf16, #tpu.memory_space<vmem>>, vector<16x128xbf16>
    tpu.vector_store %arg11[%c16, %c0_12], %26 {strides = array<i32>} : memref<48x128xbf16, #tpu.memory_space<vmem>>, vector<16x128xbf16>,
    %c0_13 = arith.constant 0 : index
    %c0_14 = arith.constant 0 : index
    %28 = vector.load %arg3[%c0_13, %c0_14] : memref<16x128xbf16, #tpu.memory_space<vmem>>, vector<16x128xbf16>
    %29 = arith.extf %28 : vector<16x128xbf16> to vector<16x128xf32>
    %30 = vector.broadcast %0 : vector<1x128xf32> to vector<16x128xf32>
    %31 = arith.mulf %29, %30 : vector<16x128xf32>
    %32 = vector.broadcast %1 : vector<1x128xf32> to vector<16x128xf32>
    %33 = arith.addf %31, %32 : vector<16x128xf32>
    %cst_15 = arith.constant 0.000000e+00 : f32
    %34 = vector.broadcast %cst_15 : f32 to vector<16x128xf32>
    %35 = arith.cmpf oge, %33, %34 : vector<16x128xf32>
    %cst_16 = arith.constant 1.000000e-01 : f32
    %36 = vector.broadcast %cst_16 : f32 to vector<16x128xf32>
    %37 = arith.mulf %36, %33 : vector<16x128xf32>
    %38 = arith.select %35, %33, %37 : vector<16x128xi1>, vector<16x128xf32>
    %39 = arith.truncf %38 : vector<16x128xf32> to vector<16x128xbf16>
    %c32 = arith.constant 32 : index
    %c0_17 = arith.constant 0 : index
    %40 = vector.load %arg11[%c32, %c0_17] : memref<48x128xbf16, #tpu.memory_space<vmem>>, vector<16x128xbf16>
    tpu.vector_store %arg11[%c32, %c0_17], %39 {strides = array<i32>} : memref<48x128xbf16, #tpu.memory_space<vmem>>, vector<16x128xbf16>,
    %c0_18 = arith.constant 0 : index
    %c0_19 = arith.constant 0 : index
    %41 = vector.load %arg4[%c0_18, %c0_19] : memref<16x1xi32, #tpu.memory_space<vmem>>, vector<16x1xi32>
    %c0_20 = arith.constant 0 : index
    %c0_21 = arith.constant 0 : index
    %42 = vector.load %arg5[%c0_20, %c0_21] : memref<16x1xi32, #tpu.memory_space<vmem>>, vector<16x1xi32>
    %cst_22 = arith.constant 0.000000e+00 : f32
    %43 = vector.broadcast %cst_22 : f32 to vector<16x128xf32>
    %c-1_i32 = arith.constant -1 : i32
    %44 = vector.broadcast %c-1_i32 : i32 to vector<16x1xi32>
    %45 = arith.addi %41, %44 : vector<16x1xi32>
    %c0_i32 = arith.constant 0 : i32
    %46 = vector.broadcast %c0_i32 : i32 to vector<16x1xi32>
    %47 = arith.cmpi sge, %45, %46 : vector<16x1xi32>
    %c-1_i32_23 = arith.constant -1 : i32
    %48 = vector.broadcast %c-1_i32_23 : i32 to vector<16x1xi32>
    %49 = arith.addi %41, %48 : vector<16x1xi32>
    %c8_i32 = arith.constant 8 : i32
    %50 = vector.broadcast %c8_i32 : i32 to vector<16x1xi32>
    %51 = arith.cmpi slt, %49, %50 : vector<16x1xi32>
    %52 = arith.andi %47, %51 : vector<16x1xi1>
    %c-1_i32_24 = arith.constant -1 : i32
    %53 = vector.broadcast %c-1_i32_24 : i32 to vector<16x1xi32>
    %54 = arith.addi %42, %53 : vector<16x1xi32>
    %c0_i32_25 = arith.constant 0 : i32
    %55 = vector.broadcast %c0_i32_25 : i32 to vector<16x1xi32>
    %56 = arith.cmpi sge, %54, %55 : vector<16x1xi32>
    %57 = arith.andi %52, %56 : vector<16x1xi1>
    %c-1_i32_26 = arith.constant -1 : i32
    %58 = vector.broadcast %c-1_i32_26 : i32 to vector<16x1xi32>
    %59 = arith.addi %42, %58 : vector<16x1xi32>
    %c8_i32_27 = arith.constant 8 : i32
    %60 = vector.broadcast %c8_i32_27 : i32 to vector<16x1xi32>
    %61 = arith.cmpi slt, %59, %60 : vector<16x1xi32>
    %62 = arith.andi %57, %61 : vector<16x1xi1>
    %cst_28 = arith.constant 1.000000e+00 : f32
    %cst_29 = arith.constant 0.000000e+00 : f32
    %63 = vector.broadcast %cst_28 : f32 to vector<16x1xf32>
    %64 = vector.broadcast %cst_29 : f32 to vector<16x1xf32>
    %65 = arith.select %62, %63, %64 : vector<16x1xi1>, vector<16x1xf32>
    %c7 = arith.constant 7 : index
    %c0_30 = arith.constant 0 : index
    %66 = vector.load %arg11[%c7, %c0_30] : memref<48x128xbf16, #tpu.memory_space<vmem>>, vector<16x128xbf16>
    %67 = arith.truncf %65 : vector<16x1xf32> to vector<16x1xbf16>
    %68 = vector.broadcast %67 : vector<16x1xbf16> to vector<16x128xbf16>
    %69 = arith.mulf %66, %68 : vector<16x128xbf16>
    %c0_31 = arith.constant 0 : index
    %c0_32 = arith.constant 0 : index
    %c0_33 = arith.constant 0 : index
    %70 = vector.load %arg8[%c0_31, %c0_32, %c0_33] : memref<9x128x128xbf16, #tpu.memory_space<vmem>>, vector<1x128x128xbf16>
    %71 = vector.shape_cast %70 : vector<1x128x128xbf16> to vector<128x128xbf16>
    %cst_34 = arith.constant dense<0.000000e+00> : vector<16x128xf32>
    %72 = tpu.matmul %69, %71, %cst_34 {dimension_numbers = #tpu.dot_dimension_numbers<[1], [0], [0], [1], [0, 0, 1, 1], [], []>} : vector<16x128xbf16>, vector<128x128xbf16>, vector<16x128xf32> -> vector<16x128xf32>
    %73 = arith.addf %43, %72 : vector<16x128xf32>
    %c-1_i32_35 = arith.constant -1 : i32
    %74 = vector.broadcast %c-1_i32_35 : i32 to vector<16x1xi32>
    %75 = arith.addi %41, %74 : vector<16x1xi32>
    %c0_i32_36 = arith.constant 0 : i32
    %76 = vector.broadcast %c0_i32_36 : i32 to vector<16x1xi32>
    %77 = arith.cmpi sge, %75, %76 : vector<16x1xi32>
    %c-1_i32_37 = arith.constant -1 : i32
    %78 = vector.broadcast %c-1_i32_37 : i32 to vector<16x1xi32>
    %79 = arith.addi %41, %78 : vector<16x1xi32>
    %c8_i32_38 = arith.constant 8 : i32
    %80 = vector.broadcast %c8_i32_38 : i32 to vector<16x1xi32>
    %81 = arith.cmpi slt, %79, %80 : vector<16x1xi32>
    %82 = arith.andi %77, %81 : vector<16x1xi1>
    %c0_i32_39 = arith.constant 0 : i32
    %83 = vector.broadcast %c0_i32_39 : i32 to vector<16x1xi32>
    %84 = arith.addi %42, %83 : vector<16x1xi32>
    %c0_i32_40 = arith.constant 0 : i32
    %85 = vector.broadcast %c0_i32_40 : i32 to vector<16x1xi32>
    %86 = arith.cmpi sge, %84, %85 : vector<16x1xi32>
    %87 = arith.andi %82, %86 : vector<16x1xi1>
    %c0_i32_41 = arith.constant 0 : i32
    %88 = vector.broadcast %c0_i32_41 : i32 to vector<16x1xi32>
    %89 = arith.addi %42, %88 : vector<16x1xi32>
    %c8_i32_42 = arith.constant 8 : i32
    %90 = vector.broadcast %c8_i32_42 : i32 to vector<16x1xi32>
    %91 = arith.cmpi slt, %89, %90 : vector<16x1xi32>
    %92 = arith.andi %87, %91 : vector<16x1xi1>
    %cst_43 = arith.constant 1.000000e+00 : f32
    %cst_44 = arith.constant 0.000000e+00 : f32
    %93 = vector.broadcast %cst_43 : f32 to vector<16x1xf32>
    %94 = vector.broadcast %cst_44 : f32 to vector<16x1xf32>
    %95 = arith.select %92, %93, %94 : vector<16x1xi1>, vector<16x1xf32>
    %c8 = arith.constant 8 : index
    %c0_45 = arith.constant 0 : index
    %96 = vector.load %arg11[%c8, %c0_45] : memref<48x128xbf16, #tpu.memory_space<vmem>>, vector<16x128xbf16>
    %97 = arith.truncf %95 : vector<16x1xf32> to vector<16x1xbf16>
    %98 = vector.broadcast %97 : vector<16x1xbf16> to vector<16x128xbf16>
    %99 = arith.mulf %96, %98 : vector<16x128xbf16>
    %c1 = arith.constant 1 : index
    %c0_46 = arith.constant 0 : index
    %c0_47 = arith.constant 0 : index
    %100 = vector.load %arg8[%c1, %c0_46, %c0_47] : memref<9x128x128xbf16, #tpu.memory_space<vmem>>, vector<1x128x128xbf16>
    %101 = vector.shape_cast %100 : vector<1x128x128xbf16> to vector<128x128xbf16>
    %cst_48 = arith.constant dense<0.000000e+00> : vector<16x128xf32>
    %102 = tpu.matmul %99, %101, %cst_48 {dimension_numbers = #tpu.dot_dimension_numbers<[1], [0], [0], [1], [0, 0, 1, 1], [], []>} : vector<16x128xbf16>, vector<128x128xbf16>, vector<16x128xf32> -> vector<16x128xf32>
    %103 = arith.addf %73, %102 : vector<16x128xf32>
    %c-1_i32_49 = arith.constant -1 : i32
    %104 = vector.broadcast %c-1_i32_49 : i32 to vector<16x1xi32>
    %105 = arith.addi %41, %104 : vector<16x1xi32>
    %c0_i32_50 = arith.constant 0 : i32
    %106 = vector.broadcast %c0_i32_50 : i32 to vector<16x1xi32>
    %107 = arith.cmpi sge, %105, %106 : vector<16x1xi32>
    %c-1_i32_51 = arith.constant -1 : i32
    %108 = vector.broadcast %c-1_i32_51 : i32 to vector<16x1xi32>
    %109 = arith.addi %41, %108 : vector<16x1xi32>
    %c8_i32_52 = arith.constant 8 : i32
    %110 = vector.broadcast %c8_i32_52 : i32 to vector<16x1xi32>
    %111 = arith.cmpi slt, %109, %110 : vector<16x1xi32>
    %112 = arith.andi %107, %111 : vector<16x1xi1>
    %c1_i32 = arith.constant 1 : i32
    %113 = vector.broadcast %c1_i32 : i32 to vector<16x1xi32>
    %114 = arith.addi %42, %113 : vector<16x1xi32>
    %c0_i32_53 = arith.constant 0 : i32
    %115 = vector.broadcast %c0_i32_53 : i32 to vector<16x1xi32>
    %116 = arith.cmpi sge, %114, %115 : vector<16x1xi32>
    %117 = arith.andi %112, %116 : vector<16x1xi1>
    %c1_i32_54 = arith.constant 1 : i32
    %118 = vector.broadcast %c1_i32_54 : i32 to vector<16x1xi32>
    %119 = arith.addi %42, %118 : vector<16x1xi32>
    %c8_i32_55 = arith.constant 8 : i32
    %120 = vector.broadcast %c8_i32_55 : i32 to vector<16x1xi32>
    %121 = arith.cmpi slt, %119, %120 : vector<16x1xi32>
    %122 = arith.andi %117, %121 : vector<16x1xi1>
    %cst_56 = arith.constant 1.000000e+00 : f32
    %cst_57 = arith.constant 0.000000e+00 : f32
    %123 = vector.broadcast %cst_56 : f32 to vector<16x1xf32>
    %124 = vector.broadcast %cst_57 : f32 to vector<16x1xf32>
    %125 = arith.select %122, %123, %124 : vector<16x1xi1>, vector<16x1xf32>
    %c9 = arith.constant 9 : index
    %c0_58 = arith.constant 0 : index
    %126 = vector.load %arg11[%c9, %c0_58] : memref<48x128xbf16, #tpu.memory_space<vmem>>, vector<16x128xbf16>
    %127 = arith.truncf %125 : vector<16x1xf32> to vector<16x1xbf16>
    %128 = vector.broadcast %127 : vector<16x1xbf16> to vector<16x128xbf16>
    %129 = arith.mulf %126, %128 : vector<16x128xbf16>
    %c2 = arith.constant 2 : index
    %c0_59 = arith.constant 0 : index
    %c0_60 = arith.constant 0 : index
    %130 = vector.load %arg8[%c2, %c0_59, %c0_60] : memref<9x128x128xbf16, #tpu.memory_space<vmem>>, vector<1x128x128xbf16>
    %131 = vector.shape_cast %130 : vector<1x128x128xbf16> to vector<128x128xbf16>
    %cst_61 = arith.constant dense<0.000000e+00> : vector<16x128xf32>
    %132 = tpu.matmul %129, %131, %cst_61 {dimension_numbers = #tpu.dot_dimension_numbers<[1], [0], [0], [1], [0, 0, 1, 1], [], []>} : vector<16x128xbf16>, vector<128x128xbf16>, vector<16x128xf32> -> vector<16x128xf32>
    %133 = arith.addf %103, %132 : vector<16x128xf32>
    %c0_i32_62 = arith.constant 0 : i32
    %134 = vector.broadcast %c0_i32_62 : i32 to vector<16x1xi32>
    %135 = arith.addi %41, %134 : vector<16x1xi32>
    %c0_i32_63 = arith.constant 0 : i32
    %136 = vector.broadcast %c0_i32_63 : i32 to vector<16x1xi32>
    %137 = arith.cmpi sge, %135, %136 : vector<16x1xi32>
    %c0_i32_64 = arith.constant 0 : i32
    %138 = vector.broadcast %c0_i32_64 : i32 to vector<16x1xi32>
    %139 = arith.addi %41, %138 : vector<16x1xi32>
    %c8_i32_65 = arith.constant 8 : i32
    %140 = vector.broadcast %c8_i32_65 : i32 to vector<16x1xi32>
    %141 = arith.cmpi slt, %139, %140 : vector<16x1xi32>
    %142 = arith.andi %137, %141 : vector<16x1xi1>
    %c-1_i32_66 = arith.constant -1 : i32
    %143 = vector.broadcast %c-1_i32_66 : i32 to vector<16x1xi32>
    %144 = arith.addi %42, %143 : vector<16x1xi32>
    %c0_i32_67 = arith.constant 0 : i32
    %145 = vector.broadcast %c0_i32_67 : i32 to vector<16x1xi32>
    %146 = arith.cmpi sge, %144, %145 : vector<16x1xi32>
    %147 = arith.andi %142, %146 : vector<16x1xi1>
    %c-1_i32_68 = arith.constant -1 : i32
    %148 = vector.broadcast %c-1_i32_68 : i32 to vector<16x1xi32>
    %149 = arith.addi %42, %148 : vector<16x1xi32>
    %c8_i32_69 = arith.constant 8 : i32
    %150 = vector.broadcast %c8_i32_69 : i32 to vector<16x1xi32>
    %151 = arith.cmpi slt, %149, %150 : vector<16x1xi32>
    %152 = arith.andi %147, %151 : vector<16x1xi1>
    %cst_70 = arith.constant 1.000000e+00 : f32
    %cst_71 = arith.constant 0.000000e+00 : f32
    %153 = vector.broadcast %cst_70 : f32 to vector<16x1xf32>
    %154 = vector.broadcast %cst_71 : f32 to vector<16x1xf32>
    %155 = arith.select %152, %153, %154 : vector<16x1xi1>, vector<16x1xf32>
    %c15 = arith.constant 15 : index
    %c0_72 = arith.constant 0 : index
    %156 = vector.load %arg11[%c15, %c0_72] : memref<48x128xbf16, #tpu.memory_space<vmem>>, vector<16x128xbf16>
    %157 = arith.truncf %155 : vector<16x1xf32> to vector<16x1xbf16>
    %158 = vector.broadcast %157 : vector<16x1xbf16> to vector<16x128xbf16>
    %159 = arith.mulf %156, %158 : vector<16x128xbf16>
    %c3 = arith.constant 3 : index
    %c0_73 = arith.constant 0 : index
    %c0_74 = arith.constant 0 : index
    %160 = vector.load %arg8[%c3, %c0_73, %c0_74] : memref<9x128x128xbf16, #tpu.memory_space<vmem>>, vector<1x128x128xbf16>
    %161 = vector.shape_cast %160 : vector<1x128x128xbf16> to vector<128x128xbf16>
    %cst_75 = arith.constant dense<0.000000e+00> : vector<16x128xf32>
    %162 = tpu.matmul %159, %161, %cst_75 {dimension_numbers = #tpu.dot_dimension_numbers<[1], [0], [0], [1], [0, 0, 1, 1], [], []>} : vector<16x128xbf16>, vector<128x128xbf16>, vector<16x128xf32> -> vector<16x128xf32>
    %163 = arith.addf %133, %162 : vector<16x128xf32>
    %c0_i32_76 = arith.constant 0 : i32
    %164 = vector.broadcast %c0_i32_76 : i32 to vector<16x1xi32>
    %165 = arith.addi %41, %164 : vector<16x1xi32>
    %c0_i32_77 = arith.constant 0 : i32
    %166 = vector.broadcast %c0_i32_77 : i32 to vector<16x1xi32>
    %167 = arith.cmpi sge, %165, %166 : vector<16x1xi32>
    %c0_i32_78 = arith.constant 0 : i32
    %168 = vector.broadcast %c0_i32_78 : i32 to vector<16x1xi32>
    %169 = arith.addi %41, %168 : vector<16x1xi32>
    %c8_i32_79 = arith.constant 8 : i32
    %170 = vector.broadcast %c8_i32_79 : i32 to vector<16x1xi32>
    %171 = arith.cmpi slt, %169, %170 : vector<16x1xi32>
    %172 = arith.andi %167, %171 : vector<16x1xi1>
    %c0_i32_80 = arith.constant 0 : i32
    %173 = vector.broadcast %c0_i32_80 : i32 to vector<16x1xi32>
    %174 = arith.addi %42, %173 : vector<16x1xi32>
    %c0_i32_81 = arith.constant 0 : i32
    %175 = vector.broadcast %c0_i32_81 : i32 to vector<16x1xi32>
    %176 = arith.cmpi sge, %174, %175 : vector<16x1xi32>
    %177 = arith.andi %172, %176 : vector<16x1xi1>
    %c0_i32_82 = arith.constant 0 : i32
    %178 = vector.broadcast %c0_i32_82 : i32 to vector<16x1xi32>
    %179 = arith.addi %42, %178 : vector<16x1xi32>
    %c8_i32_83 = arith.constant 8 : i32
    %180 = vector.broadcast %c8_i32_83 : i32 to vector<16x1xi32>
    %181 = arith.cmpi slt, %179, %180 : vector<16x1xi32>
    %182 = arith.andi %177, %181 : vector<16x1xi1>
    %cst_84 = arith.constant 1.000000e+00 : f32
    %cst_85 = arith.constant 0.000000e+00 : f32
    %183 = vector.broadcast %cst_84 : f32 to vector<16x1xf32>
    %184 = vector.broadcast %cst_85 : f32 to vector<16x1xf32>
    %185 = arith.select %182, %183, %184 : vector<16x1xi1>, vector<16x1xf32>
    %c16_86 = arith.constant 16 : index
    %c0_87 = arith.constant 0 : index
    %186 = vector.load %arg11[%c16_86, %c0_87] : memref<48x128xbf16, #tpu.memory_space<vmem>>, vector<16x128xbf16>
    %187 = arith.truncf %185 : vector<16x1xf32> to vector<16x1xbf16>
    %188 = vector.broadcast %187 : vector<16x1xbf16> to vector<16x128xbf16>
    %189 = arith.mulf %186, %188 : vector<16x128xbf16>
    %c4 = arith.constant 4 : index
    %c0_88 = arith.constant 0 : index
    %c0_89 = arith.constant 0 : index
    %190 = vector.load %arg8[%c4, %c0_88, %c0_89] : memref<9x128x128xbf16, #tpu.memory_space<vmem>>, vector<1x128x128xbf16>
    %191 = vector.shape_cast %190 : vector<1x128x128xbf16> to vector<128x128xbf16>
    %cst_90 = arith.constant dense<0.000000e+00> : vector<16x128xf32>
    %192 = tpu.matmul %189, %191, %cst_90 {dimension_numbers = #tpu.dot_dimension_numbers<[1], [0], [0], [1], [0, 0, 1, 1], [], []>} : vector<16x128xbf16>, vector<128x128xbf16>, vector<16x128xf32> -> vector<16x128xf32>
    %193 = arith.addf %163, %192 : vector<16x128xf32>
    %c0_i32_91 = arith.constant 0 : i32
    %194 = vector.broadcast %c0_i32_91 : i32 to vector<16x1xi32>
    %195 = arith.addi %41, %194 : vector<16x1xi32>
    %c0_i32_92 = arith.constant 0 : i32
    %196 = vector.broadcast %c0_i32_92 : i32 to vector<16x1xi32>
    %197 = arith.cmpi sge, %195, %196 : vector<16x1xi32>
    %c0_i32_93 = arith.constant 0 : i32
    %198 = vector.broadcast %c0_i32_93 : i32 to vector<16x1xi32>
    %199 = arith.addi %41, %198 : vector<16x1xi32>
    %c8_i32_94 = arith.constant 8 : i32
    %200 = vector.broadcast %c8_i32_94 : i32 to vector<16x1xi32>
    %201 = arith.cmpi slt, %199, %200 : vector<16x1xi32>
    %202 = arith.andi %197, %201 : vector<16x1xi1>
    %c1_i32_95 = arith.constant 1 : i32
    %203 = vector.broadcast %c1_i32_95 : i32 to vector<16x1xi32>
    %204 = arith.addi %42, %203 : vector<16x1xi32>
    %c0_i32_96 = arith.constant 0 : i32
    %205 = vector.broadcast %c0_i32_96 : i32 to vector<16x1xi32>
    %206 = arith.cmpi sge, %204, %205 : vector<16x1xi32>
    %207 = arith.andi %202, %206 : vector<16x1xi1>
    %c1_i32_97 = arith.constant 1 : i32
    %208 = vector.broadcast %c1_i32_97 : i32 to vector<16x1xi32>
    %209 = arith.addi %42, %208 : vector<16x1xi32>
    %c8_i32_98 = arith.constant 8 : i32
    %210 = vector.broadcast %c8_i32_98 : i32 to vector<16x1xi32>
    %211 = arith.cmpi slt, %209, %210 : vector<16x1xi32>
    %212 = arith.andi %207, %211 : vector<16x1xi1>
    %cst_99 = arith.constant 1.000000e+00 : f32
    %cst_100 = arith.constant 0.000000e+00 : f32
    %213 = vector.broadcast %cst_99 : f32 to vector<16x1xf32>
    %214 = vector.broadcast %cst_100 : f32 to vector<16x1xf32>
    %215 = arith.select %212, %213, %214 : vector<16x1xi1>, vector<16x1xf32>
    %c17 = arith.constant 17 : index
    %c0_101 = arith.constant 0 : index
    %216 = vector.load %arg11[%c17, %c0_101] : memref<48x128xbf16, #tpu.memory_space<vmem>>, vector<16x128xbf16>
    %217 = arith.truncf %215 : vector<16x1xf32> to vector<16x1xbf16>
    %218 = vector.broadcast %217 : vector<16x1xbf16> to vector<16x128xbf16>
    %219 = arith.mulf %216, %218 : vector<16x128xbf16>
    %c5 = arith.constant 5 : index
    %c0_102 = arith.constant 0 : index
    %c0_103 = arith.constant 0 : index
    %220 = vector.load %arg8[%c5, %c0_102, %c0_103] : memref<9x128x128xbf16, #tpu.memory_space<vmem>>, vector<1x128x128xbf16>
    %221 = vector.shape_cast %220 : vector<1x128x128xbf16> to vector<128x128xbf16>
    %cst_104 = arith.constant dense<0.000000e+00> : vector<16x128xf32>
    %222 = tpu.matmul %219, %221, %cst_104 {dimension_numbers = #tpu.dot_dimension_numbers<[1], [0], [0], [1], [0, 0, 1, 1], [], []>} : vector<16x128xbf16>, vector<128x128xbf16>, vector<16x128xf32> -> vector<16x128xf32>
    %223 = arith.addf %193, %222 : vector<16x128xf32>
    %c1_i32_105 = arith.constant 1 : i32
    %224 = vector.broadcast %c1_i32_105 : i32 to vector<16x1xi32>
    %225 = arith.addi %41, %224 : vector<16x1xi32>
    %c0_i32_106 = arith.constant 0 : i32
    %226 = vector.broadcast %c0_i32_106 : i32 to vector<16x1xi32>
    %227 = arith.cmpi sge, %225, %226 : vector<16x1xi32>
    %c1_i32_107 = arith.constant 1 : i32
    %228 = vector.broadcast %c1_i32_107 : i32 to vector<16x1xi32>
    %229 = arith.addi %41, %228 : vector<16x1xi32>
    %c8_i32_108 = arith.constant 8 : i32
    %230 = vector.broadcast %c8_i32_108 : i32 to vector<16x1xi32>
    %231 = arith.cmpi slt, %229, %230 : vector<16x1xi32>
    %232 = arith.andi %227, %231 : vector<16x1xi1>
    %c-1_i32_109 = arith.constant -1 : i32
    %233 = vector.broadcast %c-1_i32_109 : i32 to vector<16x1xi32>
    %234 = arith.addi %42, %233 : vector<16x1xi32>
    %c0_i32_110 = arith.constant 0 : i32
    %235 = vector.broadcast %c0_i32_110 : i32 to vector<16x1xi32>
    %236 = arith.cmpi sge, %234, %235 : vector<16x1xi32>
    %237 = arith.andi %232, %236 : vector<16x1xi1>
    %c-1_i32_111 = arith.constant -1 : i32
    %238 = vector.broadcast %c-1_i32_111 : i32 to vector<16x1xi32>
    %239 = arith.addi %42, %238 : vector<16x1xi32>
    %c8_i32_112 = arith.constant 8 : i32
    %240 = vector.broadcast %c8_i32_112 : i32 to vector<16x1xi32>
    %241 = arith.cmpi slt, %239, %240 : vector<16x1xi32>
    %242 = arith.andi %237, %241 : vector<16x1xi1>
    %cst_113 = arith.constant 1.000000e+00 : f32
    %cst_114 = arith.constant 0.000000e+00 : f32
    %243 = vector.broadcast %cst_113 : f32 to vector<16x1xf32>
    %244 = vector.broadcast %cst_114 : f32 to vector<16x1xf32>
    %245 = arith.select %242, %243, %244 : vector<16x1xi1>, vector<16x1xf32>
    %c23 = arith.constant 23 : index
    %c0_115 = arith.constant 0 : index
    %246 = vector.load %arg11[%c23, %c0_115] : memref<48x128xbf16, #tpu.memory_space<vmem>>, vector<16x128xbf16>
    %247 = arith.truncf %245 : vector<16x1xf32> to vector<16x1xbf16>
    %248 = vector.broadcast %247 : vector<16x1xbf16> to vector<16x128xbf16>
    %249 = arith.mulf %246, %248 : vector<16x128xbf16>
    %c6 = arith.constant 6 : index
    %c0_116 = arith.constant 0 : index
    %c0_117 = arith.constant 0 : index
    %250 = vector.load %arg8[%c6, %c0_116, %c0_117] : memref<9x128x128xbf16, #tpu.memory_space<vmem>>, vector<1x128x128xbf16>
    %251 = vector.shape_cast %250 : vector<1x128x128xbf16> to vector<128x128xbf16>
    %cst_118 = arith.constant dense<0.000000e+00> : vector<16x128xf32>
    %252 = tpu.matmul %249, %251, %cst_118 {dimension_numbers = #tpu.dot_dimension_numbers<[1], [0], [0], [1], [0, 0, 1, 1], [], []>} : vector<16x128xbf16>, vector<128x128xbf16>, vector<16x128xf32> -> vector<16x128xf32>
    %253 = arith.addf %223, %252 : vector<16x128xf32>
    %c1_i32_119 = arith.constant 1 : i32
    %254 = vector.broadcast %c1_i32_119 : i32 to vector<16x1xi32>
    %255 = arith.addi %41, %254 : vector<16x1xi32>
    %c0_i32_120 = arith.constant 0 : i32
    %256 = vector.broadcast %c0_i32_120 : i32 to vector<16x1xi32>
    %257 = arith.cmpi sge, %255, %256 : vector<16x1xi32>
    %c1_i32_121 = arith.constant 1 : i32
    %258 = vector.broadcast %c1_i32_121 : i32 to vector<16x1xi32>
    %259 = arith.addi %41, %258 : vector<16x1xi32>
    %c8_i32_122 = arith.constant 8 : i32
    %260 = vector.broadcast %c8_i32_122 : i32 to vector<16x1xi32>
    %261 = arith.cmpi slt, %259, %260 : vector<16x1xi32>
    %262 = arith.andi %257, %261 : vector<16x1xi1>
    %c0_i32_123 = arith.constant 0 : i32
    %263 = vector.broadcast %c0_i32_123 : i32 to vector<16x1xi32>
    %264 = arith.addi %42, %263 : vector<16x1xi32>
    %c0_i32_124 = arith.constant 0 : i32
    %265 = vector.broadcast %c0_i32_124 : i32 to vector<16x1xi32>
    %266 = arith.cmpi sge, %264, %265 : vector<16x1xi32>
    %267 = arith.andi %262, %266 : vector<16x1xi1>
    %c0_i32_125 = arith.constant 0 : i32
    %268 = vector.broadcast %c0_i32_125 : i32 to vector<16x1xi32>
    %269 = arith.addi %42, %268 : vector<16x1xi32>
    %c8_i32_126 = arith.constant 8 : i32
    %270 = vector.broadcast %c8_i32_126 : i32 to vector<16x1xi32>
    %271 = arith.cmpi slt, %269, %270 : vector<16x1xi32>
    %272 = arith.andi %267, %271 : vector<16x1xi1>
    %cst_127 = arith.constant 1.000000e+00 : f32
    %cst_128 = arith.constant 0.000000e+00 : f32
    %273 = vector.broadcast %cst_127 : f32 to vector<16x1xf32>
    %274 = vector.broadcast %cst_128 : f32 to vector<16x1xf32>
    %275 = arith.select %272, %273, %274 : vector<16x1xi1>, vector<16x1xf32>
    %c24 = arith.constant 24 : index
    %c0_129 = arith.constant 0 : index
    %276 = vector.load %arg11[%c24, %c0_129] : memref<48x128xbf16, #tpu.memory_space<vmem>>, vector<16x128xbf16>
    %277 = arith.truncf %275 : vector<16x1xf32> to vector<16x1xbf16>
    %278 = vector.broadcast %277 : vector<16x1xbf16> to vector<16x128xbf16>
    %279 = arith.mulf %276, %278 : vector<16x128xbf16>
    %c7_130 = arith.constant 7 : index
    %c0_131 = arith.constant 0 : index
    %c0_132 = arith.constant 0 : index
    %280 = vector.load %arg8[%c7_130, %c0_131, %c0_132] : memref<9x128x128xbf16, #tpu.memory_space<vmem>>, vector<1x128x128xbf16>
    %281 = vector.shape_cast %280 : vector<1x128x128xbf16> to vector<128x128xbf16>
    %cst_133 = arith.constant dense<0.000000e+00> : vector<16x128xf32>
    %282 = tpu.matmul %279, %281, %cst_133 {dimension_numbers = #tpu.dot_dimension_numbers<[1], [0], [0], [1], [0, 0, 1, 1], [], []>} : vector<16x128xbf16>, vector<128x128xbf16>, vector<16x128xf32> -> vector<16x128xf32>
    %283 = arith.addf %253, %282 : vector<16x128xf32>
    %c1_i32_134 = arith.constant 1 : i32
    %284 = vector.broadcast %c1_i32_134 : i32 to vector<16x1xi32>
    %285 = arith.addi %41, %284 : vector<16x1xi32>
    %c0_i32_135 = arith.constant 0 : i32
    %286 = vector.broadcast %c0_i32_135 : i32 to vector<16x1xi32>
    %287 = arith.cmpi sge, %285, %286 : vector<16x1xi32>
    %c1_i32_136 = arith.constant 1 : i32
    %288 = vector.broadcast %c1_i32_136 : i32 to vector<16x1xi32>
    %289 = arith.addi %41, %288 : vector<16x1xi32>
    %c8_i32_137 = arith.constant 8 : i32
    %290 = vector.broadcast %c8_i32_137 : i32 to vector<16x1xi32>
    %291 = arith.cmpi slt, %289, %290 : vector<16x1xi32>
    %292 = arith.andi %287, %291 : vector<16x1xi1>
    %c1_i32_138 = arith.constant 1 : i32
    %293 = vector.broadcast %c1_i32_138 : i32 to vector<16x1xi32>
    %294 = arith.addi %42, %293 : vector<16x1xi32>
    %c0_i32_139 = arith.constant 0 : i32
    %295 = vector.broadcast %c0_i32_139 : i32 to vector<16x1xi32>
    %296 = arith.cmpi sge, %294, %295 : vector<16x1xi32>
    %297 = arith.andi %292, %296 : vector<16x1xi1>
    %c1_i32_140 = arith.constant 1 : i32
    %298 = vector.broadcast %c1_i32_140 : i32 to vector<16x1xi32>
    %299 = arith.addi %42, %298 : vector<16x1xi32>
    %c8_i32_141 = arith.constant 8 : i32
    %300 = vector.broadcast %c8_i32_141 : i32 to vector<16x1xi32>
    %301 = arith.cmpi slt, %299, %300 : vector<16x1xi32>
    %302 = arith.andi %297, %301 : vector<16x1xi1>
    %cst_142 = arith.constant 1.000000e+00 : f32
    %cst_143 = arith.constant 0.000000e+00 : f32
    %303 = vector.broadcast %cst_142 : f32 to vector<16x1xf32>
    %304 = vector.broadcast %cst_143 : f32 to vector<16x1xf32>
    %305 = arith.select %302, %303, %304 : vector<16x1xi1>, vector<16x1xf32>
    %c25 = arith.constant 25 : index
    %c0_144 = arith.constant 0 : index
    %306 = vector.load %arg11[%c25, %c0_144] : memref<48x128xbf16, #tpu.memory_space<vmem>>, vector<16x128xbf16>
    %307 = arith.truncf %305 : vector<16x1xf32> to vector<16x1xbf16>
    %308 = vector.broadcast %307 : vector<16x1xbf16> to vector<16x128xbf16>
    %309 = arith.mulf %306, %308 : vector<16x128xbf16>
    %c8_145 = arith.constant 8 : index
    %c0_146 = arith.constant 0 : index
    %c0_147 = arith.constant 0 : index
    %310 = vector.load %arg8[%c8_145, %c0_146, %c0_147] : memref<9x128x128xbf16, #tpu.memory_space<vmem>>, vector<1x128x128xbf16>
    %311 = vector.shape_cast %310 : vector<1x128x128xbf16> to vector<128x128xbf16>
    %cst_148 = arith.constant dense<0.000000e+00> : vector<16x128xf32>
    %312 = tpu.matmul %309, %311, %cst_148 {dimension_numbers = #tpu.dot_dimension_numbers<[1], [0], [0], [1], [0, 0, 1, 1], [], []>} : vector<16x128xbf16>, vector<128x128xbf16>, vector<16x128xf32> -> vector<16x128xf32>
    %313 = arith.addf %283, %312 : vector<16x128xf32>
    %314 = arith.truncf %313 : vector<16x128xf32> to vector<16x128xbf16>
    %c0_149 = arith.constant 0 : index
    %c0_150 = arith.constant 0 : index
    %315 = vector.load %arg9[%c0_149, %c0_150] : memref<16x128xbf16, #tpu.memory_space<vmem>>, vector<16x128xbf16>
    tpu.vector_store %arg9[%c0_149, %c0_150], %314 {strides = array<i32>} : memref<16x128xbf16, #tpu.memory_space<vmem>>, vector<16x128xbf16>,
    %c16_i32 = arith.constant 16 : i32
    %316 = arith.muli %arg0, %c16_i32 : i32
    %c128_i32 = arith.constant 128 : i32
    %317 = arith.subi %c128_i32, %316 : i32
    %c16_i32_151 = arith.constant 16 : i32
    %318 = arith.minsi %c16_i32_151, %317 : i32
    %319 = arith.sitofp %318 : i32 to f32
    %cst_152 = arith.constant dense<0.000000e+00> : vector<128xf32>
    %320 = vector.multi_reduction <add>, %313, %cst_152 [0] : vector<16x128xf32> to vector<128xf32>
    %321 = vector.shape_cast %320 : vector<128xf32> to vector<1x128xf32>
    %322 = vector.broadcast %319 : f32 to vector<1x128xf32>
    %323 = arith.divf %321, %322 : vector<1x128xf32>
    %324 = vector.broadcast %323 : vector<1x128xf32> to vector<16x128xf32>
    %325 = arith.subf %313, %324 : vector<16x128xf32>
    %326 = vector.broadcast %185 : vector<16x1xf32> to vector<16x128xf32>
    %327 = arith.mulf %325, %326 : vector<16x128xf32>
    %328 = arith.mulf %327, %327 : vector<16x128xf32>
    %cst_153 = arith.constant dense<0.000000e+00> : vector<128xf32>
    %329 = vector.multi_reduction <add>, %328, %cst_153 [0] : vector<16x128xf32> to vector<128xf32>
    %330 = vector.shape_cast %329 : vector<128xf32> to vector<1x128xf32>
    %331 = tpu.concatenate %321, %330 in 0 : vector<1x128xf32>, vector<1x128xf32> -> vector<2x128xf32>
    %332 = vector.shape_cast %331 : vector<2x128xf32> to vector<1x2x128xf32>
    %c0_154 = arith.constant 0 : index
    %c0_155 = arith.constant 0 : index
    %c0_156 = arith.constant 0 : index
    %333 = vector.load %arg10[%c0_154, %c0_155, %c0_156] : memref<1x2x128xf32, #tpu.memory_space<vmem>>, vector<1x2x128xf32>
    tpu.vector_store %arg10[%c0_154, %c0_155, %c0_156], %332 {strides = array<i32>} : memref<1x2x128xf32, #tpu.memory_space<vmem>>, vector<1x2x128xf32>,
    return
  }
  func.func @transform_0(%arg0: i32) -> (i32, i32) {
    %c0_i32 = arith.constant 0 : i32
    %c0_i32_0 = arith.constant 0 : i32
    return %arg0, %c0_i32 : i32, i32
  }
  func.func @transform_1(%arg0: i32) -> (i32, i32) {
    %c1_i32 = arith.constant 1 : i32
    %0 = arith.muli %arg0, %c1_i32 : i32
    %c1_i32_0 = arith.constant 1 : i32
    %1 = arith.subi %0, %c1_i32_0 : i32
    %c0_i32 = arith.constant 0 : i32
    %2 = arith.maxsi %1, %c0_i32 : i32
    %c0_i32_1 = arith.constant 0 : i32
    %c0_i32_2 = arith.constant 0 : i32
    return %2, %c0_i32_1 : i32, i32
  }
  func.func @transform_2(%arg0: i32) -> (i32, i32) {
    %c1_i32 = arith.constant 1 : i32
    %0 = arith.addi %arg0, %c1_i32 : i32
    %c1_i32_0 = arith.constant 1 : i32
    %1 = arith.muli %0, %c1_i32_0 : i32
    %c7_i32 = arith.constant 7 : i32
    %2 = arith.minsi %1, %c7_i32 : i32
    %c0_i32 = arith.constant 0 : i32
    %c0_i32_1 = arith.constant 0 : i32
    return %2, %c0_i32 : i32, i32
  }
  func.func @transform_3(%arg0: i32) -> (i32, i32) {
    %c0_i32 = arith.constant 0 : i32
    %c0_i32_0 = arith.constant 0 : i32
    return %arg0, %c0_i32 : i32, i32
  }
  func.func @transform_4(%arg0: i32) -> (i32, i32) {
    %c0_i32 = arith.constant 0 : i32
    %c0_i32_0 = arith.constant 0 : i32
    return %arg0, %c0_i32 : i32, i32
  }
  func.func @transform_5(%arg0: i32) -> (i32, i32) {
    %c0_i32 = arith.constant 0 : i32
    %c0_i32_0 = arith.constant 0 : i32
    %c0_i32_1 = arith.constant 0 : i32
    return %c0_i32, %c0_i32_0 : i32, i32
  }
  func.func @transform_6(%arg0: i32) -> (i32, i32) {
    %c0_i32 = arith.constant 0 : i32
    %c0_i32_0 = arith.constant 0 : i32
    %c0_i32_1 = arith.constant 0 : i32
    return %c0_i32, %c0_i32_0 : i32, i32
  }
  func.func @transform_7(%arg0: i32) -> (i32, i32, i32) {
    %c0_i32 = arith.constant 0 : i32
    %c0_i32_0 = arith.constant 0 : i32
    %c0_i32_1 = arith.constant 0 : i32
    %c0_i32_2 = arith.constant 0 : i32
    return %c0_i32, %c0_i32_0, %c0_i32_1 : i32, i32, i32
  }
  func.func @transform_8(%arg0: i32) -> (i32, i32) {
    %c0_i32 = arith.constant 0 : i32
    %c0_i32_0 = arith.constant 0 : i32
    return %arg0, %c0_i32 : i32, i32
  }
  func.func @transform_9(%arg0: i32) -> (i32, i32, i32) {
    %c0_i32 = arith.constant 0 : i32
    %c0_i32_0 = arith.constant 0 : i32
    %c0_i32_1 = arith.constant 0 : i32
    return %arg0, %c0_i32, %c0_i32_0 : i32, i32, i32
  }
}

module attributes {stable_mosaic.version = 11 : i64} {
  func.func @pass1_kernel(%arg0: i32, %arg1: memref<16x128xbf16, #tpu.memory_space<vmem>>, %arg2: memref<16x128xbf16, #tpu.memory_space<vmem>>, %arg3: memref<16x128xbf16, #tpu.memory_space<vmem>>, %arg4: memref<16x1xi32, #tpu.memory_space<vmem>>, %arg5: memref<16x1xi32, #tpu.memory_space<vmem>>, %arg6: memref<9x128x128xbf16, #tpu.memory_space<vmem>>, %arg7: memref<128x128xbf16, #tpu.memory_space<vmem>>, %arg8: memref<16x128xbf16, #tpu.memory_space<vmem>>, %arg9: memref<16x128xbf16, #tpu.memory_space<vmem>>, %arg10: memref<1x2x128xf32, #tpu.memory_space<vmem>>, %arg11: memref<1x2x128xf32, #tpu.memory_space<vmem>>, %arg12: memref<48x128xbf16, #tpu.memory_space<vmem>>) attributes {dimension_semantics = [#tpu.dimension_semantics<parallel>], iteration_bounds = array<i64: 8>, scalar_prefetch = 0 : i64, scratch_operands = 1 : i64, tpu.core_type = #tpu.core_type<tc>, window_params = [{transform_indices = @transform_0, window_bounds = array<i64: 16, 128>}, {transform_indices = @transform_1, window_bounds = array<i64: 16, 128>}, {transform_indices = @transform_2, window_bounds = array<i64: 16, 128>}, {transform_indices = @transform_3, window_bounds = array<i64: 16, 1>}, {transform_indices = @transform_4, window_bounds = array<i64: 16, 1>}, {pipeline_mode = #tpu.pipeline_mode<synchronous>, transform_indices = @transform_5, window_bounds = array<i64: 9, 128, 128>}, {pipeline_mode = #tpu.pipeline_mode<synchronous>, transform_indices = @transform_6, window_bounds = array<i64: 128, 128>}, {transform_indices = @transform_7, window_bounds = array<i64: 16, 128>}, {transform_indices = @transform_8, window_bounds = array<i64: 16, 128>}, {transform_indices = @transform_9, window_bounds = array<i64: 1, 2, 128>}, {transform_indices = @transform_10, window_bounds = array<i64: 1, 2, 128>}]} {
    %c0 = arith.constant 0 : index
    %c0_0 = arith.constant 0 : index
    %0 = vector.load %arg2[%c0, %c0_0] : memref<16x128xbf16, #tpu.memory_space<vmem>>, vector<16x128xbf16>
    %c0_1 = arith.constant 0 : index
    %c0_2 = arith.constant 0 : index
    %1 = vector.load %arg12[%c0_1, %c0_2] : memref<48x128xbf16, #tpu.memory_space<vmem>>, vector<16x128xbf16>
    tpu.vector_store %arg12[%c0_1, %c0_2], %0 {strides = array<i32>} : memref<48x128xbf16, #tpu.memory_space<vmem>>, vector<16x128xbf16>,
    %c0_3 = arith.constant 0 : index
    %c0_4 = arith.constant 0 : index
    %2 = vector.load %arg1[%c0_3, %c0_4] : memref<16x128xbf16, #tpu.memory_space<vmem>>, vector<16x128xbf16>
    %c16 = arith.constant 16 : index
    %c0_5 = arith.constant 0 : index
    %3 = vector.load %arg12[%c16, %c0_5] : memref<48x128xbf16, #tpu.memory_space<vmem>>, vector<16x128xbf16>
    tpu.vector_store %arg12[%c16, %c0_5], %2 {strides = array<i32>} : memref<48x128xbf16, #tpu.memory_space<vmem>>, vector<16x128xbf16>,
    %c0_6 = arith.constant 0 : index
    %c0_7 = arith.constant 0 : index
    %4 = vector.load %arg3[%c0_6, %c0_7] : memref<16x128xbf16, #tpu.memory_space<vmem>>, vector<16x128xbf16>
    %c32 = arith.constant 32 : index
    %c0_8 = arith.constant 0 : index
    %5 = vector.load %arg12[%c32, %c0_8] : memref<48x128xbf16, #tpu.memory_space<vmem>>, vector<16x128xbf16>
    tpu.vector_store %arg12[%c32, %c0_8], %4 {strides = array<i32>} : memref<48x128xbf16, #tpu.memory_space<vmem>>, vector<16x128xbf16>,
    %c0_9 = arith.constant 0 : index
    %c0_10 = arith.constant 0 : index
    %6 = vector.load %arg4[%c0_9, %c0_10] : memref<16x1xi32, #tpu.memory_space<vmem>>, vector<16x1xi32>
    %c0_11 = arith.constant 0 : index
    %c0_12 = arith.constant 0 : index
    %7 = vector.load %arg5[%c0_11, %c0_12] : memref<16x1xi32, #tpu.memory_space<vmem>>, vector<16x1xi32>
    %cst = arith.constant 0.000000e+00 : f32
    %8 = vector.broadcast %cst : f32 to vector<16x128xf32>
    %c-1_i32 = arith.constant -1 : i32
    %9 = vector.broadcast %c-1_i32 : i32 to vector<16x1xi32>
    %10 = arith.addi %6, %9 : vector<16x1xi32>
    %c0_i32 = arith.constant 0 : i32
    %11 = vector.broadcast %c0_i32 : i32 to vector<16x1xi32>
    %12 = arith.cmpi sge, %10, %11 : vector<16x1xi32>
    %c-1_i32_13 = arith.constant -1 : i32
    %13 = vector.broadcast %c-1_i32_13 : i32 to vector<16x1xi32>
    %14 = arith.addi %6, %13 : vector<16x1xi32>
    %c8_i32 = arith.constant 8 : i32
    %15 = vector.broadcast %c8_i32 : i32 to vector<16x1xi32>
    %16 = arith.cmpi slt, %14, %15 : vector<16x1xi32>
    %17 = arith.andi %12, %16 : vector<16x1xi1>
    %c-1_i32_14 = arith.constant -1 : i32
    %18 = vector.broadcast %c-1_i32_14 : i32 to vector<16x1xi32>
    %19 = arith.addi %7, %18 : vector<16x1xi32>
    %c0_i32_15 = arith.constant 0 : i32
    %20 = vector.broadcast %c0_i32_15 : i32 to vector<16x1xi32>
    %21 = arith.cmpi sge, %19, %20 : vector<16x1xi32>
    %22 = arith.andi %17, %21 : vector<16x1xi1>
    %c-1_i32_16 = arith.constant -1 : i32
    %23 = vector.broadcast %c-1_i32_16 : i32 to vector<16x1xi32>
    %24 = arith.addi %7, %23 : vector<16x1xi32>
    %c8_i32_17 = arith.constant 8 : i32
    %25 = vector.broadcast %c8_i32_17 : i32 to vector<16x1xi32>
    %26 = arith.cmpi slt, %24, %25 : vector<16x1xi32>
    %27 = arith.andi %22, %26 : vector<16x1xi1>
    %cst_18 = arith.constant 1.000000e+00 : f32
    %cst_19 = arith.constant 0.000000e+00 : f32
    %28 = vector.broadcast %cst_18 : f32 to vector<16x1xf32>
    %29 = vector.broadcast %cst_19 : f32 to vector<16x1xf32>
    %30 = arith.select %27, %28, %29 : vector<16x1xi1>, vector<16x1xf32>
    %c7 = arith.constant 7 : index
    %c0_20 = arith.constant 0 : index
    %31 = vector.load %arg12[%c7, %c0_20] : memref<48x128xbf16, #tpu.memory_space<vmem>>, vector<16x128xbf16>
    %32 = arith.truncf %30 : vector<16x1xf32> to vector<16x1xbf16>
    %33 = vector.broadcast %32 : vector<16x1xbf16> to vector<16x128xbf16>
    %34 = arith.mulf %31, %33 : vector<16x128xbf16>
    %c0_21 = arith.constant 0 : index
    %c0_22 = arith.constant 0 : index
    %c0_23 = arith.constant 0 : index
    %35 = vector.load %arg6[%c0_21, %c0_22, %c0_23] : memref<9x128x128xbf16, #tpu.memory_space<vmem>>, vector<1x128x128xbf16>
    %36 = vector.shape_cast %35 : vector<1x128x128xbf16> to vector<128x128xbf16>
    %cst_24 = arith.constant dense<0.000000e+00> : vector<16x128xf32>
    %37 = tpu.matmul %34, %36, %cst_24 {dimension_numbers = #tpu.dot_dimension_numbers<[1], [0], [0], [1], [0, 0, 1, 1], [], []>} : vector<16x128xbf16>, vector<128x128xbf16>, vector<16x128xf32> -> vector<16x128xf32>
    %38 = arith.addf %8, %37 : vector<16x128xf32>
    %c-1_i32_25 = arith.constant -1 : i32
    %39 = vector.broadcast %c-1_i32_25 : i32 to vector<16x1xi32>
    %40 = arith.addi %6, %39 : vector<16x1xi32>
    %c0_i32_26 = arith.constant 0 : i32
    %41 = vector.broadcast %c0_i32_26 : i32 to vector<16x1xi32>
    %42 = arith.cmpi sge, %40, %41 : vector<16x1xi32>
    %c-1_i32_27 = arith.constant -1 : i32
    %43 = vector.broadcast %c-1_i32_27 : i32 to vector<16x1xi32>
    %44 = arith.addi %6, %43 : vector<16x1xi32>
    %c8_i32_28 = arith.constant 8 : i32
    %45 = vector.broadcast %c8_i32_28 : i32 to vector<16x1xi32>
    %46 = arith.cmpi slt, %44, %45 : vector<16x1xi32>
    %47 = arith.andi %42, %46 : vector<16x1xi1>
    %c0_i32_29 = arith.constant 0 : i32
    %48 = vector.broadcast %c0_i32_29 : i32 to vector<16x1xi32>
    %49 = arith.addi %7, %48 : vector<16x1xi32>
    %c0_i32_30 = arith.constant 0 : i32
    %50 = vector.broadcast %c0_i32_30 : i32 to vector<16x1xi32>
    %51 = arith.cmpi sge, %49, %50 : vector<16x1xi32>
    %52 = arith.andi %47, %51 : vector<16x1xi1>
    %c0_i32_31 = arith.constant 0 : i32
    %53 = vector.broadcast %c0_i32_31 : i32 to vector<16x1xi32>
    %54 = arith.addi %7, %53 : vector<16x1xi32>
    %c8_i32_32 = arith.constant 8 : i32
    %55 = vector.broadcast %c8_i32_32 : i32 to vector<16x1xi32>
    %56 = arith.cmpi slt, %54, %55 : vector<16x1xi32>
    %57 = arith.andi %52, %56 : vector<16x1xi1>
    %cst_33 = arith.constant 1.000000e+00 : f32
    %cst_34 = arith.constant 0.000000e+00 : f32
    %58 = vector.broadcast %cst_33 : f32 to vector<16x1xf32>
    %59 = vector.broadcast %cst_34 : f32 to vector<16x1xf32>
    %60 = arith.select %57, %58, %59 : vector<16x1xi1>, vector<16x1xf32>
    %c8 = arith.constant 8 : index
    %c0_35 = arith.constant 0 : index
    %61 = vector.load %arg12[%c8, %c0_35] : memref<48x128xbf16, #tpu.memory_space<vmem>>, vector<16x128xbf16>
    %62 = arith.truncf %60 : vector<16x1xf32> to vector<16x1xbf16>
    %63 = vector.broadcast %62 : vector<16x1xbf16> to vector<16x128xbf16>
    %64 = arith.mulf %61, %63 : vector<16x128xbf16>
    %c1 = arith.constant 1 : index
    %c0_36 = arith.constant 0 : index
    %c0_37 = arith.constant 0 : index
    %65 = vector.load %arg6[%c1, %c0_36, %c0_37] : memref<9x128x128xbf16, #tpu.memory_space<vmem>>, vector<1x128x128xbf16>
    %66 = vector.shape_cast %65 : vector<1x128x128xbf16> to vector<128x128xbf16>
    %cst_38 = arith.constant dense<0.000000e+00> : vector<16x128xf32>
    %67 = tpu.matmul %64, %66, %cst_38 {dimension_numbers = #tpu.dot_dimension_numbers<[1], [0], [0], [1], [0, 0, 1, 1], [], []>} : vector<16x128xbf16>, vector<128x128xbf16>, vector<16x128xf32> -> vector<16x128xf32>
    %68 = arith.addf %38, %67 : vector<16x128xf32>
    %c-1_i32_39 = arith.constant -1 : i32
    %69 = vector.broadcast %c-1_i32_39 : i32 to vector<16x1xi32>
    %70 = arith.addi %6, %69 : vector<16x1xi32>
    %c0_i32_40 = arith.constant 0 : i32
    %71 = vector.broadcast %c0_i32_40 : i32 to vector<16x1xi32>
    %72 = arith.cmpi sge, %70, %71 : vector<16x1xi32>
    %c-1_i32_41 = arith.constant -1 : i32
    %73 = vector.broadcast %c-1_i32_41 : i32 to vector<16x1xi32>
    %74 = arith.addi %6, %73 : vector<16x1xi32>
    %c8_i32_42 = arith.constant 8 : i32
    %75 = vector.broadcast %c8_i32_42 : i32 to vector<16x1xi32>
    %76 = arith.cmpi slt, %74, %75 : vector<16x1xi32>
    %77 = arith.andi %72, %76 : vector<16x1xi1>
    %c1_i32 = arith.constant 1 : i32
    %78 = vector.broadcast %c1_i32 : i32 to vector<16x1xi32>
    %79 = arith.addi %7, %78 : vector<16x1xi32>
    %c0_i32_43 = arith.constant 0 : i32
    %80 = vector.broadcast %c0_i32_43 : i32 to vector<16x1xi32>
    %81 = arith.cmpi sge, %79, %80 : vector<16x1xi32>
    %82 = arith.andi %77, %81 : vector<16x1xi1>
    %c1_i32_44 = arith.constant 1 : i32
    %83 = vector.broadcast %c1_i32_44 : i32 to vector<16x1xi32>
    %84 = arith.addi %7, %83 : vector<16x1xi32>
    %c8_i32_45 = arith.constant 8 : i32
    %85 = vector.broadcast %c8_i32_45 : i32 to vector<16x1xi32>
    %86 = arith.cmpi slt, %84, %85 : vector<16x1xi32>
    %87 = arith.andi %82, %86 : vector<16x1xi1>
    %cst_46 = arith.constant 1.000000e+00 : f32
    %cst_47 = arith.constant 0.000000e+00 : f32
    %88 = vector.broadcast %cst_46 : f32 to vector<16x1xf32>
    %89 = vector.broadcast %cst_47 : f32 to vector<16x1xf32>
    %90 = arith.select %87, %88, %89 : vector<16x1xi1>, vector<16x1xf32>
    %c9 = arith.constant 9 : index
    %c0_48 = arith.constant 0 : index
    %91 = vector.load %arg12[%c9, %c0_48] : memref<48x128xbf16, #tpu.memory_space<vmem>>, vector<16x128xbf16>
    %92 = arith.truncf %90 : vector<16x1xf32> to vector<16x1xbf16>
    %93 = vector.broadcast %92 : vector<16x1xbf16> to vector<16x128xbf16>
    %94 = arith.mulf %91, %93 : vector<16x128xbf16>
    %c2 = arith.constant 2 : index
    %c0_49 = arith.constant 0 : index
    %c0_50 = arith.constant 0 : index
    %95 = vector.load %arg6[%c2, %c0_49, %c0_50] : memref<9x128x128xbf16, #tpu.memory_space<vmem>>, vector<1x128x128xbf16>
    %96 = vector.shape_cast %95 : vector<1x128x128xbf16> to vector<128x128xbf16>
    %cst_51 = arith.constant dense<0.000000e+00> : vector<16x128xf32>
    %97 = tpu.matmul %94, %96, %cst_51 {dimension_numbers = #tpu.dot_dimension_numbers<[1], [0], [0], [1], [0, 0, 1, 1], [], []>} : vector<16x128xbf16>, vector<128x128xbf16>, vector<16x128xf32> -> vector<16x128xf32>
    %98 = arith.addf %68, %97 : vector<16x128xf32>
    %c0_i32_52 = arith.constant 0 : i32
    %99 = vector.broadcast %c0_i32_52 : i32 to vector<16x1xi32>
    %100 = arith.addi %6, %99 : vector<16x1xi32>
    %c0_i32_53 = arith.constant 0 : i32
    %101 = vector.broadcast %c0_i32_53 : i32 to vector<16x1xi32>
    %102 = arith.cmpi sge, %100, %101 : vector<16x1xi32>
    %c0_i32_54 = arith.constant 0 : i32
    %103 = vector.broadcast %c0_i32_54 : i32 to vector<16x1xi32>
    %104 = arith.addi %6, %103 : vector<16x1xi32>
    %c8_i32_55 = arith.constant 8 : i32
    %105 = vector.broadcast %c8_i32_55 : i32 to vector<16x1xi32>
    %106 = arith.cmpi slt, %104, %105 : vector<16x1xi32>
    %107 = arith.andi %102, %106 : vector<16x1xi1>
    %c-1_i32_56 = arith.constant -1 : i32
    %108 = vector.broadcast %c-1_i32_56 : i32 to vector<16x1xi32>
    %109 = arith.addi %7, %108 : vector<16x1xi32>
    %c0_i32_57 = arith.constant 0 : i32
    %110 = vector.broadcast %c0_i32_57 : i32 to vector<16x1xi32>
    %111 = arith.cmpi sge, %109, %110 : vector<16x1xi32>
    %112 = arith.andi %107, %111 : vector<16x1xi1>
    %c-1_i32_58 = arith.constant -1 : i32
    %113 = vector.broadcast %c-1_i32_58 : i32 to vector<16x1xi32>
    %114 = arith.addi %7, %113 : vector<16x1xi32>
    %c8_i32_59 = arith.constant 8 : i32
    %115 = vector.broadcast %c8_i32_59 : i32 to vector<16x1xi32>
    %116 = arith.cmpi slt, %114, %115 : vector<16x1xi32>
    %117 = arith.andi %112, %116 : vector<16x1xi1>
    %cst_60 = arith.constant 1.000000e+00 : f32
    %cst_61 = arith.constant 0.000000e+00 : f32
    %118 = vector.broadcast %cst_60 : f32 to vector<16x1xf32>
    %119 = vector.broadcast %cst_61 : f32 to vector<16x1xf32>
    %120 = arith.select %117, %118, %119 : vector<16x1xi1>, vector<16x1xf32>
    %c15 = arith.constant 15 : index
    %c0_62 = arith.constant 0 : index
    %121 = vector.load %arg12[%c15, %c0_62] : memref<48x128xbf16, #tpu.memory_space<vmem>>, vector<16x128xbf16>
    %122 = arith.truncf %120 : vector<16x1xf32> to vector<16x1xbf16>
    %123 = vector.broadcast %122 : vector<16x1xbf16> to vector<16x128xbf16>
    %124 = arith.mulf %121, %123 : vector<16x128xbf16>
    %c3 = arith.constant 3 : index
    %c0_63 = arith.constant 0 : index
    %c0_64 = arith.constant 0 : index
    %125 = vector.load %arg6[%c3, %c0_63, %c0_64] : memref<9x128x128xbf16, #tpu.memory_space<vmem>>, vector<1x128x128xbf16>
    %126 = vector.shape_cast %125 : vector<1x128x128xbf16> to vector<128x128xbf16>
    %cst_65 = arith.constant dense<0.000000e+00> : vector<16x128xf32>
    %127 = tpu.matmul %124, %126, %cst_65 {dimension_numbers = #tpu.dot_dimension_numbers<[1], [0], [0], [1], [0, 0, 1, 1], [], []>} : vector<16x128xbf16>, vector<128x128xbf16>, vector<16x128xf32> -> vector<16x128xf32>
    %128 = arith.addf %98, %127 : vector<16x128xf32>
    %c0_i32_66 = arith.constant 0 : i32
    %129 = vector.broadcast %c0_i32_66 : i32 to vector<16x1xi32>
    %130 = arith.addi %6, %129 : vector<16x1xi32>
    %c0_i32_67 = arith.constant 0 : i32
    %131 = vector.broadcast %c0_i32_67 : i32 to vector<16x1xi32>
    %132 = arith.cmpi sge, %130, %131 : vector<16x1xi32>
    %c0_i32_68 = arith.constant 0 : i32
    %133 = vector.broadcast %c0_i32_68 : i32 to vector<16x1xi32>
    %134 = arith.addi %6, %133 : vector<16x1xi32>
    %c8_i32_69 = arith.constant 8 : i32
    %135 = vector.broadcast %c8_i32_69 : i32 to vector<16x1xi32>
    %136 = arith.cmpi slt, %134, %135 : vector<16x1xi32>
    %137 = arith.andi %132, %136 : vector<16x1xi1>
    %c0_i32_70 = arith.constant 0 : i32
    %138 = vector.broadcast %c0_i32_70 : i32 to vector<16x1xi32>
    %139 = arith.addi %7, %138 : vector<16x1xi32>
    %c0_i32_71 = arith.constant 0 : i32
    %140 = vector.broadcast %c0_i32_71 : i32 to vector<16x1xi32>
    %141 = arith.cmpi sge, %139, %140 : vector<16x1xi32>
    %142 = arith.andi %137, %141 : vector<16x1xi1>
    %c0_i32_72 = arith.constant 0 : i32
    %143 = vector.broadcast %c0_i32_72 : i32 to vector<16x1xi32>
    %144 = arith.addi %7, %143 : vector<16x1xi32>
    %c8_i32_73 = arith.constant 8 : i32
    %145 = vector.broadcast %c8_i32_73 : i32 to vector<16x1xi32>
    %146 = arith.cmpi slt, %144, %145 : vector<16x1xi32>
    %147 = arith.andi %142, %146 : vector<16x1xi1>
    %cst_74 = arith.constant 1.000000e+00 : f32
    %cst_75 = arith.constant 0.000000e+00 : f32
    %148 = vector.broadcast %cst_74 : f32 to vector<16x1xf32>
    %149 = vector.broadcast %cst_75 : f32 to vector<16x1xf32>
    %150 = arith.select %147, %148, %149 : vector<16x1xi1>, vector<16x1xf32>
    %c16_76 = arith.constant 16 : index
    %c0_77 = arith.constant 0 : index
    %151 = vector.load %arg12[%c16_76, %c0_77] : memref<48x128xbf16, #tpu.memory_space<vmem>>, vector<16x128xbf16>
    %152 = arith.truncf %150 : vector<16x1xf32> to vector<16x1xbf16>
    %153 = vector.broadcast %152 : vector<16x1xbf16> to vector<16x128xbf16>
    %154 = arith.mulf %151, %153 : vector<16x128xbf16>
    %c4 = arith.constant 4 : index
    %c0_78 = arith.constant 0 : index
    %c0_79 = arith.constant 0 : index
    %155 = vector.load %arg6[%c4, %c0_78, %c0_79] : memref<9x128x128xbf16, #tpu.memory_space<vmem>>, vector<1x128x128xbf16>
    %156 = vector.shape_cast %155 : vector<1x128x128xbf16> to vector<128x128xbf16>
    %cst_80 = arith.constant dense<0.000000e+00> : vector<16x128xf32>
    %157 = tpu.matmul %154, %156, %cst_80 {dimension_numbers = #tpu.dot_dimension_numbers<[1], [0], [0], [1], [0, 0, 1, 1], [], []>} : vector<16x128xbf16>, vector<128x128xbf16>, vector<16x128xf32> -> vector<16x128xf32>
    %158 = arith.addf %128, %157 : vector<16x128xf32>
    %c0_i32_81 = arith.constant 0 : i32
    %159 = vector.broadcast %c0_i32_81 : i32 to vector<16x1xi32>
    %160 = arith.addi %6, %159 : vector<16x1xi32>
    %c0_i32_82 = arith.constant 0 : i32
    %161 = vector.broadcast %c0_i32_82 : i32 to vector<16x1xi32>
    %162 = arith.cmpi sge, %160, %161 : vector<16x1xi32>
    %c0_i32_83 = arith.constant 0 : i32
    %163 = vector.broadcast %c0_i32_83 : i32 to vector<16x1xi32>
    %164 = arith.addi %6, %163 : vector<16x1xi32>
    %c8_i32_84 = arith.constant 8 : i32
    %165 = vector.broadcast %c8_i32_84 : i32 to vector<16x1xi32>
    %166 = arith.cmpi slt, %164, %165 : vector<16x1xi32>
    %167 = arith.andi %162, %166 : vector<16x1xi1>
    %c1_i32_85 = arith.constant 1 : i32
    %168 = vector.broadcast %c1_i32_85 : i32 to vector<16x1xi32>
    %169 = arith.addi %7, %168 : vector<16x1xi32>
    %c0_i32_86 = arith.constant 0 : i32
    %170 = vector.broadcast %c0_i32_86 : i32 to vector<16x1xi32>
    %171 = arith.cmpi sge, %169, %170 : vector<16x1xi32>
    %172 = arith.andi %167, %171 : vector<16x1xi1>
    %c1_i32_87 = arith.constant 1 : i32
    %173 = vector.broadcast %c1_i32_87 : i32 to vector<16x1xi32>
    %174 = arith.addi %7, %173 : vector<16x1xi32>
    %c8_i32_88 = arith.constant 8 : i32
    %175 = vector.broadcast %c8_i32_88 : i32 to vector<16x1xi32>
    %176 = arith.cmpi slt, %174, %175 : vector<16x1xi32>
    %177 = arith.andi %172, %176 : vector<16x1xi1>
    %cst_89 = arith.constant 1.000000e+00 : f32
    %cst_90 = arith.constant 0.000000e+00 : f32
    %178 = vector.broadcast %cst_89 : f32 to vector<16x1xf32>
    %179 = vector.broadcast %cst_90 : f32 to vector<16x1xf32>
    %180 = arith.select %177, %178, %179 : vector<16x1xi1>, vector<16x1xf32>
    %c17 = arith.constant 17 : index
    %c0_91 = arith.constant 0 : index
    %181 = vector.load %arg12[%c17, %c0_91] : memref<48x128xbf16, #tpu.memory_space<vmem>>, vector<16x128xbf16>
    %182 = arith.truncf %180 : vector<16x1xf32> to vector<16x1xbf16>
    %183 = vector.broadcast %182 : vector<16x1xbf16> to vector<16x128xbf16>
    %184 = arith.mulf %181, %183 : vector<16x128xbf16>
    %c5 = arith.constant 5 : index
    %c0_92 = arith.constant 0 : index
    %c0_93 = arith.constant 0 : index
    %185 = vector.load %arg6[%c5, %c0_92, %c0_93] : memref<9x128x128xbf16, #tpu.memory_space<vmem>>, vector<1x128x128xbf16>
    %186 = vector.shape_cast %185 : vector<1x128x128xbf16> to vector<128x128xbf16>
    %cst_94 = arith.constant dense<0.000000e+00> : vector<16x128xf32>
    %187 = tpu.matmul %184, %186, %cst_94 {dimension_numbers = #tpu.dot_dimension_numbers<[1], [0], [0], [1], [0, 0, 1, 1], [], []>} : vector<16x128xbf16>, vector<128x128xbf16>, vector<16x128xf32> -> vector<16x128xf32>
    %188 = arith.addf %158, %187 : vector<16x128xf32>
    %c1_i32_95 = arith.constant 1 : i32
    %189 = vector.broadcast %c1_i32_95 : i32 to vector<16x1xi32>
    %190 = arith.addi %6, %189 : vector<16x1xi32>
    %c0_i32_96 = arith.constant 0 : i32
    %191 = vector.broadcast %c0_i32_96 : i32 to vector<16x1xi32>
    %192 = arith.cmpi sge, %190, %191 : vector<16x1xi32>
    %c1_i32_97 = arith.constant 1 : i32
    %193 = vector.broadcast %c1_i32_97 : i32 to vector<16x1xi32>
    %194 = arith.addi %6, %193 : vector<16x1xi32>
    %c8_i32_98 = arith.constant 8 : i32
    %195 = vector.broadcast %c8_i32_98 : i32 to vector<16x1xi32>
    %196 = arith.cmpi slt, %194, %195 : vector<16x1xi32>
    %197 = arith.andi %192, %196 : vector<16x1xi1>
    %c-1_i32_99 = arith.constant -1 : i32
    %198 = vector.broadcast %c-1_i32_99 : i32 to vector<16x1xi32>
    %199 = arith.addi %7, %198 : vector<16x1xi32>
    %c0_i32_100 = arith.constant 0 : i32
    %200 = vector.broadcast %c0_i32_100 : i32 to vector<16x1xi32>
    %201 = arith.cmpi sge, %199, %200 : vector<16x1xi32>
    %202 = arith.andi %197, %201 : vector<16x1xi1>
    %c-1_i32_101 = arith.constant -1 : i32
    %203 = vector.broadcast %c-1_i32_101 : i32 to vector<16x1xi32>
    %204 = arith.addi %7, %203 : vector<16x1xi32>
    %c8_i32_102 = arith.constant 8 : i32
    %205 = vector.broadcast %c8_i32_102 : i32 to vector<16x1xi32>
    %206 = arith.cmpi slt, %204, %205 : vector<16x1xi32>
    %207 = arith.andi %202, %206 : vector<16x1xi1>
    %cst_103 = arith.constant 1.000000e+00 : f32
    %cst_104 = arith.constant 0.000000e+00 : f32
    %208 = vector.broadcast %cst_103 : f32 to vector<16x1xf32>
    %209 = vector.broadcast %cst_104 : f32 to vector<16x1xf32>
    %210 = arith.select %207, %208, %209 : vector<16x1xi1>, vector<16x1xf32>
    %c23 = arith.constant 23 : index
    %c0_105 = arith.constant 0 : index
    %211 = vector.load %arg12[%c23, %c0_105] : memref<48x128xbf16, #tpu.memory_space<vmem>>, vector<16x128xbf16>
    %212 = arith.truncf %210 : vector<16x1xf32> to vector<16x1xbf16>
    %213 = vector.broadcast %212 : vector<16x1xbf16> to vector<16x128xbf16>
    %214 = arith.mulf %211, %213 : vector<16x128xbf16>
    %c6 = arith.constant 6 : index
    %c0_106 = arith.constant 0 : index
    %c0_107 = arith.constant 0 : index
    %215 = vector.load %arg6[%c6, %c0_106, %c0_107] : memref<9x128x128xbf16, #tpu.memory_space<vmem>>, vector<1x128x128xbf16>
    %216 = vector.shape_cast %215 : vector<1x128x128xbf16> to vector<128x128xbf16>
    %cst_108 = arith.constant dense<0.000000e+00> : vector<16x128xf32>
    %217 = tpu.matmul %214, %216, %cst_108 {dimension_numbers = #tpu.dot_dimension_numbers<[1], [0], [0], [1], [0, 0, 1, 1], [], []>} : vector<16x128xbf16>, vector<128x128xbf16>, vector<16x128xf32> -> vector<16x128xf32>
    %218 = arith.addf %188, %217 : vector<16x128xf32>
    %c1_i32_109 = arith.constant 1 : i32
    %219 = vector.broadcast %c1_i32_109 : i32 to vector<16x1xi32>
    %220 = arith.addi %6, %219 : vector<16x1xi32>
    %c0_i32_110 = arith.constant 0 : i32
    %221 = vector.broadcast %c0_i32_110 : i32 to vector<16x1xi32>
    %222 = arith.cmpi sge, %220, %221 : vector<16x1xi32>
    %c1_i32_111 = arith.constant 1 : i32
    %223 = vector.broadcast %c1_i32_111 : i32 to vector<16x1xi32>
    %224 = arith.addi %6, %223 : vector<16x1xi32>
    %c8_i32_112 = arith.constant 8 : i32
    %225 = vector.broadcast %c8_i32_112 : i32 to vector<16x1xi32>
    %226 = arith.cmpi slt, %224, %225 : vector<16x1xi32>
    %227 = arith.andi %222, %226 : vector<16x1xi1>
    %c0_i32_113 = arith.constant 0 : i32
    %228 = vector.broadcast %c0_i32_113 : i32 to vector<16x1xi32>
    %229 = arith.addi %7, %228 : vector<16x1xi32>
    %c0_i32_114 = arith.constant 0 : i32
    %230 = vector.broadcast %c0_i32_114 : i32 to vector<16x1xi32>
    %231 = arith.cmpi sge, %229, %230 : vector<16x1xi32>
    %232 = arith.andi %227, %231 : vector<16x1xi1>
    %c0_i32_115 = arith.constant 0 : i32
    %233 = vector.broadcast %c0_i32_115 : i32 to vector<16x1xi32>
    %234 = arith.addi %7, %233 : vector<16x1xi32>
    %c8_i32_116 = arith.constant 8 : i32
    %235 = vector.broadcast %c8_i32_116 : i32 to vector<16x1xi32>
    %236 = arith.cmpi slt, %234, %235 : vector<16x1xi32>
    %237 = arith.andi %232, %236 : vector<16x1xi1>
    %cst_117 = arith.constant 1.000000e+00 : f32
    %cst_118 = arith.constant 0.000000e+00 : f32
    %238 = vector.broadcast %cst_117 : f32 to vector<16x1xf32>
    %239 = vector.broadcast %cst_118 : f32 to vector<16x1xf32>
    %240 = arith.select %237, %238, %239 : vector<16x1xi1>, vector<16x1xf32>
    %c24 = arith.constant 24 : index
    %c0_119 = arith.constant 0 : index
    %241 = vector.load %arg12[%c24, %c0_119] : memref<48x128xbf16, #tpu.memory_space<vmem>>, vector<16x128xbf16>
    %242 = arith.truncf %240 : vector<16x1xf32> to vector<16x1xbf16>
    %243 = vector.broadcast %242 : vector<16x1xbf16> to vector<16x128xbf16>
    %244 = arith.mulf %241, %243 : vector<16x128xbf16>
    %c7_120 = arith.constant 7 : index
    %c0_121 = arith.constant 0 : index
    %c0_122 = arith.constant 0 : index
    %245 = vector.load %arg6[%c7_120, %c0_121, %c0_122] : memref<9x128x128xbf16, #tpu.memory_space<vmem>>, vector<1x128x128xbf16>
    %246 = vector.shape_cast %245 : vector<1x128x128xbf16> to vector<128x128xbf16>
    %cst_123 = arith.constant dense<0.000000e+00> : vector<16x128xf32>
    %247 = tpu.matmul %244, %246, %cst_123 {dimension_numbers = #tpu.dot_dimension_numbers<[1], [0], [0], [1], [0, 0, 1, 1], [], []>} : vector<16x128xbf16>, vector<128x128xbf16>, vector<16x128xf32> -> vector<16x128xf32>
    %248 = arith.addf %218, %247 : vector<16x128xf32>
    %c1_i32_124 = arith.constant 1 : i32
    %249 = vector.broadcast %c1_i32_124 : i32 to vector<16x1xi32>
    %250 = arith.addi %6, %249 : vector<16x1xi32>
    %c0_i32_125 = arith.constant 0 : i32
    %251 = vector.broadcast %c0_i32_125 : i32 to vector<16x1xi32>
    %252 = arith.cmpi sge, %250, %251 : vector<16x1xi32>
    %c1_i32_126 = arith.constant 1 : i32
    %253 = vector.broadcast %c1_i32_126 : i32 to vector<16x1xi32>
    %254 = arith.addi %6, %253 : vector<16x1xi32>
    %c8_i32_127 = arith.constant 8 : i32
    %255 = vector.broadcast %c8_i32_127 : i32 to vector<16x1xi32>
    %256 = arith.cmpi slt, %254, %255 : vector<16x1xi32>
    %257 = arith.andi %252, %256 : vector<16x1xi1>
    %c1_i32_128 = arith.constant 1 : i32
    %258 = vector.broadcast %c1_i32_128 : i32 to vector<16x1xi32>
    %259 = arith.addi %7, %258 : vector<16x1xi32>
    %c0_i32_129 = arith.constant 0 : i32
    %260 = vector.broadcast %c0_i32_129 : i32 to vector<16x1xi32>
    %261 = arith.cmpi sge, %259, %260 : vector<16x1xi32>
    %262 = arith.andi %257, %261 : vector<16x1xi1>
    %c1_i32_130 = arith.constant 1 : i32
    %263 = vector.broadcast %c1_i32_130 : i32 to vector<16x1xi32>
    %264 = arith.addi %7, %263 : vector<16x1xi32>
    %c8_i32_131 = arith.constant 8 : i32
    %265 = vector.broadcast %c8_i32_131 : i32 to vector<16x1xi32>
    %266 = arith.cmpi slt, %264, %265 : vector<16x1xi32>
    %267 = arith.andi %262, %266 : vector<16x1xi1>
    %cst_132 = arith.constant 1.000000e+00 : f32
    %cst_133 = arith.constant 0.000000e+00 : f32
    %268 = vector.broadcast %cst_132 : f32 to vector<16x1xf32>
    %269 = vector.broadcast %cst_133 : f32 to vector<16x1xf32>
    %270 = arith.select %267, %268, %269 : vector<16x1xi1>, vector<16x1xf32>
    %c25 = arith.constant 25 : index
    %c0_134 = arith.constant 0 : index
    %271 = vector.load %arg12[%c25, %c0_134] : memref<48x128xbf16, #tpu.memory_space<vmem>>, vector<16x128xbf16>
    %272 = arith.truncf %270 : vector<16x1xf32> to vector<16x1xbf16>
    %273 = vector.broadcast %272 : vector<16x1xbf16> to vector<16x128xbf16>
    %274 = arith.mulf %271, %273 : vector<16x128xbf16>
    %c8_135 = arith.constant 8 : index
    %c0_136 = arith.constant 0 : index
    %c0_137 = arith.constant 0 : index
    %275 = vector.load %arg6[%c8_135, %c0_136, %c0_137] : memref<9x128x128xbf16, #tpu.memory_space<vmem>>, vector<1x128x128xbf16>
    %276 = vector.shape_cast %275 : vector<1x128x128xbf16> to vector<128x128xbf16>
    %cst_138 = arith.constant dense<0.000000e+00> : vector<16x128xf32>
    %277 = tpu.matmul %274, %276, %cst_138 {dimension_numbers = #tpu.dot_dimension_numbers<[1], [0], [0], [1], [0, 0, 1, 1], [], []>} : vector<16x128xbf16>, vector<128x128xbf16>, vector<16x128xf32> -> vector<16x128xf32>
    %278 = arith.addf %248, %277 : vector<16x128xf32>
    %279 = arith.truncf %278 : vector<16x128xf32> to vector<16x128xbf16>
    %c0_139 = arith.constant 0 : index
    %c0_140 = arith.constant 0 : index
    %280 = vector.load %arg8[%c0_139, %c0_140] : memref<16x128xbf16, #tpu.memory_space<vmem>>, vector<16x128xbf16>
    tpu.vector_store %arg8[%c0_139, %c0_140], %279 {strides = array<i32>} : memref<16x128xbf16, #tpu.memory_space<vmem>>, vector<16x128xbf16>,
    %c16_i32 = arith.constant 16 : i32
    %281 = arith.muli %arg0, %c16_i32 : i32
    %c128_i32 = arith.constant 128 : i32
    %282 = arith.subi %c128_i32, %281 : i32
    %c16_i32_141 = arith.constant 16 : i32
    %283 = arith.minsi %c16_i32_141, %282 : i32
    %284 = arith.sitofp %283 : i32 to f32
    %cst_142 = arith.constant dense<0.000000e+00> : vector<128xf32>
    %285 = vector.multi_reduction <add>, %278, %cst_142 [0] : vector<16x128xf32> to vector<128xf32>
    %286 = vector.shape_cast %285 : vector<128xf32> to vector<1x128xf32>
    %287 = vector.broadcast %284 : f32 to vector<1x128xf32>
    %288 = arith.divf %286, %287 : vector<1x128xf32>
    %289 = vector.broadcast %288 : vector<1x128xf32> to vector<16x128xf32>
    %290 = arith.subf %278, %289 : vector<16x128xf32>
    %291 = vector.broadcast %150 : vector<16x1xf32> to vector<16x128xf32>
    %292 = arith.mulf %290, %291 : vector<16x128xf32>
    %293 = arith.mulf %292, %292 : vector<16x128xf32>
    %cst_143 = arith.constant dense<0.000000e+00> : vector<128xf32>
    %294 = vector.multi_reduction <add>, %293, %cst_143 [0] : vector<16x128xf32> to vector<128xf32>
    %295 = vector.shape_cast %294 : vector<128xf32> to vector<1x128xf32>
    %296 = tpu.concatenate %286, %295 in 0 : vector<1x128xf32>, vector<1x128xf32> -> vector<2x128xf32>
    %297 = vector.shape_cast %296 : vector<2x128xf32> to vector<1x2x128xf32>
    %c0_144 = arith.constant 0 : index
    %c0_145 = arith.constant 0 : index
    %c0_146 = arith.constant 0 : index
    %298 = vector.load %arg10[%c0_144, %c0_145, %c0_146] : memref<1x2x128xf32, #tpu.memory_space<vmem>>, vector<1x2x128xf32>
    tpu.vector_store %arg10[%c0_144, %c0_145, %c0_146], %297 {strides = array<i32>} : memref<1x2x128xf32, #tpu.memory_space<vmem>>, vector<1x2x128xf32>,
    %c16_147 = arith.constant 16 : index
    %c0_148 = arith.constant 0 : index
    %299 = vector.load %arg12[%c16_147, %c0_148] : memref<48x128xbf16, #tpu.memory_space<vmem>>, vector<16x128xbf16>
    %300 = arith.truncf %150 : vector<16x1xf32> to vector<16x1xbf16>
    %301 = vector.broadcast %300 : vector<16x1xbf16> to vector<16x128xbf16>
    %302 = arith.mulf %299, %301 : vector<16x128xbf16>
    %c0_149 = arith.constant 0 : index
    %c0_150 = arith.constant 0 : index
    %303 = vector.load %arg7[%c0_149, %c0_150] : memref<128x128xbf16, #tpu.memory_space<vmem>>, vector<128x128xbf16>
    %cst_151 = arith.constant dense<0.000000e+00> : vector<16x128xf32>
    %304 = tpu.matmul %302, %303, %cst_151 {dimension_numbers = #tpu.dot_dimension_numbers<[1], [0], [0], [1], [0, 0, 1, 1], [], []>} : vector<16x128xbf16>, vector<128x128xbf16>, vector<16x128xf32> -> vector<16x128xf32>
    %305 = arith.truncf %304 : vector<16x128xf32> to vector<16x128xbf16>
    %c0_152 = arith.constant 0 : index
    %c0_153 = arith.constant 0 : index
    %306 = vector.load %arg9[%c0_152, %c0_153] : memref<16x128xbf16, #tpu.memory_space<vmem>>, vector<16x128xbf16>
    tpu.vector_store %arg9[%c0_152, %c0_153], %305 {strides = array<i32>} : memref<16x128xbf16, #tpu.memory_space<vmem>>, vector<16x128xbf16>,
    %c16_i32_154 = arith.constant 16 : i32
    %307 = arith.muli %arg0, %c16_i32_154 : i32
    %c128_i32_155 = arith.constant 128 : i32
    %308 = arith.subi %c128_i32_155, %307 : i32
    %c16_i32_156 = arith.constant 16 : i32
    %309 = arith.minsi %c16_i32_156, %308 : i32
    %310 = arith.sitofp %309 : i32 to f32
    %cst_157 = arith.constant dense<0.000000e+00> : vector<128xf32>
    %311 = vector.multi_reduction <add>, %304, %cst_157 [0] : vector<16x128xf32> to vector<128xf32>
    %312 = vector.shape_cast %311 : vector<128xf32> to vector<1x128xf32>
    %313 = vector.broadcast %310 : f32 to vector<1x128xf32>
    %314 = arith.divf %312, %313 : vector<1x128xf32>
    %315 = vector.broadcast %314 : vector<1x128xf32> to vector<16x128xf32>
    %316 = arith.subf %304, %315 : vector<16x128xf32>
    %317 = vector.broadcast %150 : vector<16x1xf32> to vector<16x128xf32>
    %318 = arith.mulf %316, %317 : vector<16x128xf32>
    %319 = arith.mulf %318, %318 : vector<16x128xf32>
    %cst_158 = arith.constant dense<0.000000e+00> : vector<128xf32>
    %320 = vector.multi_reduction <add>, %319, %cst_158 [0] : vector<16x128xf32> to vector<128xf32>
    %321 = vector.shape_cast %320 : vector<128xf32> to vector<1x128xf32>
    %322 = tpu.concatenate %312, %321 in 0 : vector<1x128xf32>, vector<1x128xf32> -> vector<2x128xf32>
    %323 = vector.shape_cast %322 : vector<2x128xf32> to vector<1x2x128xf32>
    %c0_159 = arith.constant 0 : index
    %c0_160 = arith.constant 0 : index
    %c0_161 = arith.constant 0 : index
    %324 = vector.load %arg11[%c0_159, %c0_160, %c0_161] : memref<1x2x128xf32, #tpu.memory_space<vmem>>, vector<1x2x128xf32>
    tpu.vector_store %arg11[%c0_159, %c0_160, %c0_161], %323 {strides = array<i32>} : memref<1x2x128xf32, #tpu.memory_space<vmem>>, vector<1x2x128xf32>,
    return
  }
  func.func @transform_0(%arg0: i32) -> (i32, i32) {
    %c0_i32 = arith.constant 0 : i32
    %c0_i32_0 = arith.constant 0 : i32
    return %arg0, %c0_i32 : i32, i32
  }
  func.func @transform_1(%arg0: i32) -> (i32, i32) {
    %c1_i32 = arith.constant 1 : i32
    %0 = arith.muli %arg0, %c1_i32 : i32
    %c1_i32_0 = arith.constant 1 : i32
    %1 = arith.subi %0, %c1_i32_0 : i32
    %c0_i32 = arith.constant 0 : i32
    %2 = arith.maxsi %1, %c0_i32 : i32
    %c0_i32_1 = arith.constant 0 : i32
    %c0_i32_2 = arith.constant 0 : i32
    return %2, %c0_i32_1 : i32, i32
  }
  func.func @transform_2(%arg0: i32) -> (i32, i32) {
    %c1_i32 = arith.constant 1 : i32
    %0 = arith.addi %arg0, %c1_i32 : i32
    %c1_i32_0 = arith.constant 1 : i32
    %1 = arith.muli %0, %c1_i32_0 : i32
    %c7_i32 = arith.constant 7 : i32
    %2 = arith.minsi %1, %c7_i32 : i32
    %c0_i32 = arith.constant 0 : i32
    %c0_i32_1 = arith.constant 0 : i32
    return %2, %c0_i32 : i32, i32
  }
  func.func @transform_3(%arg0: i32) -> (i32, i32) {
    %c0_i32 = arith.constant 0 : i32
    %c0_i32_0 = arith.constant 0 : i32
    return %arg0, %c0_i32 : i32, i32
  }
  func.func @transform_4(%arg0: i32) -> (i32, i32) {
    %c0_i32 = arith.constant 0 : i32
    %c0_i32_0 = arith.constant 0 : i32
    return %arg0, %c0_i32 : i32, i32
  }
  func.func @transform_5(%arg0: i32) -> (i32, i32, i32) {
    %c0_i32 = arith.constant 0 : i32
    %c0_i32_0 = arith.constant 0 : i32
    %c0_i32_1 = arith.constant 0 : i32
    %c0_i32_2 = arith.constant 0 : i32
    return %c0_i32, %c0_i32_0, %c0_i32_1 : i32, i32, i32
  }
  func.func @transform_6(%arg0: i32) -> (i32, i32) {
    %c0_i32 = arith.constant 0 : i32
    %c0_i32_0 = arith.constant 0 : i32
    %c0_i32_1 = arith.constant 0 : i32
    return %c0_i32, %c0_i32_0 : i32, i32
  }
  func.func @transform_7(%arg0: i32) -> (i32, i32) {
    %c0_i32 = arith.constant 0 : i32
    %c0_i32_0 = arith.constant 0 : i32
    return %arg0, %c0_i32 : i32, i32
  }
  func.func @transform_8(%arg0: i32) -> (i32, i32) {
    %c0_i32 = arith.constant 0 : i32
    %c0_i32_0 = arith.constant 0 : i32
    return %arg0, %c0_i32 : i32, i32
  }
  func.func @transform_9(%arg0: i32) -> (i32, i32, i32) {
    %c0_i32 = arith.constant 0 : i32
    %c0_i32_0 = arith.constant 0 : i32
    %c0_i32_1 = arith.constant 0 : i32
    return %arg0, %c0_i32, %c0_i32_0 : i32, i32, i32
  }
  func.func @transform_10(%arg0: i32) -> (i32, i32, i32) {
    %c0_i32 = arith.constant 0 : i32
    %c0_i32_0 = arith.constant 0 : i32
    %c0_i32_1 = arith.constant 0 : i32
    return %arg0, %c0_i32, %c0_i32_0 : i32, i32, i32
  }
}

module attributes {stable_mosaic.version = 11 : i64} {
  func.func @pass3_kernel(%arg0: i32, %arg1: memref<16x128xbf16, #tpu.memory_space<vmem>>, %arg2: memref<16x128xbf16, #tpu.memory_space<vmem>>, %arg3: memref<1x128xf32, #tpu.memory_space<vmem>>, %arg4: memref<1x128xf32, #tpu.memory_space<vmem>>, %arg5: memref<1x128xf32, #tpu.memory_space<vmem>>, %arg6: memref<1x128xf32, #tpu.memory_space<vmem>>, %arg7: memref<16x128xf32, #tpu.memory_space<vmem>>) attributes {dimension_semantics = [#tpu.dimension_semantics<parallel>], iteration_bounds = array<i64: 8>, scalar_prefetch = 0 : i64, scratch_operands = 0 : i64, tpu.core_type = #tpu.core_type<tc>, window_params = [{transform_indices = @transform_0, window_bounds = array<i64: 16, 128>}, {transform_indices = @transform_1, window_bounds = array<i64: 16, 128>}, {pipeline_mode = #tpu.pipeline_mode<synchronous>, transform_indices = @transform_2, window_bounds = array<i64: 1, 128>}, {pipeline_mode = #tpu.pipeline_mode<synchronous>, transform_indices = @transform_3, window_bounds = array<i64: 1, 128>}, {pipeline_mode = #tpu.pipeline_mode<synchronous>, transform_indices = @transform_4, window_bounds = array<i64: 1, 128>}, {pipeline_mode = #tpu.pipeline_mode<synchronous>, transform_indices = @transform_5, window_bounds = array<i64: 1, 128>}, {transform_indices = @transform_6, window_bounds = array<i64: 16, 128>}]} {
    %c0 = arith.constant 0 : index
    %c0_0 = arith.constant 0 : index
    %0 = vector.load %arg1[%c0, %c0_0] : memref<16x128xbf16, #tpu.memory_space<vmem>>, vector<16x128xbf16>
    %1 = arith.extf %0 : vector<16x128xbf16> to vector<16x128xf32>
    %c0_1 = arith.constant 0 : index
    %c0_2 = arith.constant 0 : index
    %2 = vector.load %arg3[%c0_1, %c0_2] : memref<1x128xf32, #tpu.memory_space<vmem>>, vector<1x128xf32>
    %3 = vector.broadcast %2 : vector<1x128xf32> to vector<16x128xf32>
    %4 = arith.mulf %1, %3 : vector<16x128xf32>
    %c0_3 = arith.constant 0 : index
    %c0_4 = arith.constant 0 : index
    %5 = vector.load %arg4[%c0_3, %c0_4] : memref<1x128xf32, #tpu.memory_space<vmem>>, vector<1x128xf32>
    %6 = vector.broadcast %5 : vector<1x128xf32> to vector<16x128xf32>
    %7 = arith.addf %4, %6 : vector<16x128xf32>
    %c0_5 = arith.constant 0 : index
    %c0_6 = arith.constant 0 : index
    %8 = vector.load %arg2[%c0_5, %c0_6] : memref<16x128xbf16, #tpu.memory_space<vmem>>, vector<16x128xbf16>
    %9 = arith.extf %8 : vector<16x128xbf16> to vector<16x128xf32>
    %c0_7 = arith.constant 0 : index
    %c0_8 = arith.constant 0 : index
    %10 = vector.load %arg5[%c0_7, %c0_8] : memref<1x128xf32, #tpu.memory_space<vmem>>, vector<1x128xf32>
    %11 = vector.broadcast %10 : vector<1x128xf32> to vector<16x128xf32>
    %12 = arith.mulf %9, %11 : vector<16x128xf32>
    %c0_9 = arith.constant 0 : index
    %c0_10 = arith.constant 0 : index
    %13 = vector.load %arg6[%c0_9, %c0_10] : memref<1x128xf32, #tpu.memory_space<vmem>>, vector<1x128xf32>
    %14 = vector.broadcast %13 : vector<1x128xf32> to vector<16x128xf32>
    %15 = arith.addf %12, %14 : vector<16x128xf32>
    %cst = arith.constant 0.000000e+00 : f32
    %16 = vector.broadcast %cst : f32 to vector<16x128xf32>
    %17 = arith.cmpf oge, %7, %16 : vector<16x128xf32>
    %cst_11 = arith.constant 1.000000e-01 : f32
    %18 = vector.broadcast %cst_11 : f32 to vector<16x128xf32>
    %19 = arith.mulf %18, %7 : vector<16x128xf32>
    %20 = arith.select %17, %7, %19 : vector<16x128xi1>, vector<16x128xf32>
    %cst_12 = arith.constant 0.000000e+00 : f32
    %21 = vector.broadcast %cst_12 : f32 to vector<16x128xf32>
    %22 = arith.cmpf oge, %15, %21 : vector<16x128xf32>
    %cst_13 = arith.constant 1.000000e-01 : f32
    %23 = vector.broadcast %cst_13 : f32 to vector<16x128xf32>
    %24 = arith.mulf %23, %15 : vector<16x128xf32>
    %25 = arith.select %22, %15, %24 : vector<16x128xi1>, vector<16x128xf32>
    %26 = arith.addf %20, %25 : vector<16x128xf32>
    %c0_14 = arith.constant 0 : index
    %c0_15 = arith.constant 0 : index
    %27 = vector.load %arg7[%c0_14, %c0_15] : memref<16x128xf32, #tpu.memory_space<vmem>>, vector<16x128xf32>
    tpu.vector_store %arg7[%c0_14, %c0_15], %26 {strides = array<i32>} : memref<16x128xf32, #tpu.memory_space<vmem>>, vector<16x128xf32>,
    return
  }
  func.func @transform_0(%arg0: i32) -> (i32, i32) {
    %c0_i32 = arith.constant 0 : i32
    %c0_i32_0 = arith.constant 0 : i32
    return %arg0, %c0_i32 : i32, i32
  }
  func.func @transform_1(%arg0: i32) -> (i32, i32) {
    %c0_i32 = arith.constant 0 : i32
    %c0_i32_0 = arith.constant 0 : i32
    return %arg0, %c0_i32 : i32, i32
  }
  func.func @transform_2(%arg0: i32) -> (i32, i32) {
    %c0_i32 = arith.constant 0 : i32
    %c0_i32_0 = arith.constant 0 : i32
    %c0_i32_1 = arith.constant 0 : i32
    return %c0_i32, %c0_i32_0 : i32, i32
  }
  func.func @transform_3(%arg0: i32) -> (i32, i32) {
    %c0_i32 = arith.constant 0 : i32
    %c0_i32_0 = arith.constant 0 : i32
    %c0_i32_1 = arith.constant 0 : i32
    return %c0_i32, %c0_i32_0 : i32, i32
  }
  func.func @transform_4(%arg0: i32) -> (i32, i32) {
    %c0_i32 = arith.constant 0 : i32
    %c0_i32_0 = arith.constant 0 : i32
    %c0_i32_1 = arith.constant 0 : i32
    return %c0_i32, %c0_i32_0 : i32, i32
  }
  func.func @transform_5(%arg0: i32) -> (i32, i32) {
    %c0_i32 = arith.constant 0 : i32
    %c0_i32_0 = arith.constant 0 : i32
    %c0_i32_1 = arith.constant 0 : i32
    return %c0_i32, %c0_i32_0 : i32, i32
  }
  func.func @transform_6(%arg0: i32) -> (i32, i32) {
    %c0_i32 = arith.constant 0 : i32
    %c0_i32_0 = arith.constant 0 : i32
    return %arg0, %c0_i32 : i32, i32
  }
}

</mosaic_0001>

<bundles_post_ra>
// kernel: block_d_forward.5
= control target key start
LH: loop header
LB: loop body
LE: loop exit
PB: predicated region body
PF: predicated region fallthrough
CT: control target
= control target key end

     0   :  { %s481_s21 = smov 0   ;;  %s517_s0 = inlined_call_operand.vmem [shape: bf16[128,128], index: 0, kind: input, shape index: {}]   ;;  %s518_s1 = inlined_call_operand.vmem [shape: bf16[128,128], index: 1, kind: input, shape index: {}]   ;;  %s519_s2 = inlined_call_operand.vmem [shape: f32[1,128], index: 2, kind: input, shape index: {}]   ;;  %s520_s3 = inlined_call_operand.vmem [shape: f32[1,128], index: 3, kind: input, shape index: {}]   ;;  %s521_s4 = inlined_call_operand.vmem [shape: f32[1,128], index: 4, kind: input, shape index: {}]   ;;  %s522_s5 = inlined_call_operand.vmem [shape: f32[1,128], index: 5, kind: input, shape index: {}]   ;;  %s523_s6 = inlined_call_operand.vmem [shape: f32[128,128], index: 6, kind: output, shape index: {}]  }
   0x1 LB: > { %s405_s22 = sadd.s32 4294967295, %s444_s21   ;;  %p409_p0 = scmp.ge.s32.totalorder %s444_s21, 1  ;;  %s444_s21 = sphi %s481_s21, %s16_s21  }
   0x2   : > { %p224_p1 = scmp.lt.s32.totalorder %s444_s21, 9 }
   0x4   : > { %p225_p2 = pnand %p409_p0, %p224_p1 }
   0x5   : > { %s410_s23 = sshll.u32 (!%p225_p2), %s405_s22, 1 }
   0x6   : > { %228 = sbr.rel (%p225_p2) target bundleno = 28 (0x1c), region = 44  ;;  %p260_p3 = scmp.lt.s32.totalorder (!%p225_p2), %s410_s23, 15 }
   0xb   : > { %s525_s23 = smov (!%p260_p3, %s410_s23), 15  ;;  %v416_v0 = vld [vmem:[%s519_s2] ss:$0 sm:$0xff] }
   0xc   : > { %s411_s24 = sshll.u32 %s525_s23, 2  ;;  %v418_v3 = vld [vmem:[%s521_s4] ss:$0 sm:$0xff]  ;;  %s415_s15 = sshll.u32 %s525_s23, 3 }
   0xd   : > { %s263_s27 = scalar_lea.vmem %s517_s0, %s411_s24  ;;  %s269_s30 = scalar_lea.vmem %s518_s1, %s411_s24  ;;  %v417_v8 = vld [vmem:[%s520_s3] ss:$0 sm:$0xff] }
   0xe   : > { %v423_v1 = vld [vmem:[%s263_s27] sm:$0xff]   ;;  %s275_s18 = scalar_lea.vmem %s523_s6, %s415_s15 }
   0xf   : > { %v427_v2 = vld [vmem:[%s269_s30] sm:$0xff]   ;;  %v424_v4 = vunpack.c.l.bf16 %v423_v1  ;;  %v425_v5 = vunpack.c.h.bf16 %v423_v1 }
  0x10   : > { %v428_v6 = vunpack.c.l.bf16 %v427_v2  ;;  %v429_v7 = vunpack.c.h.bf16 %v427_v2  ;;  %v419_v9 = vld [vmem:[%s522_s5] ss:$0 sm:$0xff] }
  0x11   : > { %v288_v10 = vmul.f32 %v424_v4, %v416_v0  ;;  %v289_v12 = vmul.f32 %v425_v5, %v416_v0 }
  0x12   : > { %v310_v11 = vmul.f32 %v428_v6, %v418_v3  ;;  %v311_v13 = vmul.f32 %v429_v7, %v418_v3 }
  0x13   : > { %v297_v14 = vadd.f32 %v417_v8, %v288_v10  ;;  %v298_v16 = vadd.f32 %v417_v8, %v289_v12 }
  0x14   : > { %v319_v15 = vadd.f32 %v419_v9, %v310_v11  ;;  %v320_v17 = vadd.f32 %v419_v9, %v311_v13 }
  0x15   : > { %vm321_vm0 = vcmp.ge.f32.partialorder %v297_v14, 0.0  ;;  %v323_v18 = vmul.f32 0.1, %v297_v14  ;;  %vm322_vm2 = vcmp.ge.f32.partialorder %v298_v16, 0.0  ;;  %v324_v20 = vmul.f32 0.1, %v298_v16 }
  0x16   : > { %vm327_vm1 = vcmp.ge.f32.partialorder %v319_v15, 0.0  ;;  %v329_v19 = vmul.f32 0.1, %v319_v15  ;;  %vm328_vm3 = vcmp.ge.f32.partialorder %v320_v17, 0.0  ;;  %v330_v21 = vmul.f32 0.1, %v320_v17 }
  0x17   : > { %v325_v22 = vsel %vm321_vm0, %v297_v14, %v323_v18  ;;  %v326_v25 = vsel %vm322_vm2, %v298_v16, %v324_v20 }
  0x18   : > { %v331_v23 = vsel %vm327_vm1, %v319_v15, %v329_v19  ;;  %v332_v26 = vsel %vm328_vm3, %v320_v17, %v330_v21 }
  0x19   : > { %v333_v24 = vadd.f32 %v331_v23, %v325_v22  ;;  %v334_v27 = vadd.f32 %v332_v26, %v326_v25 }
  0x1b   : > { %335 = vst [vmem:[%s275_s18] sm:$0xff] %v333_v24  ;;  %336 = vst [vmem:[%s275_s18 + $0x8] sm:$0xff] %v334_v27 }
  0x1c PF: > { %s16_s21 = sadd.s32 1, %s444_s21  }
  0x1d   : > { %p13_p4 = scmp.ge.s32.totalorder %s16_s21, 10  }
  0x1f   :  { %15 = sbr.rel (!%p13_p4) target bundleno = 1 (0x1), region = 77 }

// kernel: block_d_forward.4
= control target key start
LH: loop header
LB: loop body
LE: loop exit
PB: predicated region body
PF: predicated region fallthrough
CT: control target
= control target key end

     0   :  { %s3041_s30 = smov 0   ;;  %s3773_s0 = inlined_call_operand.vmem [shape: bf16[128,128], index: 0, kind: input, shape index: {}, may-alias: {0,1,2}]   ;;  %s3774_s1 = inlined_call_operand.vmem [shape: bf16[128,128], index: 1, kind: input, shape index: {}, may-alias: {0,1,2}]   ;;  %s3775_s2 = inlined_call_operand.vmem [shape: bf16[128,128], index: 2, kind: input, shape index: {}, may-alias: {0,1,2}]   ;;  %s3776_s3 = inlined_call_operand.vmem [shape: s32[128,1], index: 3, kind: input, shape index: {}]   ;;  %s3777_s4 = inlined_call_operand.vmem [shape: s32[128,1], index: 4, kind: input, shape index: {}]   ;;  %s3778_s5 = inlined_call_operand.vmem [shape: f32[1,128], index: 5, kind: input, shape index: {}]   ;;  %s3779_s6 = inlined_call_operand.vmem [shape: f32[1,128], index: 6, kind: input, shape index: {}]   ;;  %s3780_s7 = inlined_call_operand.vmem [shape: bf16[9,128,128], index: 7, kind: input, shape index: {}]   ;;  %s3781_s8 = inlined_call_operand.vmem [shape: bf16[128,128], index: 8, kind: output, shape index: {0}]   ;;  %s3782_s9 = inlined_call_operand.vmem [shape: f32[8,2,128], index: 9, kind: output, shape index: {1}]  }
   0x1 LB: > { %s3047_s10 = sadd.s32 4294967295, %s2984_s30   ;;  %p2338_p0 = scmp.ge.s32.totalorder %s2984_s30, 1  ;;  %s2984_s30 = sphi %s3041_s30, %s20_s30  }
   0x2   : > { %p359_p1 = scmp.lt.s32.totalorder %s2984_s30, 9 }
   0x4   : > { %p360_p2 = pnand %p2338_p0, %p359_p1 }
   0x5   : > { %s2339_s11 = sshll.u32 (!%p360_p2), %s3047_s10, 1  ;;  %s2341_s12 = sadd.s32 (!%p360_p2), 4294967295, %s3047_s10 }
   0x6   : > { %363 = sbr.rel (%p360_p2) target bundleno = 532 (0x214), region = 52  ;;  %p426_p3 = scmp.lt.s32.totalorder (!%p360_p2), %s2339_s11, 15 }
   0x7   : > { %p432_p4 = scmp.gt.s32.totalorder (!%p360_p2), %s2341_s12, 0  ;;  %s443_s13 = sadd.s32 (!%p360_p2), 1, %s3047_s10 }
   0x8   : > { %p444_p5 = scmp.lt.s32.totalorder (!%p360_p2), %s443_s13, 7  ;;  %p473_p9 = scmp.lt.s32.totalorder (!%p360_p2), %s3047_s10, 7 }
   0xb   : > { %v2986_v0 = vmov 0   ;;  %v2987_v1 = vmov 0.0   ;;  %v2904_v2 = vld [vmem:[%s3780_s7 + $0x78] sm:$0xff]   ;;  %s3826_s11 = smov (!%p426_p3, %s2339_s11), 15  ;;  %s3828_s12 = smov (!%p432_p4, %s2341_s12), 0  ;;  %v2905_v3 = vld [vmem:[%s3780_s7 + $0x70] sm:$0xff]  }
   0xc   : > { %2897 = vset.pattern.permute.xlu0 %v2986_v0  ;;  %2898 = vset.pattern.permute.xlu1 %v2986_v0  ;;  %s2347_s18 = sshll.u32 %s3826_s11, 3  ;;  %s2342_s19 = sshll.u32 %s3828_s12, 1  ;;  %v2906_v10 = vld [vmem:[%s3780_s7 + $0x68] sm:$0xff]   ;;  %v2910_v11 = vld [vmem:[%s3780_s7 + $0x38] sm:$0xff]   ;;  %v3101_v12 = vld [vmem:[%s3778_s5] ss:$0 sm:$0xff] }
   0xd   : > { %2704 = vmatprep.subr.bf16.mxu0 %v2987_v1  ;;  %2724 = vmatprep.subr.bf16.mxu1 %v2987_v1  ;;  %s459_s22 = scalar_lea.vmem %s3776_s3, %s2347_s18  ;;  %p435_p6 = scmp.lt.s32.totalorder %s2342_s19, 15  ;;  %v2907_v17 = vld [vmem:[%s3780_s7 + $0x60] sm:$0xff]   ;;  %v2908_v27 = vld [vmem:[%s3780_s7 + $0x58] sm:$0xff]   ;;  %v2909_v34 = vld [vmem:[%s3780_s7 + $0x50] sm:$0xff]  }
   0xe   : > { %2705 = vmatpush3.bf16.msra.mxu0 %v2904_v2  ;;  %s465_s25 = scalar_lea.vmem %s3777_s4, %s2347_s18  ;;  %v3072_v4 = vld [vmem:[%s459_s22] sm:$0xff]  ;;  %v3074_v5 = vld [vmem:[%s459_s22 + $0x8] sm:$0xff]  ;;  %s3830_s13 = smov (!%p444_p5, %s443_s13), 7  ;;  %2725 = vmatpush3.bf16.msra.mxu1 %v2910_v11  ;;  %v2912_v35 = vld [vmem:[%s3780_s7 + $0x30] sm:$0xff]  }
   0xf   : > { %2706 = vmatprep.subr.bf16.mxu0 %v2987_v1  ;;  %v3078_v6 = vld [vmem:[%s465_s25] sm:$0xff]  ;;  %v3080_v7 = vld [vmem:[%s465_s25 + $0x8] sm:$0xff]  ;;  %v568_v8 = vadd.s32 4294967295, %v3072_v4  ;;  %v569_v9 = vadd.s32 4294967295, %v3074_v5  ;;  %s3832_s19 = smov (!%p435_p6, %s2342_s19), 15  ;;  %s2344_s12 = sshll.u32 %s3830_s13, 1  ;;  %2726 = vmatprep.subr.bf16.mxu1 %v2987_v1 }
  0x10   : > { %vm3790_vm0 = vcmp.ge.s32.totalorder %v3078_v6, 0  ;;  %s2340_s14 = sshll.u32 %s3826_s11, 2  ;;  %s2343_s15 = sshll.u32 %s3832_s19, 2  ;;  %vm3787_vm6 = vcmp.ge.s32.totalorder %v3080_v7, 0  ;;  %v3109_v14 = vadd.s32 1, %v3078_v6  ;;  %v3112_v15 = vadd.s32 1, %v3080_v7 }
  0x11   : > { %vm570_vm1 = vcmp.ge.s32.totalorder %v568_v8, 0  ;;  %vm571_vm2 = vcmp.ge.s32.totalorder %v569_v9, 0  ;;  %vm572_vm3 = vcmp.lt.s32.totalorder %v568_v8, 8  ;;  %vm573_vm4 = vcmp.lt.s32.totalorder %v569_v9, 8  ;;  %p3094_p7 = scmp.lt.s32.totalorder %s2344_s12, 15  ;;  %s438_s20 = scalar_lea.vmem %s3774_s1, %s2343_s15  ;;  %v2911_v49 = vld [vmem:[%s3780_s7 + $0x48] sm:$0xff]  }
  0x12   : > { %2707 = vmatpush3.bf16.msra.mxu0 %v2905_v3  ;;  %vm3103_vm5 = vmand %vm570_vm1, %vm572_vm3  ;;  %vm3786_vm8 = vcmp.lt.s32.totalorder %v3078_v6, 8  ;;  %s429_s23 = scalar_lea.vmem %s3773_s0, %s2340_s14  ;;  %v2590_v18 = vld [vmem:[%s438_s20] sm:$0xff]   ;;  %vm3785_vm10 = vcmp.lt.s32.totalorder %v3080_v7, 8  ;;  %vm3784_vm11 = vcmp.ge.s32.totalorder %v3109_v14, 0  ;;  %v3138_v20 = vadd.s32 4294967295, %v3078_v6  ;;  %2727 = vmatpush3.bf16.msra.mxu1 %v2912_v35  ;;  %v2914_v9 = vld [vmem:[%s3780_s7 + $0x28] sm:$0xff]  }
  0x13   : > { %2708 = vmatprep.subr.bf16.mxu0 %v2987_v1  ;;  %vm3117_vm7 = vmand %vm571_vm2, %vm573_vm4  ;;  %v2599_v19 = vld [vmem:[%s429_s23] sm:$0xff]   ;;  %v3141_v21 = vadd.s32 4294967295, %v3080_v7  ;;  %s3834_s12 = smov (!%p3094_p7, %s2344_s12), 15  ;;  %v2591_v22 = vunpack.c.l.bf16 %v2590_v18  ;;  %v2592_v23 = vunpack.c.h.bf16 %v2590_v18  ;;  %vm3783_vm14 = vcmp.ge.s32.totalorder %v3112_v15, 0  ;;  %2728 = vmatprep.subr.bf16.mxu1 %v2987_v1 }
  0x14   : > { %vm657_vm9 = vmand %vm3103_vm5, %vm3790_vm0  ;;  %v2600_v24 = vunpack.c.l.bf16 %v2599_v19  ;;  %v2601_v25 = vunpack.c.h.bf16 %v2599_v19  ;;  %v3155_v26 = vld [vmem:[%s3779_s6] ss:$0 sm:$0xff]  ;;  %vm1108_vm15 = vcmp.ge.s32.totalorder %v3072_v4, 0  ;;  %vm3789_vm2 = vcmp.lt.s32.totalorder %v3109_v14, 8  ;;  %s2345_s15 = sshll.u32 %s3834_s12, 2  ;;  %s471_s12 = scalar_lea.vmem %s3781_s8, %s2340_s14 }
  0x15   : > { %vm658_vm12 = vmand %vm3117_vm7, %vm3787_vm6  ;;  %v490_v28 = vmul.f32 %v2591_v22, %v3101_v12  ;;  %vm3788_vm4 = vcmp.lt.s32.totalorder %v3112_v15, 8  ;;  %v491_v33 = vmul.f32 %v2592_v23, %v3101_v12  ;;  %s450_s20 = scalar_lea.vmem %s3775_s2, %s2345_s15  ;;  %v2913_v8 = vld [vmem:[%s3780_s7 + $0x40] sm:$0xff]   ;;  %v1626_v11 = vadd.s32 1, %v3072_v4  ;;  %s2578_s15 = sshll.u32 %s3047_s10, 4 }
  0x16   : > { %2709 = vmatpush3.bf16.msra.mxu0 %v2906_v10  ;;  %vm661_vm13 = vmand %vm657_vm9, %vm3786_vm8  ;;  %v520_v30 = vmul.f32 %v2600_v24, %v3101_v12  ;;  %v521_v32 = vmul.f32 %v2601_v25, %v3101_v12  ;;  %vm1109_vm9 = vcmp.ge.s32.totalorder %v3074_v5, 0  ;;  %vm3791_vm8 = vcmp.lt.s32.totalorder %v3141_v21, 8  ;;  %v2608_v48 = vld [vmem:[%s450_s20] sm:$0xff]   ;;  %2729 = vmatpush3.bf16.msra.mxu1 %v2914_v9  ;;  %s2157_s16 = ssub.s32 128, %s2578_s15  ;;  %s3838_s10 = smov (!%p473_p9, %s3047_s10), 7 }
  0x17   : > { %2710 = vmatprep.subr.bf16.mxu0 %v2987_v1  ;;  %vm662_vm1 = vmand %vm658_vm12, %vm3785_vm10  ;;  %v663_v29 = vsel %vm661_vm13, 1.0, %v2987_v1  ;;  %vm578_vm13 = vcmp.ge.s32.totalorder %v3138_v20, 0  ;;  %v498_v39 = vadd.f32 %v3155_v26, %v490_v28  ;;  %v499_v43 = vadd.f32 %v3155_v26, %v491_v33  ;;  %2730 = vmatprep.subr.bf16.mxu1 %v2987_v1  ;;  %p2158_p8 = scmp.lt.s32.totalorder %s2157_s16, 16  ;;  %s2352_s11 = sshll.u32 %s3838_s10, 1 }
  0x18   : > { %v664_v31 = vsel %vm662_vm1, 1.0, %v2987_v1  ;;  %vm921_vm3 = vmand %vm3103_vm5, %vm3784_vm11  ;;  %vm579_vm1 = vcmp.ge.s32.totalorder %v3141_v21, 0  ;;  %v522_v37 = vadd.f32 %v3155_v26, %v520_v30  ;;  %v523_v38 = vadd.f32 %v3155_v26, %v521_v32  ;;  %v2917_v32 = vld [vmem:[%s3780_s7 + $0x18] sm:$0xff]   ;;  %s476_s20 = scalar_lea.vmem %s3782_s9, %s2352_s11 }
  0x19   : > { %vm922_vm12 = vmand %vm3117_vm7, %vm3783_vm14  ;;  %v665_v36 = vpack.c.bf16 %v664_v31, %v663_v29  ;;  %vm582_vm11 = vcmp.lt.s32.totalorder %v3138_v20, 8  ;;  %v502_v56 = vmul.f32 0.1, %v498_v39  ;;  %v503_v57 = vmul.f32 0.1, %v499_v43  ;;  %s3836_s16 = smov (!%p2158_p8, %s2157_s16), 16 }
  0x1a   : > { %2711 = vmatpush3.bf16.msra.mxu0 %v2907_v17  ;;  %vm925_vm14 = vmand %vm921_vm3, %vm3789_vm2  ;;  %vm524_vm6 = vcmp.ge.f32.partialorder %v522_v37, 0.0  ;;  %vm525_vm3 = vcmp.ge.f32.partialorder %v523_v38, 0.0  ;;  %v526_v41 = vmul.f32 0.1, %v522_v37  ;;  %v527_v42 = vmul.f32 0.1, %v523_v38  ;;  %s2160_s17 = scvt.s32.f32 %s3836_s16 }
  0x1b   : > { %2712 = vmatprep.subr.bf16.mxu0 %v2987_v1  ;;  %vm926_vm10 = vmand %vm922_vm12, %vm3788_vm4  ;;  %v927_v40 = vsel %vm925_vm14, 1.0, %v2987_v1  ;;  %668 = vperm.xlu0 %2897, %v665_v36   ;;  %vm1110_vm4 = vcmp.lt.s32.totalorder %v3072_v4, 8  ;;  %vm1111_vm2 = vcmp.lt.s32.totalorder %v3074_v5, 8  ;;  %v2609_v58 = vunpack.c.l.bf16 %v2608_v48 }
  0x1c   : > { %vm580_vm12 = vmand %vm3103_vm5, %vm578_vm13  ;;  %v928_v44 = vsel %vm926_vm10, 1.0, %v2987_v1  ;;  %v528_v45 = vsel %vm524_vm6, %v522_v37, %v526_v41  ;;  %v529_v46 = vsel %vm525_vm3, %v523_v38, %v527_v42  ;;  %v2610_v59 = vunpack.c.h.bf16 %v2608_v48 }
  0x1d   : > { %vm581_vm14 = vmand %vm3117_vm7, %vm579_vm1  ;;  %v932_v47 = vpack.c.bf16 %v928_v44, %v927_v40  ;;  %v2605_v50 = vpack.c.bf16 %v529_v46, %v528_v45  ;;  %vm500_vm7 = vcmp.ge.f32.partialorder %v498_v39, 0.0  ;;  %v544_v0 = vmul.f32 %v2609_v58, %v3101_v12 }
  0x1e   : > { %2713 = vmatpush3.bf16.msra.mxu0 %v2908_v27  ;;  %vm584_vm5 = vmand %vm580_vm12, %vm582_vm11  ;;  %vm501_vm12 = vcmp.ge.f32.partialorder %v499_v43, 0.0  ;;  %v504_v60 = vsel %vm500_vm7, %v498_v39, %v502_v56  ;;  %v545_v2 = vmul.f32 %v2610_v59, %v3101_v12  ;;  %vm3802_vm7 = vcmp.lt.s32.totalorder %v3078_v6, 8  ;;  %v2915_v27 = vld [vmem:[%s3780_s7 + $0x20] sm:$0xff]   ;;  %v2921_v39 = vld [vmem:[%s3780_s7 + $0x8] sm:$0xff]  }
  0x1f   : > { %2714 = vmatprep.subr.bf16.mxu0 %v2987_v1  ;;  %vm585_vm10 = vmand %vm581_vm14, %vm3791_vm8  ;;  %935 = vperm.xlu1 %2898, %v932_v47   ;;  %v586_v51 = vsel %vm584_vm5, 1.0, %v2987_v1  ;;  %2621 = vst [vmem:[#allocation2 + $0x8] sm:$0xff] %v2605_v50   ;;  %v505_v61 = vsel %vm501_vm12, %v499_v43, %v503_v57  ;;  %vm3801_vm5 = vcmp.ge.s32.totalorder %v3080_v7, 0  ;;  %v1627_v12 = vadd.s32 1, %v3074_v5  ;;  %v2916_v57 = vld [vmem:[%s3780_s7 + $0xb8] sm:$0xff]  }
  0x20   : > { %v587_v52 = vsel %vm585_vm10, 1.0, %v2987_v1  ;;  %vm3233_vm6 = vmand %vm1108_vm15, %vm1110_vm4  ;;  %v2596_v62 = vpack.c.bf16 %v505_v61, %v504_v60  ;;  %v546_v16 = vadd.f32 %v3155_v26, %v544_v0  ;;  %v547_v4 = vadd.f32 %v3155_v26, %v545_v2  ;;  %2731 = vmatpush3.bf16.msra.mxu1 %v2915_v27  ;;  %v2938_v27 = vld [vmem:[%s3780_s7 + $0x120] sm:$0xff]  }
  0x21   : > { %v591_v54 = vpack.c.bf16 %v587_v52, %v586_v51  ;;  %vm3240_vm3 = vmand %vm1109_vm9, %vm1111_vm2  ;;  %2732 = vmatprep.subr.bf16.mxu1 %v2987_v1  ;;  %v600_v41 = vlaneseq  ;;  %v2990_v42 = vmov 1985246804  }
  0x22   : > { %2715 = vmatpush3.bf16.msra.mxu0 %v2909_v34  ;;  %vm1114_vm15 = vmand %vm3233_vm6, %vm578_vm13  ;;  %2597 = vst [vmem:[#allocation2] sm:$0xff] %v2596_v62   ;;  %v550_v19 = vmul.f32 0.1, %v546_v16  ;;  %v551_v22 = vmul.f32 0.1, %v547_v4  ;;  %v2919_v34 = vld [vmem:[%s3780_s7 + $0x10] sm:$0xff]   ;;  %v605_v43 = vunpack.c.l.s4 %v2990_v42 }
  0x23   : > { %2716 = vmatprep.subr.bf16.mxu0 %v2987_v1  ;;  %594 = vperm.xlu0 %2897, %v591_v54   ;;  %vm1115_vm2 = vmand %vm3240_vm3, %vm579_vm1  ;;  %v601_v45 = vshrl.u32 %v600_v41, 7 }
  0x24   : > { %vm1116_vm4 = vmand %vm1114_vm15, %vm582_vm11  ;;  %vm3803_vm15 = vcmp.lt.s32.totalorder %v3080_v7, 8  ;;  %2733 = vmatpush3.bf16.msra.mxu1 %v2917_v32  ;;  %v606_v46 = vunpack.c.0.s8 %v605_v43 }
  0x25   : > { %vm1117_vm9 = vmand %vm1115_vm2, %vm3791_vm8  ;;  %v1118_v63 = vsel %vm1116_vm4, 1.0, %v2987_v1  ;;  %vm3804_vm4 = vcmp.ge.s32.totalorder %v3109_v14, 0  ;;  %2734 = vmatprep.subr.bf16.mxu1 %v2987_v1 }
  0x26   : > { %2717 = vmatpush3.bf16.msra.mxu0 %v2911_v49  ;;  %v1119_v3 = vsel %vm1117_vm9, 1.0, %v2987_v1  ;;  %vm1301_vm14 = vmand %vm3233_vm6, %vm3790_vm0  ;;  %vm1631_vm0 = vcmp.lt.s32.totalorder %v1627_v12, 8  ;;  %v3385_v48 = vsub.s32 %v606_v46, %v601_v45  ;;  %v3389_v51 = vld [vmem:[#allocation2 + $0x8] sm:$0xf]  ;;  %v931_v24 = vld [vmem:[#allocation2 + $0xc] sm:$0x1] }
  0x27   : > { %2718 = vmatprep.subr.bf16.mxu0 %v2987_v1  ;;  %v1122_v10 = vpack.c.bf16 %v1119_v3, %v1118_v63  ;;  %vm1302_vm10 = vmand %vm3240_vm3, %vm3801_vm5  ;;  %v2918_v3 = vld [vmem:[%s3780_s7 + $0xb0] sm:$0xff]  }
  0x28   : > { %vm1303_vm12 = vmand %vm1301_vm14, %vm3802_vm7  ;;  %vm3805_vm14 = vcmp.ge.s32.totalorder %v3112_v15, 0  ;;  %vm1630_vm7 = vcmp.lt.s32.totalorder %v1626_v11, 8  ;;  %2735 = vmatpush3.bf16.msra.mxu1 %v2919_v34 }
  0x29   : > { %1125 = vperm.xlu1 %2898, %v1122_v10   ;;  %vm1304_vm2 = vmand %vm1302_vm10, %vm3803_vm15  ;;  %v3282_v13 = vsel %vm1303_vm12, 1.0, %v2987_v1  ;;  %vm1628_vm10 = vcmp.ge.s32.totalorder %v1626_v11, 0  ;;  %vm3806_vm12 = vcmp.lt.s32.totalorder %v3109_v14, 8  ;;  %2736 = vmatprep.subr.bf16.mxu1 %v2987_v1  ;;  %v3387_v49 = vld [vmem:[#allocation2 + $0x4] sm:$0xf] }
  0x2a   : > { %2719 = vmatpush3.bf16.msra.mxu0 %v2913_v8  ;;  %v3288_v17 = vsel %vm1304_vm2, 1.0, %v2987_v1  ;;  %vm1445_vm9 = vmand %vm3233_vm6, %vm3804_vm4  ;;  %vm1629_vm2 = vcmp.ge.s32.totalorder %v1627_v12, 0  ;;  %vm3807_vm6 = vcmp.lt.s32.totalorder %v3112_v15, 8 }
  0x2b   : > { %2744 = vmatprep.subr.bf16.mxu0 %v2987_v1  ;;  %v1307_v5 = vpack.c.bf16 %v3288_v17, %v3282_v13  ;;  %vm1446_vm5 = vmand %vm3240_vm3, %vm3805_vm14  ;;  %vm548_vm3 = vcmp.ge.f32.partialorder %v546_v16, 0.0  ;;  %vm549_vm14 = vcmp.ge.f32.partialorder %v547_v4, 0.0  ;;  %v2899_v36 = vpack.i.bf16 %v3288_v17, %v3282_v13 }
  0x2c   : > { %vm1447_vm15 = vmand %vm1445_vm9, %vm3806_vm12  ;;  %v552_v28 = vsel %vm548_vm3, %v546_v16, %v550_v19  ;;  %v553_v29 = vsel %vm549_vm14, %v547_v4, %v551_v22  ;;  %vm3816_vm3 = vcmp.lt.s32.totalorder %v3112_v15, 8  ;;  %2737 = vmatpush3.bf16.msra.mxu1 %v2921_v39  ;;  %v2920_v22 = vld [vmem:[%s3780_s7 + $0xa8] sm:$0xff]  }
  0x2d   : > { %1310 = vperm.xlu0 %2897, %v1307_v5   ;;  %vm1448_vm4 = vmand %vm1446_vm5, %vm3807_vm6  ;;  %v1449_v18 = vsel %vm1447_vm15, 1.0, %v2987_v1  ;;  %v2614_v31 = vpack.c.bf16 %v553_v29, %v552_v28  ;;  %vm3814_vm15 = vcmp.ge.s32.totalorder %v3112_v15, 0  ;;  %vm3815_vm6 = vcmp.lt.s32.totalorder %v3109_v14, 8  ;;  %2738 = vmatprep.subr.bf16.mxu1 %v2987_v1  ;;  %v3433_v39 = vld [vmem:[#allocation2 + $0x8] sm:$0xf] }
  0x2e   : > { %v1450_v23 = vsel %vm1448_vm4, 1.0, %v2987_v1  ;;  %vm3307_vm8 = vmand %vm1628_vm10, %vm1630_vm7  ;;  %vm2988_vm10 = vmmov 0  }
  0x2f   : > { %v1454_v25 = vpack.c.bf16 %v1450_v23, %v1449_v18  ;;  %vm3311_vm9 = vmand %vm1629_vm2, %vm1631_vm0  ;;  %2720 = vmatprep.mubr.msk.bf16.mxu0 %vm2988_vm10, %v2987_v1  ;;  %2740 = vmatprep.mubr.msk.bf16.mxu1 %vm2988_vm10, %v2987_v1  ;;  %2622 = vst [vmem:[#allocation2 + $0x10] sm:$0xff] %v2614_v31  }
  0x30   : > { %vm1634_vm5 = vmand %vm3307_vm8, %vm578_vm13  ;;  %vm3812_vm13 = vcmp.lt.s32.totalorder %v3141_v21, 8 }
  0x31   : > { %1457 = vperm.xlu1 %2898, %v1454_v25   ;;  %vm1635_vm0 = vmand %vm3311_vm9, %vm579_vm1  ;;  %vm3813_vm1 = vcmp.ge.s32.totalorder %v3109_v14, 0 }
  0x32   : > { %vm1636_vm7 = vmand %vm1634_vm5, %vm582_vm11  ;;  %vm3817_vm5 = vcmp.ge.s32.totalorder %v3078_v6, 0 }
  0x33   : > { %vm1637_vm12 = vmand %vm1635_vm0, %vm3812_vm13  ;;  %v1638_v30 = vsel %vm1636_vm7, 1.0, %v2987_v1  ;;  %vm3818_vm7 = vcmp.ge.s32.totalorder %v3080_v7, 0 }
  0x34   : > { %v1639_v33 = vsel %vm1637_vm12, 1.0, %v2987_v1  ;;  %vm1965_vm11 = vmand %vm3307_vm8, %vm3813_vm1  ;;  %vm3819_vm12 = vcmp.lt.s32.totalorder %v3078_v6, 8  ;;  %v2923_v6 = vld [vmem:[%s3780_s7] sm:$0xff]  }
  0x35   : > { %v1642_v20 = vpack.c.bf16 %v1639_v33, %v1638_v30  ;;  %vm1966_vm2 = vmand %vm3311_vm9, %vm3814_vm15  ;;  %2739 = vmatpush3.bf16.msra.mxu1 %v2923_v6 }
  0x36   : > { %vm1967_vm4 = vmand %vm1965_vm11, %vm3815_vm6  ;;  %vm3820_vm11 = vcmp.lt.s32.totalorder %v3080_v7, 8  ;;  %2764 = vmatprep.subr.bf16.mxu1 %v2987_v1  ;;  %v2989_v7 = vmov 839922192   ;;  %vm953_vm6 = vsmask.f32 4368 }
  0x37   : > { %1645 = vperm.xlu0 %2897, %v1642_v20   ;;  %vm1968_vm14 = vmand %vm1966_vm2, %vm3816_vm3  ;;  %v1969_v21 = vsel %vm1967_vm4, 1.0, %v2987_v1  ;;  %v598_v40 = vunpack.c.l.s4 %v2989_v7  ;;  %vm952_vm2 = vsmask.f32 256  ;;  %v2922_v20 = vld [vmem:[%s3780_s7 + $0xa0] sm:$0xff]   ;;  %v3436_v7 = vld [vmem:[#allocation2 + $0xc] sm:$0xf] }
  0x38   : > { %v1970_v35 = vsel %vm1968_vm14, 1.0, %v2987_v1  ;;  %vm1821_vm0 = vmand %vm3307_vm8, %vm3817_vm5  ;;  %vm611_vm8 = vsmask.f32 3328  ;;  %vm809_vm14 = vsmask.f32 4352 }
  0x39   : > { %v1974_v14 = vpack.c.bf16 %v1970_v35, %v1969_v21  ;;  %vm1822_vm13 = vmand %vm3311_vm9, %vm3818_vm7  ;;  %v599_v44 = vunpack.c.0.s8 %v598_v40  ;;  %vm612_vm9 = vsmask.f32 7440  ;;  %v929_v21 = vld [vmem:[#allocation2 + $0x4] sm:$0xf]  ;;  %v588_v35 = vld [vmem:[#allocation2] sm:$0x8] }
  0x3a   : > { %vm1823_vm1 = vmand %vm1821_vm0, %vm3819_vm12  ;;  %vm1003_vm5 = vsmask.f32 7424 }
  0x3b   : > { %1977 = vperm.xlu1 %2898, %v1974_v14   ;;  %vm1824_vm15 = vmand %vm1822_vm13, %vm3820_vm11  ;;  %v1825_v15 = vsel %vm1823_vm1, 1.0, %v2987_v1  ;;  %v3383_v47 = vsub.s32 %v599_v44, %v601_v45  ;;  %v2924_v45 = vld [vmem:[%s3780_s7 + $0x98] sm:$0xff]  }
  0x3c   : > { %v1826_v37 = vsel %vm1824_vm15, 1.0, %v2987_v1  ;;  %vm3414_vm4 = vmor %vm611_vm8, %vm612_vm9 }
  0x3d   : > { %v1827_v38 = vpack.c.bf16 %v1826_v37, %v1825_v15  ;;  %vm3420_vm3 = vmor %vm952_vm2, %vm953_vm6 }
  0x3f   : > { %1830 = vperm.xlu0 %2897, %v1827_v38   ;;  %2900 = vperm.xlu1 %2898, %v2899_v36  }
  0x96   : > { %v669_v50 = vpop.permute.xlu0 %668 }
  0x97   : > { %v677_v52 = vrot.slane %v669_v50, %v3383_v47  ;;  %v684_v53 = vrot.slane %v669_v50, %v3385_v48 }
  0x99   : > { %v687_v54 = vmul.bf16 %v677_v52, %v3387_v49  ;;  %v688_v55 = vmul.bf16 %v684_v53, %v3389_v51 }
  0x9a   : > { %v936_v56 = vpop.permute.xlu1 %935 }
  0x9b   : > { %v944_v58 = vrot.slane %v936_v56, %v3383_v47  ;;  %v951_v59 = vrot.slane %v936_v56, %v3385_v48  ;;  %v2377_v60 = vcombine.low %v687_v54, %v688_v55 }
  0x9d   : > { %v956_v61 = vshrl.u32 %v944_v58, 16  ;;  %v964_v62 = vshrl.u32 %v951_v59, 16  ;;  %2721 = vmatmul.mubr.bf16.vlgmr.msra.gmra.mxu0 %v2377_v60  ;;  %v967_v10 = vshll.u32 %v951_v59, 16  ;;  %v959_v4 = vshll.u32 %v944_v58, 16 }
  0x9e   : > { %v595_v63 = vpop.permute.xlu0 %594  ;;  %2745 = vmatpush3.bf16.msra.mxu0 %v2916_v57  ;;  %2760 = vmatprep.mubr.msk.bf16.mxu0 %vm2988_vm10, %v2987_v1 }
  0x9f   : > { %v603_v0 = vrot.slane %v595_v63, %v3383_v47  ;;  %v610_v2 = vrot.slane %v595_v63, %v3385_v48  ;;  %v958_v8 = vrot.slane %v956_v61, 7  ;;  %v966_v9 = vrot.slane %v964_v62, 7  ;;  %2746 = vmatprep.subr.bf16.mxu0 %v2987_v1  ;;  %v2925_v63 = vld [vmem:[%s3780_s7 + $0x90] sm:$0xff]  }
  0xa1   : > { %v615_v11 = vshll.u32 %v603_v0, 16  ;;  %v618_v12 = vshrl.u32 %v603_v0, 16  ;;  %v624_v13 = vshll.u32 %v610_v2, 16  ;;  %v628_v16 = vshrl.u32 %v610_v2, 16 }
  0xa2   : > { %2747 = vmatpush3.bf16.msra.mxu0 %v2918_v3  ;;  %v971_v23 = vrot.slane %v966_v9, 4  ;;  %v962_v25 = vrot.slane %v958_v8, 4  ;;  %v969_v26 = vor.u32 %v967_v10, %v966_v9  ;;  %v961_v32 = vor.u32 %v959_v4, %v958_v8 }
  0xa3   : > { %v617_v17 = vrot.slane %v615_v11, 5  ;;  %v620_v5 = vrot.slane %v618_v12, 4  ;;  %v626_v18 = vrot.slane %v624_v13, 5  ;;  %v630_v19 = vrot.slane %v628_v16, 4  ;;  %2748 = vmatprep.subr.bf16.mxu0 %v2987_v1 }
  0xa4   : > { %v1126_v30 = vpop.permute.xlu1 %1125  ;;  %v977_v34 = vmul.bf16 %v971_v23, %v931_v24  ;;  %v970_v38 = vsel %vm3420_vm3, %v962_v25, %v969_v26  ;;  %v975_v41 = vmul.bf16 %v961_v32, %v929_v21  ;;  %v2927_v23 = vld [vmem:[%s3780_s7 + $0x88] sm:$0xff]  }
  0xa5   : > { %v621_v28 = vor.u32 %v620_v5, %v617_v17  ;;  %v631_v29 = vor.u32 %v630_v19, %v626_v18  ;;  %v1134_v37 = vrot.slane %v1126_v30, %v3383_v47  ;;  %v636_v42 = vmul.bf16 %v617_v17, %v588_v35 }
  0xa6   : > { %2749 = vmatpush3.bf16.msra.mxu0 %v2920_v22  ;;  %v3440_v43 = vrot.slane %v1126_v30, %v3385_v48  ;;  %v2413_v46 = vcombine.low %v977_v34, %v977_v34  ;;  %v1451_v30 = vld [vmem:[#allocation2 + $0x8] sm:$0xf]  ;;  %v1453_v34 = vld [vmem:[#allocation2 + $0x10] sm:$0x1] }
  0xa7   : > { %v622_v33 = vrot.slane %v621_v28, 4  ;;  %v632_v14 = vrot.slane %v631_v29, 4  ;;  %2750 = vmatprep.subr.bf16.mxu0 %v2987_v1  ;;  %v1143_v54 = vshll.u32 %v1134_v37, 16  ;;  %v1146_v59 = vshrl.u32 %v1134_v37, 16 }
  0xa8   : > { %v1311_v15 = vpop.permute.xlu0 %1310  ;;  %v1156_v60 = vshrl.u32 %v3440_v43, 16  ;;  %v3471_v12 = vshll.u32 %v2413_v46, 16 }
  0xa9   : > { %v627_v36 = vsel %vm3414_vm4, %v622_v33, %v626_v18  ;;  %v1319_v40 = vrot.slane %v1311_v15, %v3383_v47  ;;  %v1326_v44 = vrot.slane %v1311_v15, %v3385_v48  ;;  %v638_v50 = vmul.bf16 %v632_v14, %v3389_v51 }
  0xaa   : > { %v637_v6 = vmul.bf16 %v627_v36, %v3387_v49  ;;  %2751 = vmatpush3.bf16.msra.mxu0 %v2922_v20  ;;  %v976_v49 = vmul.bf16 %v970_v38, %v3433_v39  ;;  %v1152_v51 = vshll.u32 %v3440_v43, 16  ;;  %v3467_v9 = vrot.slane %v1143_v54, 5 }
  0xab   : > { %v3449_v52 = vmul.bf16 %v1319_v40, %v3433_v39  ;;  %2752 = vmatprep.subr.bf16.mxu0 %v2987_v1  ;;  %v3453_v55 = vmul.bf16 %v1326_v44, %v3436_v7  ;;  %v3464_v0 = vcombine.low %v638_v50, %v638_v50  ;;  %v3473_v13 = vrot.slane %v1146_v59, 4 }
  0xac   : > { %v1458_v53 = vpop.permute.xlu1 %1457  ;;  %v2386_v58 = vcombine.low %v636_v42, %v637_v6  ;;  %v3469_v10 = vcombine.low %v975_v41, %v976_v49  ;;  %v3475_v18 = vrot.slane %v1152_v51, 5  ;;  %v2929_v42 = vld [vmem:[%s3780_s7 + $0x80] sm:$0xff]  }
  0xad   : > { %v1466_v56 = vrot.slane %v1458_v53, %v3383_v47  ;;  %v1473_v57 = vrot.slane %v1458_v53, %v3385_v48  ;;  %v2464_v61 = vcombine.low %v3449_v52, %v3453_v55  ;;  %v819_v29 = vshrl.u32 %v3464_v0, 16  ;;  %v1640_v53 = vld [vmem:[#allocation2 + $0x8] sm:$0x8]  ;;  %v2947_v55 = vld [vmem:[%s3780_s7 + $0x160] sm:$0xff]  }
  0xae   : > { %2753 = vmatpush3.bf16.msra.mxu0 %v2924_v45  ;;  %v811_v17 = vshrl.u32 %v2386_v58, 16  ;;  %v814_v5 = vshll.u32 %v2386_v58, 16  ;;  %v1005_v24 = vshrl.u32 %v3469_v10, 16  ;;  %v822_v37 = vshll.u32 %v3464_v0, 16  ;;  %v1452_v58 = vld [vmem:[#allocation2 + $0xc] sm:$0xf] }
  0xaf   : > { %v1475_v62 = vshrl.u32 %v1466_v56, 16  ;;  %v1478_v2 = vshll.u32 %v1466_v56, 16  ;;  %v1483_v3 = vshrl.u32 %v1473_v57, 16  ;;  %v1486_v8 = vshll.u32 %v1473_v57, 16  ;;  %2754 = vmatprep.subr.bf16.mxu0 %v2987_v1  ;;  %v2952_v52 = vld [vmem:[%s3780_s7 + $0x1a8] sm:$0xff]  }
  0xb0   : > { %v3485_v15 = vrot.slane %v811_v17, 3  ;;  %v3487_v36 = vrot.slane %v814_v5, 4  ;;  %v1641_v5 = vld [vmem:[#allocation2 + $0x10] sm:$0xf]  ;;  %v1149_v43 = vor.u32 %v3473_v13, %v3467_v9 }
  0xb1   : > { %v1477_v11 = vrot.slane %v1475_v62, 7  ;;  %v1485_v16 = vrot.slane %v1483_v3, 7  ;;  %v2928_v13 = vld [vmem:[%s3780_s7 + $0xf0] sm:$0xff]  }
  0xb2   : > { %v1646_v4 = vpop.permute.xlu0 %1645  ;;  %2755 = vmatpush3.bf16.msra.mxu0 %v2925_v63 }
  0xb3   : > { %v1654_v19 = vrot.slane %v1646_v4, %v3383_v47  ;;  %v1661_v22 = vrot.slane %v1646_v4, %v3385_v48  ;;  %v1480_v25 = vor.u32 %v1478_v2, %v1477_v11  ;;  %v1481_v26 = vrot.slane %v1477_v11, 4  ;;  %2756 = vmatprep.subr.bf16.mxu0 %v2987_v1  ;;  %v1971_v4 = vld [vmem:[#allocation2 + $0xc] sm:$0xf] }
  0xb4   : > { %v1488_v28 = vor.u32 %v1486_v8, %v1485_v16  ;;  %v1490_v32 = vrot.slane %v1485_v16, 4 }
  0xb5   : > { %v1663_v33 = vshll.u32 %v1654_v19, 16  ;;  %v1666_v20 = vshrl.u32 %v1654_v19, 16  ;;  %v1672_v21 = vshll.u32 %v1661_v22, 16  ;;  %v1676_v35 = vshrl.u32 %v1661_v22, 16 }
  0xb6   : > { %v1978_v14 = vpop.permute.xlu1 %1977  ;;  %2757 = vmatpush3.bf16.msra.mxu0 %v2927_v23  ;;  %v1494_v44 = vmul.bf16 %v1480_v25, %v1451_v30  ;;  %v1489_v50 = vsel %vm3420_vm3, %v1481_v26, %v1488_v28  ;;  %v3498_v49 = vmul.bf16 %v1490_v32, %v1453_v34  ;;  %v1973_v23 = vld [vmem:[#allocation2 + $0x14] sm:$0x1] }
  0xb7   : > { %v1665_v38 = vrot.slane %v1663_v33, 5  ;;  %v1668_v6 = vrot.slane %v1666_v20, 4  ;;  %v1674_v40 = vrot.slane %v1672_v21, 5  ;;  %v1986_v41 = vrot.slane %v1978_v14, %v3383_v47  ;;  %2758 = vmatprep.subr.bf16.mxu0 %v2987_v1 }
  0xb8   : > { %v1678_v45 = vrot.slane %v1676_v35, 4  ;;  %v1993_v46 = vrot.slane %v1978_v14, %v3385_v48  ;;  %v1495_v0 = vmul.bf16 %v1489_v50, %v1452_v58  ;;  %v817_v35 = vor.u32 %v3487_v36, %v3485_v15 }
  0xb9   : > { %v1669_v54 = vor.u32 %v1668_v6, %v1665_v38  ;;  %v1995_v56 = vshrl.u32 %v1986_v41, 16  ;;  %v1998_v57 = vshll.u32 %v1986_v41, 16  ;;  %v1684_v16 = vmul.bf16 %v1665_v38, %v1640_v53 }
  0xba   : > { %v1679_v59 = vor.u32 %v1678_v45, %v1674_v40  ;;  %v2003_v51 = vshrl.u32 %v1993_v46, 16  ;;  %v2006_v62 = vshll.u32 %v1993_v46, 16  ;;  %v1831_v63 = vpop.permute.xlu0 %1830  ;;  %2759 = vmatpush3.bf16.msra.mxu0 %v2929_v42  ;;  %v3502_v22 = vcombine.low %v1494_v44, %v1495_v0 }
  0xbb   : > { %v1670_v2 = vrot.slane %v1669_v54, 4  ;;  %v1997_v3 = vrot.slane %v1995_v56, 7  ;;  %v1839_v8 = vrot.slane %v1831_v63, %v3383_v47  ;;  %v1846_v11 = vrot.slane %v1831_v63, %v3385_v48  ;;  %2784 = vmatprep.subr.bf16.mxu0 %v2987_v1  ;;  %v1972_v47 = vld [vmem:[#allocation2 + $0x10] sm:$0xf]  ;;  %v2926_v54 = vld [vmem:[%s3780_s7 + $0xf8] sm:$0xff]  }
  0xbc   : > { %v2005_v17 = vrot.slane %v2003_v51, 7  ;;  %v1680_v19 = vrot.slane %v1679_v59, 4  ;;  %v821_v14 = vrot.slane %v819_v29, 3  ;;  %v824_v45 = vrot.slane %v822_v37, 4  ;;  %v2932_v51 = vld [vmem:[%s3780_s7 + $0x138] sm:$0xff]  }
  0xbd   : > { %v2000_v25 = vor.u32 %v1998_v57, %v1997_v3  ;;  %v2001_v26 = vrot.slane %v1997_v3, 4  ;;  %v1675_v28 = vsel %vm3414_vm4, %v1670_v2, %v1674_v40  ;;  %v3507_v30 = vmul.bf16 %v1839_v8, %v1452_v58 }
  0xbe   : > { %v2008_v48 = vor.u32 %v2006_v62, %v2005_v17  ;;  %v2010_v32 = vrot.slane %v2005_v17, 4  ;;  %v1686_v33 = vmul.bf16 %v1680_v19, %v1641_v5  ;;  %v1685_v20 = vmul.bf16 %v1675_v28, %v1452_v58 }
  0xbf   : > { %v2014_v21 = vmul.bf16 %v2000_v25, %v1971_v4  ;;  %v3509_v34 = vmul.bf16 %v1846_v11, %v1641_v5  ;;  %v1007_v46 = vshll.u32 %v3469_v10, 16  ;;  %v1158_v50 = vrot.slane %v1156_v60, 4  ;;  %v2934_v4 = vld [vmem:[%s3780_s7 + $0x130] sm:$0xff]  }
  0xc0   : > { %v2009_v38 = vsel %vm3420_vm3, %v2001_v26, %v2008_v48  ;;  %v2016_v6 = vmul.bf16 %v2010_v32, %v1973_v23  ;;  %v2516_v41 = vcombine.low %v1686_v33, %v1686_v33  ;;  %v2515_v40 = vcombine.low %v1684_v16, %v1685_v20  ;;  %v2930_v26 = vld [vmem:[%s3780_s7 + $0xe8] sm:$0xff]  }
  0xc1   : > { %v2015_v42 = vmul.bf16 %v2009_v38, %v1972_v47  ;;  %v2541_v44 = vcombine.low %v3507_v30, %v3509_v34  ;;  %v2490_v15 = vcombine.low %v3498_v49, %v3498_v49  ;;  %v825_v53 = vor.u32 %v824_v45, %v821_v14  ;;  %v2936_v20 = vld [vmem:[%s3780_s7 + $0x128] sm:$0xff]   ;;  %v1120_v14 = vld [vmem:[#allocation2 + $0x4] sm:$0x8] }
  0xc2   : > { %v1721_v29 = vshrl.u32 %v2516_v41, 16  ;;  %v1724_v36 = vshll.u32 %v2516_v41, 16  ;;  %v1009_v56 = vrot.slane %v1007_v46, 1  ;;  %v1014_v57 = vrot.slane %v3471_v12, 1 }
  0xc3   : > { %v2566_v31 = vcombine.low %v2014_v21, %v2015_v42  ;;  %v2567_v60 = vcombine.low %v2016_v6, %v2016_v6  ;;  %v826_v49 = vsel %vm809_vm14, %v817_v35, %v825_v53  ;;  %v1523_v62 = vshrl.u32 %v3502_v22, 16  ;;  %v2931_v6 = vld [vmem:[%s3780_s7 + $0xe0] sm:$0xff]   ;;  %v2937_v53 = vld [vmem:[%s3780_s7 + $0xc8] sm:$0xff]  }
  0xc4   : > { %v1723_v37 = vrot.slane %v1721_v29, 3  ;;  %v1726_v58 = vrot.slane %v1724_v36, 4  ;;  %v1010_v59 = vor.u32 %v1009_v56, %v1005_v24  ;;  %2741 = vmatmul.mubr.bf16.vlgmr.msra.gmra.mxu1 %v826_v49  ;;  %v1525_v12 = vshll.u32 %v3502_v22, 16 }
  0xc5   : > { %v1530_v63 = vshll.u32 %v2490_v15, 16  ;;  %v1713_v0 = vshrl.u32 %v2515_v40, 16  ;;  %v1159_v2 = vor.u32 %v1158_v50, %v3475_v18  ;;  %2765 = vmatpush3.bf16.msra.mxu1 %v2926_v54  ;;  %2780 = vmatprep.mubr.msk.bf16.mxu1 %vm2988_vm10, %v2987_v1  ;;  %v1716_v24 = vshll.u32 %v2515_v40, 16 }
  0xc6   : > { %v1015_v10 = vsel %vm1003_vm5, %v1010_v59, %v1014_v57  ;;  %2766 = vmatprep.subr.bf16.mxu1 %v2987_v1  ;;  %v1527_v3 = vrot.slane %v1525_v12, 1  ;;  %v1727_v16 = vor.u32 %v1726_v58, %v1723_v37  ;;  %v2043_v5 = vshrl.u32 %v2566_v31, 16  ;;  %v2943_v58 = vld [vmem:[%s3780_s7 + $0x108] sm:$0xff]   ;;  %v2945_v59 = vld [vmem:[%s3780_s7 + $0x100] sm:$0xff]   ;;  %v2948_v12 = vld [vmem:[%s3780_s7 + $0x1b8] sm:$0xff]  }
  0xc7   : > { %2761 = vmatmul.mubr.bf16.vlgmr.msra.gmra.mxu0 %v1015_v10  ;;  %v1532_v8 = vrot.slane %v1530_v63, 1  ;;  %v1715_v11 = vrot.slane %v1713_v0, 3  ;;  %v1718_v17 = vrot.slane %v1716_v24, 4  ;;  %v2045_v19 = vshll.u32 %v2566_v31, 16  ;;  %v2941_v31 = vld [vmem:[%s3780_s7 + $0x110] sm:$0xff]   ;;  %v2956_v10 = vld [vmem:[%s3780_s7 + $0x198] sm:$0xff]  }
  0xc8   : > { %2785 = vmatpush3.bf16.msra.mxu0 %v2932_v51  ;;  %2800 = vmatprep.mubr.msk.bf16.mxu0 %vm2988_vm10, %v2987_v1  ;;  %v2050_v22 = vshll.u32 %v2567_v60, 16  ;;  %v1150_v23 = vrot.slane %v1149_v43, 4  ;;  %v1528_v25 = vor.u32 %v1527_v3, %v1523_v62  ;;  %v1160_v33 = vrot.slane %v1159_v2, 4  ;;  %v2939_v43 = vld [vmem:[%s3780_s7 + $0xc0] sm:$0xff]   ;;  %v2942_v51 = vld [vmem:[%s3780_s7 + $0x178] sm:$0xff]   ;;  %v2944_v63 = vld [vmem:[%s3780_s7 + $0x170] sm:$0xff]  }
  0xc9   : > { %2786 = vmatprep.subr.bf16.mxu0 %v2987_v1  ;;  %2767 = vmatpush3.bf16.msra.mxu1 %v2928_v13  ;;  %v1719_v28 = vor.u32 %v1718_v17, %v1715_v11  ;;  %v2047_v47 = vrot.slane %v2045_v19, 1  ;;  %v1164_v40 = vmul.bf16 %v3467_v9, %v1120_v14  ;;  %v2950_v0 = vld [vmem:[%s3780_s7 + $0x1b0] sm:$0xff]   ;;  %v2946_v2 = vld [vmem:[%s3780_s7 + $0x168] sm:$0xff]   ;;  %v2949_v13 = vld [vmem:[%s3780_s7 + $0x158] sm:$0xff]  }
  0xca   : > { %v2052_v48 = vrot.slane %v2050_v22, 1  ;;  %2768 = vmatprep.subr.bf16.mxu1 %v2987_v1  ;;  %v3555_v32 = vsel %vm1003_vm5, %v1528_v25, %v1532_v8  ;;  %v1155_v38 = vsel %vm3414_vm4, %v1150_v23, %v3475_v18  ;;  %v1166_v45 = vmul.bf16 %v1160_v33, %v3436_v7  ;;  %v2933_v18 = vld [vmem:[%s3780_s7 + $0xd8] sm:$0xff]   ;;  %v2935_v7 = vld [vmem:[%s3780_s7 + $0xd0] sm:$0xff]   ;;  %v2953_v8 = vld [vmem:[%s3780_s7 + $0x148] sm:$0xff]  }
  0xcb   : > { %v3561_v21 = vsel %vm809_vm14, %v1719_v28, %v1727_v16  ;;  %v2048_v35 = vor.u32 %v2047_v47, %v2043_v5  ;;  %v1165_v42 = vmul.bf16 %v1155_v38, %v3433_v39  ;;  %v2940_v39 = vld [vmem:[%s3780_s7 + $0x118] sm:$0xff]   ;;  %v2951_v24 = vld [vmem:[%s3780_s7 + $0x150] sm:$0xff]   ;;  %v2959_v11 = vld [vmem:[%s3780_s7 + $0x188] sm:$0xff]  }
  0xcc   : > { %2787 = vmatpush3.bf16.msra.mxu0 %v2934_v4  ;;  %v2439_v9 = vcombine.low %v1166_v45, %v1166_v45  ;;  %v2957_v3 = vld [vmem:[%s3780_s7 + $0x190] sm:$0xff]   ;;  %v2955_v16 = vld [vmem:[%s3780_s7 + $0x140] sm:$0xff]   ;;  %v2958_v17 = vld [vmem:[%s3780_s7 + $0x1f8] sm:$0xff]  }
  0xcd   : > { %2788 = vmatprep.subr.bf16.mxu0 %v2987_v1  ;;  %2769 = vmatpush3.bf16.msra.mxu1 %v2930_v26  ;;  %v3571_v41 = vsel %vm1003_vm5, %v2048_v35, %v2052_v48  ;;  %v2438_v46 = vcombine.low %v1164_v40, %v1165_v42  ;;  %v2961_v4 = vld [vmem:[%s3780_s7 + $0x180] sm:$0xff]   ;;  %v2964_v5 = vld [vmem:[%s3780_s7 + $0x238] sm:$0xff]   ;;  %v2960_v19 = vld [vmem:[%s3780_s7 + $0x1f0] sm:$0xff]  }
  0xce   : > { %2770 = vmatprep.subr.bf16.mxu1 %v2987_v1  ;;  %v1201_v50 = vshrl.u32 %v2439_v9, 16  ;;  %v1204_v15 = vshll.u32 %v2439_v9, 16  ;;  %v2966_v22 = vld [vmem:[%s3780_s7 + $0x230] sm:$0xff]   ;;  %v2962_v23 = vld [vmem:[%s3780_s7 + $0x1e8] sm:$0xff]   ;;  %v2963_v26 = vld [vmem:[%s3780_s7 + $0x1e0] sm:$0xff]  }
  0xcf   : > { %v1193_v29 = vshrl.u32 %v2438_v46, 16  ;;  %v1196_v36 = vshll.u32 %v2438_v46, 16  ;;  %v2968_v25 = vld [vmem:[%s3780_s7 + $0x228] sm:$0xff]   ;;  %v2970_v28 = vld [vmem:[%s3780_s7 + $0x220] sm:$0xff]   ;;  %v2965_v47 = vld [vmem:[%s3780_s7 + $0x1d8] sm:$0xff]  }
  0xd0   : > { %2789 = vmatpush3.bf16.msra.mxu0 %v2936_v20  ;;  %v1203_v54 = vrot.slane %v1201_v50, 3  ;;  %v1206_v56 = vrot.slane %v1204_v15, 4  ;;  %v2972_v48 = vld [vmem:[%s3780_s7 + $0x218] sm:$0xff]   ;;  %v2973_v33 = vld [vmem:[%s3780_s7 + $0x210] sm:$0xff]   ;;  %v2969_v20 = vld [vmem:[%s3780_s7 + $0x1c8] sm:$0xff]  }
  0xd1   : > { %2790 = vmatprep.subr.bf16.mxu0 %v2987_v1  ;;  %2771 = vmatpush3.bf16.msra.mxu1 %v2931_v6  ;;  %v1195_v57 = vrot.slane %v1193_v29, 3  ;;  %v1198_v37 = vrot.slane %v1196_v36, 4  ;;  %v2971_v35 = vld [vmem:[%s3780_s7 + $0x1c0] sm:$0xff]  }
  0xd2   : > { %2772 = vmatprep.subr.bf16.mxu1 %v2987_v1  ;;  %v1207_v49 = vor.u32 %v1206_v56, %v1203_v54  ;;  %v2975_v14 = vld [vmem:[%s3780_s7 + $0x200] sm:$0xff]  }
  0xd3   : > { %v1199_v60 = vor.u32 %v1198_v37, %v1195_v57 }
  0xd4   : > { %2791 = vmatpush3.bf16.msra.mxu0 %v2938_v27 }
  0xd5   : > { %2792 = vmatprep.subr.bf16.mxu0 %v2987_v1  ;;  %2773 = vmatpush3.bf16.msra.mxu1 %v2933_v18  ;;  %v1208_v62 = vsel %vm809_vm14, %v1199_v60, %v1207_v49 }
  0xd6   : > { %2774 = vmatprep.subr.bf16.mxu1 %v2987_v1 }
  0xd8   : > { %2793 = vmatpush3.bf16.msra.mxu0 %v2940_v39 }
  0xd9   : > { %2794 = vmatprep.subr.bf16.mxu0 %v2987_v1  ;;  %2775 = vmatpush3.bf16.msra.mxu1 %v2935_v7 }
  0xda   : > { %2776 = vmatprep.subr.bf16.mxu1 %v2987_v1 }
  0xdc   : > { %2795 = vmatpush3.bf16.msra.mxu0 %v2941_v31 }
  0xdd   : > { %2796 = vmatprep.subr.bf16.mxu0 %v2987_v1  ;;  %2777 = vmatpush3.bf16.msra.mxu1 %v2937_v53 }
  0xde   : > { %2778 = vmatprep.subr.bf16.mxu1 %v2987_v1 }
  0xe0   : > { %2797 = vmatpush3.bf16.msra.mxu0 %v2943_v58 }
  0xe1   : > { %2798 = vmatprep.subr.bf16.mxu0 %v2987_v1  ;;  %2779 = vmatpush3.bf16.msra.mxu1 %v2939_v43 }
  0xe2   : > { %2804 = vmatprep.subr.bf16.mxu1 %v2987_v1 }
  0xe4   : > { %2799 = vmatpush3.bf16.msra.mxu0 %v2945_v59  ;;  %2781 = vmatmul.mubr.bf16.vlgmr.msra.gmra.mxu1 %v1208_v62 }
  0xe5   : > { %2824 = vmatprep.subr.bf16.mxu0 %v2987_v1  ;;  %2805 = vmatpush3.bf16.msra.mxu1 %v2942_v51 }
  0xe6   : > { %2820 = vmatprep.mubr.msk.bf16.mxu1 %vm2988_vm10, %v2987_v1  ;;  %2806 = vmatprep.subr.bf16.mxu1 %v2987_v1 }
  0xe7   : > { %2801 = vmatmul.mubr.bf16.vlgmr.msra.gmra.mxu0 %v2464_v61  ;;  %v2954_v61 = vld [vmem:[%s3780_s7 + $0x1a0] sm:$0xff]  }
  0xe8   : > { %2825 = vmatpush3.bf16.msra.mxu0 %v2948_v12  ;;  %2840 = vmatprep.mubr.msk.bf16.mxu0 %vm2988_vm10, %v2987_v1 }
  0xe9   : > { %2826 = vmatprep.subr.bf16.mxu0 %v2987_v1  ;;  %2807 = vmatpush3.bf16.msra.mxu1 %v2944_v63 }
  0xea   : > { %2808 = vmatprep.subr.bf16.mxu1 %v2987_v1 }
  0xec   : > { %2827 = vmatpush3.bf16.msra.mxu0 %v2950_v0 }
  0xed   : > { %2828 = vmatprep.subr.bf16.mxu0 %v2987_v1  ;;  %2809 = vmatpush3.bf16.msra.mxu1 %v2946_v2 }
  0xee   : > { %2810 = vmatprep.subr.bf16.mxu1 %v2987_v1 }
  0xf0   : > { %2829 = vmatpush3.bf16.msra.mxu0 %v2952_v52 }
  0xf1   : > { %2830 = vmatprep.subr.bf16.mxu0 %v2987_v1  ;;  %2811 = vmatpush3.bf16.msra.mxu1 %v2947_v55 }
  0xf2   : > { %2812 = vmatprep.subr.bf16.mxu1 %v2987_v1 }
  0xf4   : > { %2831 = vmatpush3.bf16.msra.mxu0 %v2954_v61 }
  0xf5   : > { %2832 = vmatprep.subr.bf16.mxu0 %v2987_v1  ;;  %2813 = vmatpush3.bf16.msra.mxu1 %v2949_v13 }
  0xf6   : > { %2814 = vmatprep.subr.bf16.mxu1 %v2987_v1 }
  0xf8   : > { %2833 = vmatpush3.bf16.msra.mxu0 %v2956_v10 }
  0xf9   : > { %2834 = vmatprep.subr.bf16.mxu0 %v2987_v1  ;;  %2815 = vmatpush3.bf16.msra.mxu1 %v2951_v24 }
  0xfa   : > { %2816 = vmatprep.subr.bf16.mxu1 %v2987_v1 }
  0xfc   : > { %2835 = vmatpush3.bf16.msra.mxu0 %v2957_v3 }
  0xfd   : > { %2836 = vmatprep.subr.bf16.mxu0 %v2987_v1  ;;  %2817 = vmatpush3.bf16.msra.mxu1 %v2953_v8 }
  0xfe   : > { %2818 = vmatprep.subr.bf16.mxu1 %v2987_v1 }
 0x100   : > { %2837 = vmatpush3.bf16.msra.mxu0 %v2959_v11  ;;  %v2168_v11 = vstv %s2160_s17 }
 0x101   : > { %2838 = vmatprep.subr.bf16.mxu0 %v2987_v1  ;;  %2819 = vmatpush3.bf16.msra.mxu1 %v2955_v16  ;;  %2976 = vrcp.f32 %v2168_v11 }
 0x102   : > { %2844 = vmatprep.subr.bf16.mxu1 %v2987_v1 }
 0x104   : > { %2839 = vmatpush3.bf16.msra.mxu0 %v2961_v4  ;;  %2821 = vmatmul.mubr.bf16.vlgmr.msra.gmra.mxu1 %v3555_v32  ;;  %v2967_v32 = vld [vmem:[%s3780_s7 + $0x1d0] sm:$0xff]  }
 0x105   : > { %2864 = vmatprep.subr.bf16.mxu0 %v2987_v1  ;;  %2845 = vmatpush3.bf16.msra.mxu1 %v2958_v17 }
 0x106   : > { %2860 = vmatprep.mubr.msk.bf16.mxu1 %vm2988_vm10, %v2987_v1  ;;  %2846 = vmatprep.subr.bf16.mxu1 %v2987_v1 }
 0x107   : > { %2841 = vmatmul.mubr.bf16.vlgmr.msra.gmra.mxu0 %v3561_v21  ;;  %v2974_v21 = vld [vmem:[%s3780_s7 + $0x208] sm:$0xff]  }
 0x108   : > { %2865 = vmatpush3.bf16.msra.mxu0 %v2964_v5  ;;  %2880 = vmatprep.mubr.msk.bf16.mxu0 %vm2988_vm10, %v2987_v1  ;;  %vm2194_vm10 = vcmask 1040384  }
 0x109   : > { %2866 = vmatprep.subr.bf16.mxu0 %v2987_v1  ;;  %2847 = vmatpush3.bf16.msra.mxu1 %v2960_v19 }
 0x10a   : > { %2848 = vmatprep.subr.bf16.mxu1 %v2987_v1 }
 0x10c   : > { %2867 = vmatpush3.bf16.msra.mxu0 %v2966_v22 }
 0x10d   : > { %2868 = vmatprep.subr.bf16.mxu0 %v2987_v1  ;;  %2849 = vmatpush3.bf16.msra.mxu1 %v2962_v23 }
 0x10e   : > { %2850 = vmatprep.subr.bf16.mxu1 %v2987_v1 }
 0x110   : > { %2869 = vmatpush3.bf16.msra.mxu0 %v2968_v25 }
 0x111   : > { %2870 = vmatprep.subr.bf16.mxu0 %v2987_v1  ;;  %2851 = vmatpush3.bf16.msra.mxu1 %v2963_v26 }
 0x112   : > { %2852 = vmatprep.subr.bf16.mxu1 %v2987_v1 }
 0x114   : > { %2871 = vmatpush3.bf16.msra.mxu0 %v2970_v28 }
 0x115   : > { %2872 = vmatprep.subr.bf16.mxu0 %v2987_v1  ;;  %2853 = vmatpush3.bf16.msra.mxu1 %v2965_v47 }
 0x116   : > { %2854 = vmatprep.subr.bf16.mxu1 %v2987_v1 }
 0x118   : > { %2873 = vmatpush3.bf16.msra.mxu0 %v2972_v48 }
 0x119   : > { %2874 = vmatprep.subr.bf16.mxu0 %v2987_v1  ;;  %2855 = vmatpush3.bf16.msra.mxu1 %v2967_v32 }
 0x11a   : > { %2856 = vmatprep.subr.bf16.mxu1 %v2987_v1 }
 0x11c   : > { %2875 = vmatpush3.bf16.msra.mxu0 %v2973_v33 }
 0x11d   : > { %2876 = vmatprep.subr.bf16.mxu0 %v2987_v1  ;;  %2857 = vmatpush3.bf16.msra.mxu1 %v2969_v20  ;;  %v2977_v20 = vpop.eup %2976 }
 0x11e   : > { %2858 = vmatprep.subr.bf16.mxu1 %v2987_v1 }
 0x120   : > { %2877 = vmatpush3.bf16.msra.mxu0 %v2974_v21 }
 0x121   : > { %2878 = vmatprep.subr.bf16.mxu0 %v2987_v1  ;;  %2859 = vmatpush3.bf16.msra.mxu1 %v2971_v35  ;;  %v2901_v35 = vpop.permute.xlu1 %2900 }
 0x124   : > { %2879 = vmatpush3.bf16.msra.mxu0 %v2975_v14  ;;  %2861 = vmatmul.mubr.bf16.vlgmr.msra.gmra.mxu1 %v2541_v44 }
 0x127   : > { %2881 = vmatmul.mubr.bf16.vlgmr.msra.gmra.mxu0 %v3571_v41 }
 0x15d   : > { %v794_v38 = vpop.f32.mrf.mxu0 }
 0x15f   : > { %v2722_v6 = vpop.f32.mrf.mxu0 }
 0x160   : > { %v2902_v6 = vunpack.i.l.bf16 %v2901_v35 }
 0x161   : > { %v797_v40 = vpop.f32.mrf.mxu0 }
 0x163   : > { %v2723_v42 = vpop.f32.mrf.mxu0 }
 0x184   : > { %v910_v45 = vpop.f32.mrf.mxu1 }
 0x185   : > { %v911_v27 = vadd.f32 %v910_v45, %v794_v38  ;;  %v2903_v38 = vunpack.i.h.bf16 %v2901_v35 }
 0x186   : > { %v2742_v18 = vpop.f32.mrf.mxu1 }
 0x187   : > { %v1099_v46 = vpop.f32.mrf.mxu0 }
 0x188   : > { %v1106_v9 = vadd.f32 %v1099_v46, %v911_v27  ;;  %v913_v39 = vpop.f32.mrf.mxu1 }
 0x189   : > { %v2762_v7 = vpop.f32.mrf.mxu0  ;;  %v914_v1 = vadd.f32 %v913_v39, %v797_v40 }
 0x18a   : > { %v2743_v50 = vpop.f32.mrf.mxu1 }
 0x18b   : > { %v1102_v15 = vpop.f32.mrf.mxu0 }
 0x18c   : > { %v1107_v29 = vadd.f32 %v1102_v15, %v914_v1 }
 0x18d   : > { %v2763_v36 = vpop.f32.mrf.mxu0 }
 0x1a4   : > { %v1292_v30 = vpop.f32.mrf.mxu1 }
 0x1a5   : > { %v1299_v62 = vadd.f32 %v1292_v30, %v1106_v9 }
 0x1a6   : > { %v2782_v34 = vpop.f32.mrf.mxu1 }
 0x1a7   : > { %v1436_v44 = vpop.f32.mrf.mxu0 }
 0x1a8   : > { %v1295_v41 = vpop.f32.mrf.mxu1  ;;  %v1443_v63 = vadd.f32 %v1436_v44, %v1299_v62 }
 0x1a9   : > { %v2802_v31 = vpop.f32.mrf.mxu0  ;;  %v1300_v12 = vadd.f32 %v1295_v41, %v1107_v29 }
 0x1aa   : > { %v2783_v53 = vpop.f32.mrf.mxu1 }
 0x1ab   : > { %v1439_v54 = vpop.f32.mrf.mxu0 }
 0x1ac   : > { %v1444_v0 = vadd.f32 %v1439_v54, %v1300_v12 }
 0x1ad   : > { %v2803_v56 = vpop.f32.mrf.mxu0 }
 0x1c4   : > { %v1617_v57 = vpop.f32.mrf.mxu1 }
 0x1c5   : > { %v1624_v52 = vadd.f32 %v1617_v57, %v1443_v63 }
 0x1c6   : > { %v2822_v37 = vpop.f32.mrf.mxu1 }
 0x1c7   : > { %v1812_v58 = vpop.f32.mrf.mxu0 }
 0x1c8   : > { %v1620_v43 = vpop.f32.mrf.mxu1  ;;  %v1819_v10 = vadd.f32 %v1812_v58, %v1624_v52 }
 0x1c9   : > { %v2842_v60 = vpop.f32.mrf.mxu0  ;;  %v1625_v55 = vadd.f32 %v1620_v43, %v1444_v0 }
 0x1ca   : > { %v2823_v49 = vpop.f32.mrf.mxu1 }
 0x1cb   : > { %v1815_v59 = vpop.f32.mrf.mxu0 }
 0x1cc   : > { %v1820_v24 = vadd.f32 %v1815_v59, %v1625_v55 }
 0x1cd   : > { %v2843_v51 = vpop.f32.mrf.mxu0 }
 0x1e4   : > { %v1956_v2 = vpop.f32.mrf.mxu1 }
 0x1e5   : > { %v1963_v16 = vadd.f32 %v1956_v2, %v1819_v10 }
 0x1e6   : > { %v2862_v61 = vpop.f32.mrf.mxu1 }
 0x1e7   : > { %v2137_v13 = vpop.f32.mrf.mxu0 }
 0x1e8   : > { %v1959_v3 = vpop.f32.mrf.mxu1  ;;  %v2144_v19 = vadd.f32 %v2137_v13, %v1963_v16 }
 0x1e9   : > { %v2882_v8 = vpop.f32.mrf.mxu0  ;;  %v1964_v4 = vadd.f32 %v1959_v3, %v1820_v24 }
 0x1ea   : > { %v2863_v17 = vpop.f32.mrf.mxu1 }
 0x1eb   : > { %v2140_v5 = vpop.f32.mrf.mxu0 }
 0x1ec   : > { %v2145_v22 = vadd.f32 %v2140_v5, %v1964_v4 }
 0x1ed   : > { %v2883_v23 = vpop.f32.mrf.mxu0 }
 0x1ee   : > { %v2619_v25 = vpack.c.bf16 %v2145_v22, %v2144_v19  ;;  %v2161_v26 = vadd.f32 %v2145_v22, %v2144_v19 }
 0x1f0   : > { %2620 = vst [vmem:[%s471_s12] sm:$0xff] %v2619_v25   ;;  %v2162_v28 = vrot.slane %v2161_v26, 4 }
 0x1f2   : > { %v2163_v47 = vadd.f32 %v2162_v28, %v2161_v26 }
 0x1f4   : > { %v2164_v48 = vrot.slane %v2163_v47, 2 }
 0x1f6   : > { %v2165_v32 = vadd.f32 %v2164_v48, %v2163_v47 }
 0x1f8   : > { %v2166_v33 = vrot.slane %v2165_v32, 1 }
 0x1fa   : > { %v2167_v21 = vadd.f32 %v2166_v33, %v2165_v32 }
 0x1fc   : > { %v2170_v14 = vmul.f32 %v2977_v20, %v2167_v21 }
 0x1fe   : > { %v2171_v40 = vsub.f32 %v2144_v19, %v2170_v14  ;;  %v2172_v42 = vsub.f32 %v2145_v22, %v2170_v14 }
 0x200   : > { %v2183_v45 = vmul.f32 %v2902_v6, %v2171_v40  ;;  %v2184_v27 = vmul.f32 %v2903_v38, %v2172_v42 }
 0x202   : > { %v2185_v18 = vmul.f32 %v2183_v45, %v2183_v45  ;;  %v2186_v46 = vmul.f32 %v2184_v27, %v2184_v27 }
 0x204   : > { %v2187_v9 = vadd.f32 %v2186_v46, %v2185_v18 }
 0x206   : > { %v2188_v39 = vrot.slane %v2187_v9, 4 }
 0x208   : > { %v2189_v7 = vadd.f32 %v2188_v39, %v2187_v9 }
 0x20a   : > { %v2190_v1 = vrot.slane %v2189_v7, 2 }
 0x20c   : > { %v2191_v50 = vadd.f32 %v2190_v1, %v2189_v7 }
 0x20e   : > { %v2192_v15 = vrot.slane %v2191_v50, 1 }
 0x210   : > { %v2193_v29 = vadd.f32 %v2192_v15, %v2191_v50 }
 0x212   : > { %v2195_v36 = vsel %vm2194_vm10, %v2167_v21, %v2193_v29 }
 0x213   : > { %2196 = vst [vmem:[%s476_s20] sm:$0x3] %v2195_v36 }
 0x214 PF: > { %s20_s30 = sadd.s32 1, %s2984_s30  }
 0x215   : > { %p17_p10 = scmp.ge.s32.totalorder %s20_s30, 10  }
 0x217   :  { %19 = sbr.rel (!%p17_p10) target bundleno = 1 (0x1), region = 114 }

// kernel: block_d_forward.3
= control target key start
LH: loop header
LB: loop body
LE: loop exit
PB: predicated region body
PF: predicated region fallthrough
CT: control target
= control target key end

     0   :  { %s3250_s13 = smov 0   ;;  %s3986_s0 = inlined_call_operand.vmem [shape: bf16[128,128], index: 0, kind: input, shape index: {}, may-alias: {0,1,2}]   ;;  %s3987_s1 = inlined_call_operand.vmem [shape: bf16[128,128], index: 1, kind: input, shape index: {}, may-alias: {0,1,2}]   ;;  %s3988_s2 = inlined_call_operand.vmem [shape: bf16[128,128], index: 2, kind: input, shape index: {}, may-alias: {0,1,2}]   ;;  %s3989_s3 = inlined_call_operand.vmem [shape: s32[128,1], index: 3, kind: input, shape index: {}]   ;;  %s3990_s4 = inlined_call_operand.vmem [shape: s32[128,1], index: 4, kind: input, shape index: {}]   ;;  %s3991_s5 = inlined_call_operand.vmem [shape: bf16[9,128,128], index: 5, kind: input, shape index: {}]   ;;  %s3992_s6 = inlined_call_operand.vmem [shape: bf16[128,128], index: 6, kind: input, shape index: {}]   ;;  %s3993_s7 = inlined_call_operand.vmem [shape: bf16[128,128], index: 7, kind: output, shape index: {0}]   ;;  %s3994_s8 = inlined_call_operand.vmem [shape: bf16[128,128], index: 8, kind: output, shape index: {1}]   ;;  %s3995_s9 = inlined_call_operand.vmem [shape: f32[8,2,128], index: 9, kind: output, shape index: {2}]   ;;  %s3996_s10 = inlined_call_operand.vmem [shape: f32[8,2,128], index: 10, kind: output, shape index: {3}]  }
   0x1 LB: > { %s3256_s14 = sadd.s32 4294967295, %s3188_s13   ;;  %p2527_p0 = scmp.ge.s32.totalorder %s3188_s13, 1  ;;  %s3188_s13 = sphi %s3250_s13, %s21_s13  }
   0x2   : > { %p388_p1 = scmp.lt.s32.totalorder %s3188_s13, 9 }
   0x4   : > { %p389_p2 = pnand %p2527_p0, %p388_p1 }
   0x5   : > { %s2528_s15 = sshll.u32 (!%p389_p2), %s3256_s14, 1  ;;  %s2530_s20 = sadd.s32 (!%p389_p2), 4294967295, %s3256_s14 }
   0x6   : > { %392 = sbr.rel (%p389_p2) target bundleno = 540 (0x21c), region = 48  ;;  %p466_p3 = scmp.lt.s32.totalorder (!%p389_p2), %s2528_s15, 15 }
   0x7   : > { %p3312_p4 = scmp.gt.s32.totalorder (!%p389_p2), %s2530_s20, 0  ;;  %s2762_s11 = sshll.u32 (!%p389_p2), %s3256_s14, 4 }
   0x8   : > { %p519_p9 = scmp.lt.s32.totalorder (!%p389_p2), %s3256_s14, 7 }
   0xb   : > { %v3100_v0 = vld [vmem:[%s3991_s5 + $0x78] sm:$0xff]   ;;  %v3190_v1 = vmov 0   ;;  %v3191_v2 = vmov 0.0   ;;  %s4036_s15 = smov (!%p466_p3, %s2528_s15), 15  ;;  %v3101_v3 = vld [vmem:[%s3991_s5 + $0x70] sm:$0xff]   ;;  %v3102_v4 = vld [vmem:[%s3991_s5 + $0x68] sm:$0xff]  }
   0xc   : > { %3093 = vset.pattern.permute.xlu0 %v3190_v1  ;;  %3094 = vset.pattern.permute.xlu1 %v3190_v1  ;;  %s2536_s21 = sshll.u32 %s4036_s15, 3  ;;  %s3271_s22 = sshll.u32 %s4036_s15, 2  ;;  %v3104_v5 = vld [vmem:[%s3991_s5 + $0x38] sm:$0xff]   ;;  %v3106_v15 = vld [vmem:[%s3991_s5 + $0x30] sm:$0xff]   ;;  %v3103_v17 = vld [vmem:[%s3991_s5 + $0x60] sm:$0xff]  }
   0xd   : > { %2880 = vmatprep.subr.bf16.mxu0 %v3191_v2  ;;  %2900 = vmatprep.subr.bf16.mxu1 %v3191_v2  ;;  %s499_s29 = scalar_lea.vmem %s3989_s3, %s2536_s21  ;;  %s505_s12 = scalar_lea.vmem %s3990_s4, %s2536_s21  ;;  %v3105_v19 = vld [vmem:[%s3991_s5 + $0x58] sm:$0xff]   ;;  %v3108_v20 = vld [vmem:[%s3991_s5 + $0x28] sm:$0xff]   ;;  %v3107_v25 = vld [vmem:[%s3991_s5 + $0x50] sm:$0xff]  }
   0xe   : > { %2881 = vmatpush3.bf16.msra.mxu0 %v3100_v0  ;;  %v3285_v6 = vld [vmem:[%s499_s29] sm:$0xff]  ;;  %v3287_v7 = vld [vmem:[%s499_s29 + $0x8] sm:$0xff]  ;;  %s469_s17 = scalar_lea.vmem %s3986_s0, %s3271_s22  ;;  %2901 = vmatpush3.bf16.msra.mxu1 %v3104_v5  ;;  %s4038_s20 = smov (!%p3312_p4, %s2530_s20), 0  ;;  %v3112_v42 = vld [vmem:[%s3991_s5 + $0x18] sm:$0xff]  }
   0xf   : > { %2882 = vmatprep.subr.bf16.mxu0 %v3191_v2  ;;  %v3289_v8 = vld [vmem:[%s505_s12] sm:$0xff]  ;;  %v3295_v9 = vld [vmem:[%s505_s12 + $0x8] sm:$0xff]  ;;  %v544_v10 = vadd.s32 4294967295, %v3285_v6  ;;  %v545_v11 = vadd.s32 4294967295, %v3287_v7  ;;  %2902 = vmatprep.subr.bf16.mxu1 %v3191_v2  ;;  %s2531_s29 = sshll.u32 %s4038_s20, 1  ;;  %v1602_v33 = vadd.s32 1, %v3285_v6  ;;  %s517_s21 = scalar_lea.vmem %s3994_s8, %s3271_s22 }
  0x10   : > { %v3300_v12 = vadd.s32 4294967295, %v3289_v8  ;;  %v532_v13 = vld [vmem:[%s469_s17] sm:$0xff]   ;;  %v3305_v14 = vadd.s32 4294967295, %v3295_v9  ;;  %vm3997_vm12 = vcmp.ge.s32.totalorder %v3289_v8, 0  ;;  %vm4000_vm14 = vcmp.ge.s32.totalorder %v3295_v9, 0  ;;  %p475_p5 = scmp.lt.s32.totalorder %s2531_s29, 15 }
  0x11   : > { %534 = vst [vmem:[#allocation2 + $0x8] sm:$0xff] %v532_v13   ;;  %vm546_vm0 = vcmp.ge.s32.totalorder %v544_v10, 0  ;;  %vm547_vm1 = vcmp.ge.s32.totalorder %v545_v11, 0  ;;  %vm548_vm2 = vcmp.lt.s32.totalorder %v544_v10, 8  ;;  %vm549_vm3 = vcmp.lt.s32.totalorder %v545_v11, 8  ;;  %s483_s17 = sadd.s32 1, %s3256_s14 }
  0x12   : > { %2883 = vmatpush3.bf16.msra.mxu0 %v3101_v3  ;;  %vm3316_vm4 = vmand %vm546_vm0, %vm548_vm2  ;;  %vm554_vm5 = vcmp.ge.s32.totalorder %v3300_v12, 0  ;;  %vm4003_vm6 = vcmp.ge.s32.totalorder %v3305_v14, 0  ;;  %2903 = vmatpush3.bf16.msra.mxu1 %v3106_v15  ;;  %vm3999_vm8 = vcmp.lt.s32.totalorder %v3300_v12, 8  ;;  %vm3998_vm10 = vcmp.lt.s32.totalorder %v3305_v14, 8  ;;  %s4040_s29 = smov (!%p475_p5, %s2531_s29), 15  ;;  %v3109_v34 = vld [vmem:[%s3991_s5 + $0x48] sm:$0xff]  }
  0x13   : > { %2884 = vmatprep.subr.bf16.mxu0 %v3191_v2  ;;  %vm3325_vm7 = vmand %vm547_vm1, %vm549_vm3  ;;  %2904 = vmatprep.subr.bf16.mxu1 %v3191_v2  ;;  %vm4001_vm15 = vcmp.lt.s32.totalorder %v3289_v8, 8  ;;  %vm4002_vm0 = vcmp.lt.s32.totalorder %v3295_v9, 8  ;;  %v3358_v21 = vadd.s32 1, %v3289_v8  ;;  %v3364_v23 = vadd.s32 1, %v3295_v9  ;;  %s2532_s20 = sshll.u32 %s4040_s29, 2  ;;  %v3110_v35 = vld [vmem:[%s3991_s5 + $0x20] sm:$0xff]  }
  0x14   : > { %vm556_vm9 = vmand %vm3316_vm4, %vm554_vm5  ;;  %vm1084_vm2 = vcmp.ge.s32.totalorder %v3285_v6, 0  ;;  %vm1085_vm3 = vcmp.ge.s32.totalorder %v3287_v7, 0  ;;  %s478_s16 = scalar_lea.vmem %s3987_s1, %s2532_s20  ;;  %v1603_v36 = vadd.s32 1, %v3287_v7  ;;  %p484_p6 = scmp.lt.s32.totalorder %s483_s17, 7  ;;  %v3111_v41 = vld [vmem:[%s3991_s5 + $0x40] sm:$0xff]   ;;  %v3113_v49 = vld [vmem:[%s3991_s5 + $0x10] sm:$0xff]  }
  0x15   : > { %vm557_vm11 = vmand %vm3325_vm7, %vm4003_vm6  ;;  %v528_v32 = vld [vmem:[%s478_s16] sm:$0xff]   ;;  %v3115_v53 = vld [vmem:[%s3991_s5 + $0x8] sm:$0xff]   ;;  %s4048_s14 = smov (!%p519_p9, %s3256_s14), 7 }
  0x16   : > { %2885 = vmatpush3.bf16.msra.mxu0 %v3102_v4  ;;  %vm560_vm13 = vmand %vm556_vm9, %vm3999_vm8  ;;  %2905 = vmatpush3.bf16.msra.mxu1 %v3108_v20  ;;  %530 = vst [vmem:[#allocation2] sm:$0xff] %v528_v32   ;;  %s4042_s17 = smov (!%p484_p6, %s483_s17), 7  ;;  %vm1607_vm6 = vcmp.lt.s32.totalorder %v1603_v36, 8  ;;  %v3117_v58 = vld [vmem:[%s3991_s5] sm:$0xff]   ;;  %v3193_v4 = vmov 839922192  }
  0x17   : > { %2886 = vmatprep.subr.bf16.mxu0 %v3191_v2  ;;  %vm561_vm1 = vmand %vm557_vm11, %vm3998_vm10  ;;  %v562_v22 = vsel %vm560_vm13, 1.0, %v3191_v2  ;;  %2906 = vmatprep.subr.bf16.mxu1 %v3191_v2  ;;  %vm1086_vm13 = vcmp.lt.s32.totalorder %v3285_v6, 8  ;;  %vm895_vm10 = vcmp.ge.s32.totalorder %v3358_v21, 0  ;;  %s2533_s24 = sshll.u32 %s4042_s17, 1  ;;  %v574_v5 = vunpack.c.l.s4 %v3193_v4  ;;  %v3126_v32 = vld [vmem:[%s3991_s5 + $0xe0] sm:$0xff]   ;;  %s511_s17 = scalar_lea.vmem %s3993_s7, %s3271_s22 }
  0x18   : > { %v563_v24 = vsel %vm561_vm1, 1.0, %v3191_v2  ;;  %vm633_vm9 = vmand %vm3316_vm4, %vm3997_vm12  ;;  %vm1087_vm1 = vcmp.lt.s32.totalorder %v3287_v7, 8  ;;  %p487_p7 = scmp.lt.s32.totalorder %s2533_s24, 15  ;;  %v576_v6 = vlaneseq  ;;  %v3194_v7 = vmov 1985246804   ;;  %s2543_s22 = sshll.u32 %s4048_s14, 1 }
  0x19   : > { %v567_v26 = vpack.c.bf16 %v563_v24, %v562_v22  ;;  %vm634_vm11 = vmand %vm3325_vm7, %vm4000_vm14  ;;  %vm896_vm14 = vcmp.ge.s32.totalorder %v3364_v23, 0  ;;  %v581_v10 = vunpack.c.l.s4 %v3194_v7  ;;  %v575_v11 = vunpack.c.0.s8 %v574_v5  ;;  %v566_v22 = vld [vmem:[#allocation2 + $0x8] sm:$0xf]  ;;  %s522_s25 = scalar_lea.vmem %s3995_s9, %s2543_s22  ;;  %s526_s28 = scalar_lea.vmem %s3996_s10, %s2543_s22 }
  0x1a   : > { %2887 = vmatpush3.bf16.msra.mxu0 %v3103_v17  ;;  %vm637_vm12 = vmand %vm633_vm9, %vm4001_vm15  ;;  %vm899_vm15 = vcmp.lt.s32.totalorder %v3358_v21, 8  ;;  %2907 = vmatpush3.bf16.msra.mxu1 %v3110_v35  ;;  %s4044_s24 = smov (!%p487_p7, %s2533_s24), 15 }
  0x1b   : > { %2888 = vmatprep.subr.bf16.mxu0 %v3191_v2  ;;  %570 = vperm.xlu0 %3093, %v567_v26   ;;  %vm638_vm8 = vmand %vm634_vm11, %vm4002_vm0  ;;  %v639_v27 = vsel %vm637_vm12, 1.0, %v3191_v2  ;;  %vm1605_vm0 = vcmp.ge.s32.totalorder %v1603_v36, 0  ;;  %s2534_s29 = sshll.u32 %s4044_s24, 2 }
  0x1c   : > { %v640_v28 = vsel %vm638_vm8, 1.0, %v3191_v2  ;;  %vm3395_vm9 = vmand %vm1084_vm2, %vm1086_vm13  ;;  %vm900_vm8 = vcmp.lt.s32.totalorder %v3364_v23, 8  ;;  %2908 = vmatprep.subr.bf16.mxu1 %v3191_v2  ;;  %s490_s20 = scalar_lea.vmem %s3988_s2, %s2534_s29 }
  0x1d   : > { %v641_v30 = vpack.c.bf16 %v640_v28, %v639_v27  ;;  %vm3404_vm12 = vmand %vm1085_vm3, %vm1087_vm1  ;;  %v536_v48 = vld [vmem:[%s490_s20] sm:$0xff]   ;;  %s2133_s20 = ssub.s32 128, %s2762_s11 }
  0x1e   : > { %2889 = vmatpush3.bf16.msra.mxu0 %v3105_v19  ;;  %vm1421_vm2 = vmand %vm3395_vm9, %vm895_vm10  ;;  %2909 = vmatpush3.bf16.msra.mxu1 %v3112_v42  ;;  %538 = vst [vmem:[#allocation2 + $0x10] sm:$0xff] %v536_v48   ;;  %v565_v27 = vld [vmem:[#allocation2 + $0x4] sm:$0xf]  ;;  %v564_v35 = vld [vmem:[#allocation2] sm:$0x8]  ;;  %p2134_p8 = scmp.lt.s32.totalorder %s2133_s20, 16 }
  0x1f   : > { %2890 = vmatprep.subr.bf16.mxu0 %v3191_v2  ;;  %644 = vperm.xlu0 %3093, %v641_v30   ;;  %vm1422_vm3 = vmand %vm3404_vm12, %vm896_vm14 }
  0x20   : > { %vm1423_vm11 = vmand %vm1421_vm2, %vm899_vm15  ;;  %2910 = vmatprep.subr.bf16.mxu1 %v3191_v2  ;;  %s4046_s20 = smov (!%p2134_p8, %s2133_s20), 16 }
  0x21   : > { %vm1424_vm13 = vmand %vm1422_vm3, %vm900_vm8  ;;  %v1425_v37 = vsel %vm1423_vm11, 1.0, %v3191_v2  ;;  %vm1604_vm3 = vcmp.ge.s32.totalorder %v1602_v33, 0  ;;  %vm1606_vm11 = vcmp.lt.s32.totalorder %v1602_v33, 8  ;;  %s2136_s12 = scvt.s32.f32 %s4046_s20 }
  0x22   : > { %2891 = vmatpush3.bf16.msra.mxu0 %v3107_v25  ;;  %v1426_v38 = vsel %vm1424_vm13, 1.0, %v3191_v2  ;;  %vm897_vm1 = vmand %vm3316_vm4, %vm895_vm10  ;;  %2911 = vmatpush3.bf16.msra.mxu1 %v3113_v49 }
  0x23   : > { %2892 = vmatprep.subr.bf16.mxu0 %v3191_v2  ;;  %v1430_v39 = vpack.c.bf16 %v1426_v38, %v1425_v37  ;;  %vm898_vm2 = vmand %vm3325_vm7, %vm896_vm14  ;;  %2912 = vmatprep.subr.bf16.mxu1 %v3191_v2  ;;  %v3114_v38 = vld [vmem:[%s3991_s5 + $0xb8] sm:$0xff]  }
  0x24   : > { %vm901_vm13 = vmand %vm897_vm1, %vm899_vm15 }
  0x25   : > { %1433 = vperm.xlu0 %3093, %v1430_v39   ;;  %vm902_vm4 = vmand %vm898_vm2, %vm900_vm8  ;;  %v903_v40 = vsel %vm901_vm13, 1.0, %v3191_v2  ;;  %vm4019_vm13 = vcmp.lt.s32.totalorder %v3305_v14, 8 }
  0x26   : > { %2893 = vmatpush3.bf16.msra.mxu0 %v3109_v34  ;;  %v904_v43 = vsel %vm902_vm4, 1.0, %v3191_v2  ;;  %vm3458_vm7 = vmand %vm1604_vm3, %vm1606_vm11  ;;  %vm4017_vm3 = vcmp.ge.s32.totalorder %v3305_v14, 0  ;;  %2913 = vmatpush3.bf16.msra.mxu1 %v3115_v53 }
  0x27   : > { %2894 = vmatprep.subr.bf16.mxu0 %v3191_v2  ;;  %v908_v45 = vpack.c.bf16 %v904_v43, %v903_v40  ;;  %vm3462_vm1 = vmand %vm1605_vm0, %vm1607_vm6  ;;  %vm4018_vm0 = vcmp.lt.s32.totalorder %v3300_v12, 8  ;;  %2914 = vmatprep.subr.bf16.mxu1 %v3191_v2 }
  0x28   : > { %vm1610_vm2 = vmand %vm3458_vm7, %vm554_vm5 }
  0x29   : > { %911 = vperm.xlu1 %3094, %v908_v45   ;;  %vm1611_vm6 = vmand %vm3462_vm1, %vm4017_vm3  ;;  %vm3192_vm3 = vmmov 0  }
  0x2a   : > { %2895 = vmatpush3.bf16.msra.mxu0 %v3111_v41  ;;  %vm1612_vm11 = vmand %vm1610_vm2, %vm4018_vm0  ;;  %2896 = vmatprep.mubr.msk.bf16.mxu0 %vm3192_vm3, %v3191_v2 }
  0x2b   : > { %2920 = vmatprep.subr.bf16.mxu0 %v3191_v2  ;;  %vm1613_vm4 = vmand %vm1611_vm6, %vm4019_vm13  ;;  %v1614_v47 = vsel %vm1612_vm11, 1.0, %v3191_v2  ;;  %2916 = vmatprep.mubr.msk.bf16.mxu1 %vm3192_vm3, %v3191_v2  ;;  %vm4020_vm6 = vcmp.ge.s32.totalorder %v3305_v14, 0  ;;  %vm4021_vm11 = vcmp.lt.s32.totalorder %v3300_v12, 8  ;;  %v582_v12 = vunpack.c.0.s8 %v581_v10 }
  0x2c   : > { %v1615_v50 = vsel %vm1613_vm4, 1.0, %v3191_v2  ;;  %vm1090_vm2 = vmand %vm3395_vm9, %vm554_vm5  ;;  %vm4022_vm5 = vcmp.lt.s32.totalorder %v3305_v14, 8  ;;  %2915 = vmatpush3.bf16.msra.mxu1 %v3117_v58 }
  0x2d   : > { %v1618_v51 = vpack.c.bf16 %v1615_v50, %v1614_v47  ;;  %vm1091_vm0 = vmand %vm3404_vm12, %vm4020_vm6  ;;  %2940 = vmatprep.subr.bf16.mxu1 %v3191_v2  ;;  %v3116_v50 = vld [vmem:[%s3991_s5 + $0xb0] sm:$0xff]  }
  0x2e   : > { %vm1092_vm13 = vmand %vm1090_vm2, %vm4021_vm11 }
  0x2f   : > { %1621 = vperm.xlu0 %3093, %v1618_v51   ;;  %vm1093_vm4 = vmand %vm1091_vm0, %vm4022_vm5  ;;  %v1094_v52 = vsel %vm1092_vm13, 1.0, %v3191_v2 }
  0x30   : > { %v1095_v54 = vsel %vm1093_vm4, 1.0, %v3191_v2  ;;  %vm1941_vm6 = vmand %vm3458_vm7, %vm895_vm10  ;;  %vm4023_vm10 = vcmp.ge.s32.totalorder %v3289_v8, 0  ;;  %vm4026_vm4 = vcmp.lt.s32.totalorder %v3295_v9, 8 }
  0x31   : > { %v1098_v55 = vpack.c.bf16 %v1095_v54, %v1094_v52  ;;  %vm1942_vm2 = vmand %vm3462_vm1, %vm896_vm14  ;;  %vm4024_vm14 = vcmp.ge.s32.totalorder %v3295_v9, 0 }
  0x32   : > { %vm1943_vm0 = vmand %vm1941_vm6, %vm899_vm15 }
  0x33   : > { %1101 = vperm.xlu1 %3094, %v1098_v55   ;;  %vm1944_vm11 = vmand %vm1942_vm2, %vm900_vm8  ;;  %v1945_v56 = vsel %vm1943_vm0, 1.0, %v3191_v2  ;;  %vm4025_vm8 = vcmp.lt.s32.totalorder %v3289_v8, 8  ;;  %v577_v8 = vshrl.u32 %v576_v6, 7 }
  0x34   : > { %v1946_v57 = vsel %vm1944_vm11, 1.0, %v3191_v2  ;;  %vm1277_vm13 = vmand %vm3395_vm9, %vm4023_vm10 }
  0x35   : > { %v1950_v59 = vpack.c.bf16 %v1946_v57, %v1945_v56  ;;  %vm1278_vm15 = vmand %vm3404_vm12, %vm4024_vm14  ;;  %v3557_v13 = vsub.s32 %v575_v11, %v577_v8  ;;  %v3559_v9 = vsub.s32 %v582_v12, %v577_v8 }
  0x36   : > { %vm1279_vm5 = vmand %vm1277_vm13, %vm4025_vm8 }
  0x37   : > { %1953 = vperm.xlu0 %3093, %v1950_v59   ;;  %vm1280_vm6 = vmand %vm1278_vm15, %vm4026_vm4  ;;  %v1281_v60 = vsel %vm1279_vm5, 1.0, %v3191_v2  ;;  %vm929_vm5 = vsmask.f32 4368 }
  0x38   : > { %v1282_v61 = vsel %vm1280_vm6, 1.0, %v3191_v2  ;;  %vm4027_vm9 = vmmov %vm4023_vm10 }
  0x39   : > { %vm1797_vm2 = vmand %vm3458_vm7, %vm4027_vm9  ;;  %v1283_v62 = vpack.c.bf16 %v1282_v61, %v1281_v60  ;;  %v3095_v3 = vpack.i.bf16 %v1282_v61, %v1281_v60  ;;  %vm587_vm7 = vsmask.f32 3328  ;;  %vm979_vm9 = vsmask.f32 7424 }
  0x3a   : > { %vm4028_vm12 = vmmov %vm4024_vm14 }
  0x3b   : > { %vm1798_vm0 = vmand %vm3462_vm1, %vm4028_vm12  ;;  %1286 = vperm.xlu1 %3094, %v1283_v62   ;;  %vm588_vm1 = vsmask.f32 7440  ;;  %v3118_v62 = vld [vmem:[%s3991_s5 + $0xa8] sm:$0xff]  }
  0x3c   : > { %vm4029_vm11 = vmmov %vm4025_vm8  ;;  %vm928_vm8 = vsmask.f32 256 }
  0x3d   : > { %vm1799_vm10 = vmand %vm1797_vm2, %vm4029_vm11 }
  0x3e   : > { %vm4030_vm13 = vmmov %vm4026_vm4  ;;  %v1801_v63 = vsel %vm1799_vm10, 1.0, %v3191_v2  ;;  %vm785_vm4 = vsmask.f32 4352 }
  0x3f   : > { %vm1800_vm14 = vmand %vm1798_vm0, %vm4030_vm13 }
  0x40   : > { %v1802_v0 = vsel %vm1800_vm14, 1.0, %v3191_v2  ;;  %vm3565_vm15 = vmor %vm587_vm7, %vm588_vm1 }
  0x41   : > { %v1803_v1 = vpack.c.bf16 %v1802_v0, %v1801_v63  ;;  %vm3628_vm6 = vmor %vm928_vm8, %vm929_vm5 }
  0x43   : > { %1806 = vperm.xlu1 %3094, %v1803_v1  }
  0x47   : > { %3096 = vperm.xlu1 %3094, %v3095_v3  }
  0x96   : > { %v571_v14 = vpop.permute.xlu0 %570 }
  0x97   : > { %v579_v15 = vrot.slane %v571_v14, %v3557_v13  ;;  %v586_v16 = vrot.slane %v571_v14, %v3559_v9 }
  0x99   : > { %v591_v17 = vshll.u32 %v579_v15, 16  ;;  %v594_v18 = vshrl.u32 %v579_v15, 16  ;;  %v600_v19 = vshll.u32 %v586_v16, 16  ;;  %v604_v20 = vshrl.u32 %v586_v16, 16  ;;  %v3593_v15 = vld [vmem:[#allocation2 + $0x8] sm:$0xf] }
  0x9a   : > { %v645_v21 = vpop.permute.xlu0 %644 }
  0x9b   : > { %v593_v23 = vrot.slane %v591_v17, 5  ;;  %v596_v24 = vrot.slane %v594_v18, 4  ;;  %v602_v25 = vrot.slane %v600_v19, 5  ;;  %v606_v26 = vrot.slane %v604_v20, 4  ;;  %v3119_v20 = vld [vmem:[%s3991_s5 + $0xa0] sm:$0xff]  }
  0x9c   : > { %v653_v28 = vrot.slane %v645_v21, %v3557_v13  ;;  %v660_v29 = vrot.slane %v645_v21, %v3559_v9  ;;  %v3601_v21 = vld [vmem:[#allocation2 + $0x4] sm:$0xf] }
  0x9d   : > { %v597_v30 = vor.u32 %v596_v24, %v593_v23  ;;  %v607_v31 = vor.u32 %v606_v26, %v602_v25  ;;  %v612_v45 = vmul.bf16 %v593_v23, %v564_v35  ;;  %v1429_v26 = vld [vmem:[#allocation2 + $0x10] sm:$0x1] }
  0x9e   : > { %v663_v33 = vmul.bf16 %v653_v28, %v565_v27  ;;  %v664_v34 = vmul.bf16 %v660_v29, %v566_v22 }
  0x9f   : > { %v598_v36 = vrot.slane %v597_v30, 4  ;;  %v608_v37 = vrot.slane %v607_v31, 4 }
  0xa0   : > { %v1434_v39 = vpop.permute.xlu0 %1433  ;;  %v2561_v40 = vcombine.low %v663_v33, %v664_v34 }
  0xa1   : > { %v603_v41 = vsel %vm3565_vm15, %v598_v36, %v602_v25  ;;  %v614_v42 = vmul.bf16 %v608_v37, %v566_v22  ;;  %v1442_v43 = vrot.slane %v1434_v39, %v3557_v13  ;;  %v1449_v44 = vrot.slane %v1434_v39, %v3559_v9 }
  0xa2   : > { %v613_v46 = vmul.bf16 %v603_v41, %v565_v27  ;;  %2897 = vmatmul.mubr.bf16.vlgmr.msra.gmra.mxu0 %v2561_v40  ;;  %v3120_v41 = vld [vmem:[%s3991_s5 + $0xf8] sm:$0xff]  }
  0xa3   : > { %v2571_v47 = vcombine.low %v614_v42, %v614_v42  ;;  %v1451_v48 = vshrl.u32 %v1442_v43, 16  ;;  %v1459_v49 = vshrl.u32 %v1449_v44, 16  ;;  %2921 = vmatpush3.bf16.msra.mxu0 %v3114_v38  ;;  %2936 = vmatprep.mubr.msk.bf16.mxu0 %vm3192_vm3, %v3191_v2  ;;  %v1454_v60 = vshll.u32 %v1442_v43, 16  ;;  %v3121_v42 = vld [vmem:[%s3991_s5 + $0x98] sm:$0xff]  }
  0xa4   : > { %v2570_v51 = vcombine.low %v612_v45, %v613_v46  ;;  %2922 = vmatprep.subr.bf16.mxu0 %v3191_v2  ;;  %v912_v55 = vpop.permute.xlu1 %911  ;;  %v1462_v5 = vshll.u32 %v1449_v44, 16  ;;  %v907_v44 = vld [vmem:[#allocation2 + $0xc] sm:$0x1] }
  0xa5   : > { %v795_v52 = vshrl.u32 %v2571_v47, 16  ;;  %v798_v53 = vshll.u32 %v2571_v47, 16  ;;  %v3582_v54 = vrot.slane %v1451_v48, 7  ;;  %v920_v56 = vrot.slane %v912_v55, %v3557_v13 }
  0xa6   : > { %v927_v57 = vrot.slane %v912_v55, %v3559_v9  ;;  %v787_v58 = vshrl.u32 %v2570_v51, 16  ;;  %v790_v59 = vshll.u32 %v2570_v51, 16  ;;  %v1461_v61 = vrot.slane %v1459_v49, 7 }
  0xa7   : > { %2923 = vmatpush3.bf16.msra.mxu0 %v3116_v50  ;;  %v932_v63 = vshrl.u32 %v920_v56, 16  ;;  %v935_v0 = vshll.u32 %v920_v56, 16  ;;  %v3591_v4 = vor.u32 %v1454_v60, %v3582_v54  ;;  %v797_v12 = vrot.slane %v795_v52, 3 }
  0xa8   : > { %v940_v1 = vshrl.u32 %v927_v57, 16  ;;  %v943_v3 = vshll.u32 %v927_v57, 16  ;;  %2924 = vmatprep.subr.bf16.mxu0 %v3191_v2  ;;  %v789_v6 = vrot.slane %v787_v58, 3  ;;  %v792_v7 = vrot.slane %v790_v59, 4  ;;  %v3640_v59 = vld [vmem:[#allocation2 + $0x8] sm:$0xf] }
  0xa9   : > { %v934_v10 = vrot.slane %v932_v63, 7  ;;  %v800_v14 = vrot.slane %v798_v53, 4  ;;  %v1457_v16 = vrot.slane %v3582_v54, 4  ;;  %v1466_v17 = vrot.slane %v1461_v61, 4 }
  0xaa   : > { %v942_v11 = vrot.slane %v940_v1, 7  ;;  %v1622_v8 = vpop.permute.xlu0 %1621  ;;  %v793_v25 = vor.u32 %v792_v7, %v789_v6  ;;  %v3606_v31 = vor.u32 %v1462_v5, %v1461_v61  ;;  %v1470_v33 = vmul.bf16 %v3591_v4, %v3593_v15  ;;  %v3123_v1 = vld [vmem:[%s3991_s5 + $0x90] sm:$0xff]  }
  0xab   : > { %v1630_v18 = vrot.slane %v1622_v8, %v3557_v13  ;;  %v1637_v19 = vrot.slane %v1622_v8, %v3559_v9  ;;  %2925 = vmatpush3.bf16.msra.mxu0 %v3118_v62  ;;  %v3603_v22 = vor.u32 %v935_v0, %v934_v10  ;;  %v938_v23 = vrot.slane %v934_v10, 4  ;;  %v3122_v0 = vld [vmem:[%s3991_s5 + $0xf0] sm:$0xff]  }
  0xac   : > { %v945_v24 = vor.u32 %v943_v3, %v942_v11  ;;  %2926 = vmatprep.subr.bf16.mxu0 %v3191_v2  ;;  %v947_v34 = vrot.slane %v942_v11, 4  ;;  %v801_v35 = vor.u32 %v800_v14, %v797_v12  ;;  %v3620_v43 = vmul.bf16 %v1466_v17, %v1429_v26  ;;  %v1096_v17 = vld [vmem:[#allocation2 + $0x4] sm:$0x8] }
  0xad   : > { %v1639_v27 = vshll.u32 %v1630_v18, 16  ;;  %v1642_v28 = vshrl.u32 %v1630_v18, 16  ;;  %v1648_v29 = vshll.u32 %v1637_v19, 16  ;;  %v1652_v30 = vshrl.u32 %v1637_v19, 16 }
  0xae   : > { %v1102_v40 = vpop.permute.xlu1 %1101  ;;  %v951_v45 = vmul.bf16 %v3603_v22, %v3601_v21  ;;  %v3637_v51 = vsel %vm3628_vm6, %v938_v23, %v945_v24  ;;  %v802_v52 = vsel %vm785_vm4, %v793_v25, %v801_v35  ;;  %v3642_v60 = vmul.bf16 %v947_v34, %v907_v44  ;;  %v1948_v24 = vld [vmem:[#allocation2 + $0x10] sm:$0xf] }
  0xaf   : > { %v3610_v36 = vrot.slane %v1639_v27, 5  ;;  %v1644_v37 = vrot.slane %v1642_v28, 4  ;;  %v3612_v38 = vrot.slane %v1648_v29, 5  ;;  %v1654_v39 = vrot.slane %v1652_v30, 4  ;;  %2927 = vmatpush3.bf16.msra.mxu0 %v3119_v20  ;;  %2917 = vmatmul.mubr.bf16.vlgmr.msra.gmra.mxu1 %v802_v52  ;;  %v1097_v28 = vld [vmem:[#allocation2 + $0xc] sm:$0xf] }
  0xb0   : > { %v1110_v46 = vrot.slane %v1102_v40, %v3557_v13  ;;  %v1117_v47 = vrot.slane %v1102_v40, %v3559_v9  ;;  %2928 = vmatprep.subr.bf16.mxu0 %v3191_v2  ;;  %2941 = vmatpush3.bf16.msra.mxu1 %v3120_v41  ;;  %v952_v12 = vmul.bf16 %v3637_v51, %v3640_v59  ;;  %v3124_v30 = vld [vmem:[%s3991_s5 + $0xe8] sm:$0xff]  }
  0xb1   : > { %v1645_v49 = vor.u32 %v1644_v37, %v3610_v36  ;;  %v1655_v50 = vor.u32 %v1654_v39, %v3612_v38  ;;  %2942 = vmatprep.subr.bf16.mxu1 %v3191_v2  ;;  %2956 = vmatprep.mubr.msk.bf16.mxu1 %vm3192_vm3, %v3191_v2  ;;  %v1949_v37 = vld [vmem:[#allocation2 + $0x14] sm:$0x1]  ;;  %v1465_v40 = vsel %vm3628_vm6, %v1457_v16, %v3606_v31  ;;  %v2174_v31 = vld [vmem:[#allocation2 + $0xc] sm:$0xf] }
  0xb2   : > { %v1119_v53 = vshll.u32 %v1110_v46, 16  ;;  %v1122_v55 = vshrl.u32 %v1110_v46, 16  ;;  %v1128_v56 = vshll.u32 %v1117_v47, 16  ;;  %v1132_v57 = vshrl.u32 %v1117_v47, 16  ;;  %v1954_v58 = vpop.permute.xlu0 %1953  ;;  %v2173_v47 = vld [vmem:[#allocation2 + $0x8] sm:$0xf] }
  0xb3   : > { %v3644_v61 = vrot.slane %v1645_v49, 4  ;;  %v1962_v62 = vrot.slane %v1954_v58, %v3557_v13  ;;  %v1969_v63 = vrot.slane %v1954_v58, %v3559_v9  ;;  %2929 = vmatpush3.bf16.msra.mxu0 %v3121_v42  ;;  %v3666_v14 = vrot.slane %v1655_v50, 4  ;;  %v3125_v49 = vld [vmem:[%s3991_s5 + $0x88] sm:$0xff]  }
  0xb4   : > { %v3654_v3 = vrot.slane %v1119_v53, 5  ;;  %v1124_v5 = vrot.slane %v1122_v55, 4  ;;  %v1130_v6 = vrot.slane %v1128_v56, 5  ;;  %v1134_v7 = vrot.slane %v1132_v57, 4  ;;  %2930 = vmatprep.subr.bf16.mxu0 %v3191_v2  ;;  %2943 = vmatpush3.bf16.msra.mxu1 %v3122_v0  ;;  %v1428_v52 = vld [vmem:[#allocation2 + $0xc] sm:$0xf] }
  0xb5   : > { %v1651_v10 = vsel %vm3565_vm15, %v3644_v61, %v3612_v38  ;;  %v1971_v11 = vshrl.u32 %v1962_v62, 16  ;;  %v1979_v8 = vshrl.u32 %v1969_v63, 16  ;;  %v1974_v20 = vshll.u32 %v1962_v62, 16  ;;  %v1947_v38 = vld [vmem:[#allocation2 + $0xc] sm:$0xf]  ;;  %2944 = vmatprep.subr.bf16.mxu1 %v3191_v2 }
  0xb6   : > { %v1125_v18 = vor.u32 %v1124_v5, %v3654_v3  ;;  %v1135_v19 = vor.u32 %v1134_v7, %v1130_v6  ;;  %v1287_v23 = vpop.permute.xlu1 %1286  ;;  %v1982_v27 = vshll.u32 %v1969_v63, 16  ;;  %v1616_v53 = vld [vmem:[#allocation2 + $0x8] sm:$0x8]  ;;  %v1140_v55 = vmul.bf16 %v3654_v3, %v1096_v17 }
  0xb7   : > { %v1973_v25 = vrot.slane %v1971_v11, 7  ;;  %v1981_v26 = vrot.slane %v1979_v8, 7  ;;  %v1295_v29 = vrot.slane %v1287_v23, %v3557_v13  ;;  %2931 = vmatpush3.bf16.msra.mxu0 %v3123_v1  ;;  %v1302_v39 = vrot.slane %v1287_v23, %v3559_v9  ;;  %v1617_v1 = vld [vmem:[#allocation2 + $0x10] sm:$0xf] }
  0xb8   : > { %v1126_v34 = vrot.slane %v1125_v18, 4  ;;  %v1136_v35 = vrot.slane %v1135_v19, 4  ;;  %2932 = vmatprep.subr.bf16.mxu0 %v3191_v2  ;;  %2945 = vmatpush3.bf16.msra.mxu1 %v3124_v30  ;;  %v2597_v48 = vcombine.low %v3642_v60, %v3642_v60  ;;  %v1660_v7 = vmul.bf16 %v3610_v36, %v1616_v53  ;;  %v3128_v36 = vld [vmem:[%s3991_s5 + $0xd8] sm:$0xff]  }
  0xb9   : > { %v1976_v41 = vor.u32 %v1974_v20, %v1973_v25  ;;  %v1977_v42 = vrot.slane %v1973_v25, 4  ;;  %v1984_v44 = vor.u32 %v1982_v27, %v1981_v26  ;;  %v1986_v46 = vrot.slane %v1981_v26, 4  ;;  %2946 = vmatprep.subr.bf16.mxu1 %v3191_v2 }
  0xba   : > { %v1131_v50 = vsel %vm3565_vm15, %v1126_v34, %v1130_v6  ;;  %v1142_v54 = vmul.bf16 %v1136_v35, %v1097_v28  ;;  %v1305_v51 = vmul.bf16 %v1295_v29, %v3640_v59  ;;  %v1306_v16 = vmul.bf16 %v1302_v39, %v1097_v28 }
  0xbb   : > { %v1985_v56 = vsel %vm3628_vm6, %v1977_v42, %v1984_v44  ;;  %v1990_v57 = vmul.bf16 %v1976_v41, %v1947_v38  ;;  %v1141_v58 = vmul.bf16 %v1131_v50, %v3640_v59  ;;  %v1992_v62 = vmul.bf16 %v1986_v46, %v1949_v37  ;;  %2933 = vmatpush3.bf16.msra.mxu0 %v3125_v49  ;;  %v3127_v59 = vld [vmem:[%s3991_s5 + $0x80] sm:$0xff]   ;;  %v3130_v44 = vld [vmem:[%s3991_s5 + $0x138] sm:$0xff]  }
  0xbc   : > { %v1991_v61 = vmul.bf16 %v1985_v56, %v1948_v24  ;;  %v3694_v63 = vcombine.low %v1305_v51, %v1306_v16  ;;  %v2175_v0 = vmul.bf16 %v2173_v47, %v1295_v29  ;;  %v2623_v3 = vcombine.low %v1142_v54, %v1142_v54  ;;  %2934 = vmatprep.subr.bf16.mxu0 %v3191_v2  ;;  %v3131_v47 = vld [vmem:[%s3991_s5 + $0xc8] sm:$0xff]  }
  0xbd   : > { %v2176_v5 = vmul.bf16 %v2174_v31, %v1302_v39  ;;  %v1471_v6 = vmul.bf16 %v1465_v40, %v1428_v52  ;;  %v2596_v8 = vcombine.low %v951_v45, %v952_v12  ;;  %v1661_v17 = vmul.bf16 %v1651_v10, %v1428_v52  ;;  %2947 = vmatpush3.bf16.msra.mxu1 %v3126_v32  ;;  %v3132_v32 = vld [vmem:[%s3991_s5 + $0x130] sm:$0xff]  }
  0xbe   : > { %v3703_v11 = vcombine.low %v1990_v57, %v1991_v61  ;;  %v2622_v60 = vcombine.low %v1140_v55, %v1141_v58  ;;  %v1807_v19 = vpop.permute.xlu1 %1806  ;;  %v1662_v23 = vmul.bf16 %v3666_v14, %v1617_v1  ;;  %v2674_v21 = vcombine.low %v3620_v43, %v3620_v43  ;;  %2948 = vmatprep.subr.bf16.mxu1 %v3191_v2 }
  0xbf   : > { %v3709_v18 = vcombine.low %v2175_v0, %v2176_v5  ;;  %v2673_v20 = vcombine.low %v1470_v33, %v1471_v6  ;;  %v2751_v22 = vcombine.low %v1992_v62, %v1992_v62  ;;  %v2699_v45 = vcombine.low %v1660_v7, %v1661_v17  ;;  %2935 = vmatpush3.bf16.msra.mxu0 %v3127_v59  ;;  %v3133_v0 = vld [vmem:[%s3991_s5 + $0xc0] sm:$0xff]  }
  0xc0   : > { %v1815_v10 = vrot.slane %v1807_v19, %v3557_v13  ;;  %v1177_v12 = vshrl.u32 %v2623_v3, 16  ;;  %v1180_v24 = vshll.u32 %v2623_v3, 16  ;;  %v2700_v4 = vcombine.low %v1662_v23, %v1662_v23  ;;  %2960 = vmatprep.subr.bf16.mxu0 %v3191_v2  ;;  %v3129_v13 = vld [vmem:[%s3991_s5 + $0xd0] sm:$0xff]   ;;  %v3135_v23 = vld [vmem:[%s3991_s5 + $0x120] sm:$0xff]  }
  0xc1   : > { %v1822_v15 = vrot.slane %v1807_v19, %v3559_v9  ;;  %v981_v14 = vshrl.u32 %v2596_v8, 16  ;;  %v983_v25 = vshll.u32 %v2596_v8, 16  ;;  %v988_v26 = vshll.u32 %v2597_v48, 16  ;;  %2949 = vmatpush3.bf16.msra.mxu1 %v3128_v36  ;;  %v3138_v36 = vld [vmem:[%s3991_s5 + $0x170] sm:$0xff]  }
  0xc2   : > { %v3723_v33 = vmul.bf16 %v1815_v10, %v1428_v52  ;;  %v1697_v43 = vshrl.u32 %v2700_v4, 16  ;;  %v1700_v27 = vshll.u32 %v2700_v4, 16  ;;  %v1169_v29 = vshrl.u32 %v2622_v60, 16  ;;  %2950 = vmatprep.subr.bf16.mxu1 %v3191_v2  ;;  %v3142_v10 = vld [vmem:[%s3991_s5 + $0x160] sm:$0xff]  }
  0xc3   : > { %v3726_v28 = vmul.bf16 %v1822_v15, %v1617_v1  ;;  %v985_v9 = vrot.slane %v983_v25, 1  ;;  %v990_v30 = vrot.slane %v988_v26, 1  ;;  %v1172_v34 = vshll.u32 %v2622_v60, 16  ;;  %v3134_v60 = vld [vmem:[%s3991_s5 + $0x128] sm:$0xff]   ;;  %v3143_v4 = vld [vmem:[%s3991_s5 + $0x100] sm:$0xff]   ;;  %v3145_v15 = vld [vmem:[%s3991_s5 + $0x150] sm:$0xff]  }
  0xc4   : > { %v2026_v35 = vshll.u32 %v2751_v22, 16  ;;  %v1699_v37 = vrot.slane %v1697_v43, 3  ;;  %v1702_v38 = vrot.slane %v1700_v27, 4  ;;  %v1179_v40 = vrot.slane %v1177_v12, 3  ;;  %v3140_v22 = vld [vmem:[%s3991_s5 + $0x168] sm:$0xff]   ;;  %v3148_v26 = vld [vmem:[%s3991_s5 + $0x1b0] sm:$0xff]  }
  0xc5   : > { %v2725_v39 = vcombine.low %v3723_v33, %v3726_v28  ;;  %v1182_v41 = vrot.slane %v1180_v24, 4  ;;  %v986_v42 = vor.u32 %v985_v9, %v981_v14  ;;  %v1501_v46 = vshll.u32 %v2673_v20, 16  ;;  %2951 = vmatpush3.bf16.msra.mxu1 %v3129_v13  ;;  %v3141_v12 = vld [vmem:[%s3991_s5 + $0x108] sm:$0xff]   ;;  %v3144_v24 = vld [vmem:[%s3991_s5 + $0x158] sm:$0xff]   ;;  %v3149_v43 = vld [vmem:[%s3991_s5 + $0x140] sm:$0xff]  }
  0xc6   : > { %v1171_v49 = vrot.slane %v1169_v29, 3  ;;  %v1506_v50 = vshll.u32 %v2674_v21, 16  ;;  %v1689_v54 = vshrl.u32 %v2699_v45, 16  ;;  %v1692_v51 = vshll.u32 %v2699_v45, 16  ;;  %2952 = vmatprep.subr.bf16.mxu1 %v3191_v2  ;;  %v3137_v21 = vld [vmem:[%s3991_s5 + $0x118] sm:$0xff]   ;;  %v3139_v45 = vld [vmem:[%s3991_s5 + $0x110] sm:$0xff]  }
  0xc7   : > { %v991_v16 = vsel %vm979_vm9, %v986_v42, %v990_v30  ;;  %v1174_v31 = vrot.slane %v1172_v34, 4  ;;  %v1499_v52 = vshrl.u32 %v2673_v20, 16  ;;  %v1503_v53 = vrot.slane %v1501_v46, 1  ;;  %v3146_v14 = vld [vmem:[%s3991_s5 + $0x1b8] sm:$0xff]   ;;  %v3147_v25 = vld [vmem:[%s3991_s5 + $0x148] sm:$0xff]   ;;  %v3151_v13 = vld [vmem:[%s3991_s5 + $0x1a0] sm:$0xff]  }
  0xc8   : > { %2937 = vmatmul.mubr.bf16.vlgmr.msra.gmra.mxu0 %v991_v16  ;;  %v1691_v55 = vrot.slane %v1689_v54, 3  ;;  %v1694_v56 = vrot.slane %v1692_v51, 4  ;;  %v1703_v57 = vor.u32 %v1702_v38, %v1699_v37  ;;  %v2021_v58 = vshll.u32 %v3703_v11, 16  ;;  %v3152_v27 = vld [vmem:[%s3991_s5 + $0x1f8] sm:$0xff]   ;;  %v3154_v29 = vld [vmem:[%s3991_s5 + $0x1f0] sm:$0xff]   ;;  %v3156_v30 = vld [vmem:[%s3991_s5 + $0x1e8] sm:$0xff]  }
  0xc9   : > { %2961 = vmatpush3.bf16.msra.mxu0 %v3130_v44  ;;  %2976 = vmatprep.mubr.msk.bf16.mxu0 %vm3192_vm3, %v3191_v2  ;;  %v1504_v61 = vor.u32 %v1503_v53, %v1499_v52  ;;  %v1508_v62 = vrot.slane %v1506_v50, 1  ;;  %v2019_v48 = vshrl.u32 %v3703_v11, 16  ;;  %v1183_v5 = vor.u32 %v1182_v41, %v1179_v40  ;;  %v3136_v11 = vld [vmem:[%s3991_s5 + $0x178] sm:$0xff]   ;;  %v3155_v34 = vld [vmem:[%s3991_s5 + $0x190] sm:$0xff]   ;;  %v3157_v37 = vld [vmem:[%s3991_s5 + $0x188] sm:$0xff]  }
  0xca   : > { %2962 = vmatprep.subr.bf16.mxu0 %v3191_v2  ;;  %2953 = vmatpush3.bf16.msra.mxu1 %v3131_v47  ;;  %v1695_v1 = vor.u32 %v1694_v56, %v1691_v55  ;;  %v2023_v3 = vrot.slane %v2021_v58, 1  ;;  %v1175_v59 = vor.u32 %v1174_v31, %v1171_v49  ;;  %v2028_v17 = vrot.slane %v2026_v35, 1  ;;  %v3153_v9 = vld [vmem:[%s3991_s5 + $0x198] sm:$0xff]   ;;  %v3158_v35 = vld [vmem:[%s3991_s5 + $0x1e0] sm:$0xff]   ;;  %v3161_v41 = vld [vmem:[%s3991_s5 + $0x1d0] sm:$0xff]  }
  0xcb   : > { %2954 = vmatprep.subr.bf16.mxu1 %v3191_v2  ;;  %v3755_v6 = vsel %vm979_vm9, %v1504_v61, %v1508_v62  ;;  %v3160_v38 = vld [vmem:[%s3991_s5 + $0x1d8] sm:$0xff]   ;;  %v3159_v40 = vld [vmem:[%s3991_s5 + $0x180] sm:$0xff]   ;;  %v3163_v44 = vld [vmem:[%s3991_s5 + $0x1c8] sm:$0xff]  }
  0xcc   : > { %v3758_v7 = vsel %vm785_vm4, %v1695_v1, %v1703_v57  ;;  %v2024_v8 = vor.u32 %v2023_v3, %v2019_v48  ;;  %v1184_v20 = vsel %vm785_vm4, %v1175_v59, %v1183_v5  ;;  %v3162_v42 = vld [vmem:[%s3991_s5 + $0x238] sm:$0xff]   ;;  %v3164_v46 = vld [vmem:[%s3991_s5 + $0x230] sm:$0xff]   ;;  %v3165_v47 = vld [vmem:[%s3991_s5 + $0x1c0] sm:$0xff]  }
  0xcd   : > { %2963 = vmatpush3.bf16.msra.mxu0 %v3132_v32  ;;  %v3166_v49 = vld [vmem:[%s3991_s5 + $0x228] sm:$0xff]   ;;  %v3168_v50 = vld [vmem:[%s3992_s6 + $0x38] sm:$0xff]   ;;  %v3167_v54 = vld [vmem:[%s3991_s5 + $0x220] sm:$0xff]  }
  0xce   : > { %2964 = vmatprep.subr.bf16.mxu0 %v3191_v2  ;;  %2955 = vmatpush3.bf16.msra.mxu1 %v3133_v0  ;;  %v3768_v19 = vsel %vm979_vm9, %v2024_v8, %v2028_v17  ;;  %v3170_v51 = vld [vmem:[%s3992_s6 + $0x30] sm:$0xff]   ;;  %v3169_v33 = vld [vmem:[%s3991_s5 + $0x218] sm:$0xff]   ;;  %v3172_v28 = vld [vmem:[%s3992_s6 + $0x28] sm:$0xff]  }
  0xcf   : > { %2980 = vmatprep.subr.bf16.mxu1 %v3191_v2  ;;  %v3174_v16 = vld [vmem:[%s3992_s6 + $0x20] sm:$0xff]   ;;  %v3173_v31 = vld [vmem:[%s3991_s5 + $0x208] sm:$0xff]   ;;  %v3176_v52 = vld [vmem:[%s3992_s6 + $0x18] sm:$0xff]  }
  0xd0   : > { %v3175_v53 = vld [vmem:[%s3991_s5 + $0x200] sm:$0xff]   ;;  %v3177_v55 = vld [vmem:[%s3992_s6 + $0x10] sm:$0xff]   ;;  %v3178_v56 = vld [vmem:[%s3992_s6 + $0x8] sm:$0xff]  }
  0xd1   : > { %2965 = vmatpush3.bf16.msra.mxu0 %v3134_v60  ;;  %2957 = vmatmul.mubr.bf16.vlgmr.msra.gmra.mxu1 %v1184_v20  ;;  %v3179_v57 = vld [vmem:[%s3992_s6] sm:$0xff]  }
  0xd2   : > { %2966 = vmatprep.subr.bf16.mxu0 %v3191_v2  ;;  %2981 = vmatpush3.bf16.msra.mxu1 %v3136_v11 }
  0xd3   : > { %2982 = vmatprep.subr.bf16.mxu1 %v3191_v2  ;;  %2996 = vmatprep.mubr.msk.bf16.mxu1 %vm3192_vm3, %v3191_v2 }
  0xd5   : > { %2967 = vmatpush3.bf16.msra.mxu0 %v3135_v23 }
  0xd6   : > { %2968 = vmatprep.subr.bf16.mxu0 %v3191_v2  ;;  %2983 = vmatpush3.bf16.msra.mxu1 %v3138_v36 }
  0xd7   : > { %2984 = vmatprep.subr.bf16.mxu1 %v3191_v2 }
  0xd9   : > { %2969 = vmatpush3.bf16.msra.mxu0 %v3137_v21 }
  0xda   : > { %2970 = vmatprep.subr.bf16.mxu0 %v3191_v2  ;;  %2985 = vmatpush3.bf16.msra.mxu1 %v3140_v22 }
  0xdb   : > { %2986 = vmatprep.subr.bf16.mxu1 %v3191_v2 }
  0xdd   : > { %2971 = vmatpush3.bf16.msra.mxu0 %v3139_v45 }
  0xde   : > { %2972 = vmatprep.subr.bf16.mxu0 %v3191_v2  ;;  %2987 = vmatpush3.bf16.msra.mxu1 %v3142_v10 }
  0xdf   : > { %2988 = vmatprep.subr.bf16.mxu1 %v3191_v2 }
  0xe1   : > { %2973 = vmatpush3.bf16.msra.mxu0 %v3141_v12 }
  0xe2   : > { %2974 = vmatprep.subr.bf16.mxu0 %v3191_v2  ;;  %2989 = vmatpush3.bf16.msra.mxu1 %v3144_v24 }
  0xe3   : > { %2990 = vmatprep.subr.bf16.mxu1 %v3191_v2 }
  0xe5   : > { %2975 = vmatpush3.bf16.msra.mxu0 %v3143_v4 }
  0xe6   : > { %3000 = vmatprep.subr.bf16.mxu0 %v3191_v2  ;;  %2991 = vmatpush3.bf16.msra.mxu1 %v3145_v15 }
  0xe7   : > { %2992 = vmatprep.subr.bf16.mxu1 %v3191_v2 }
  0xe8   : > { %2977 = vmatmul.mubr.bf16.vlgmr.msra.gmra.mxu0 %v3694_v63  ;;  %v3150_v63 = vld [vmem:[%s3991_s5 + $0x1a8] sm:$0xff]  }
  0xe9   : > { %3001 = vmatpush3.bf16.msra.mxu0 %v3146_v14  ;;  %3016 = vmatprep.mubr.msk.bf16.mxu0 %vm3192_vm3, %v3191_v2 }
  0xea   : > { %3002 = vmatprep.subr.bf16.mxu0 %v3191_v2  ;;  %2993 = vmatpush3.bf16.msra.mxu1 %v3147_v25 }
  0xeb   : > { %2994 = vmatprep.subr.bf16.mxu1 %v3191_v2 }
  0xed   : > { %3003 = vmatpush3.bf16.msra.mxu0 %v3148_v26 }
  0xee   : > { %3004 = vmatprep.subr.bf16.mxu0 %v3191_v2  ;;  %2995 = vmatpush3.bf16.msra.mxu1 %v3149_v43 }
  0xef   : > { %3020 = vmatprep.subr.bf16.mxu1 %v3191_v2 }
  0xf1   : > { %3005 = vmatpush3.bf16.msra.mxu0 %v3150_v63  ;;  %2997 = vmatmul.mubr.bf16.vlgmr.msra.gmra.mxu1 %v3755_v6 }
  0xf2   : > { %3006 = vmatprep.subr.bf16.mxu0 %v3191_v2  ;;  %3021 = vmatpush3.bf16.msra.mxu1 %v3152_v27 }
  0xf3   : > { %3022 = vmatprep.subr.bf16.mxu1 %v3191_v2  ;;  %3036 = vmatprep.mubr.msk.bf16.mxu1 %vm3192_vm3, %v3191_v2 }
  0xf5   : > { %3007 = vmatpush3.bf16.msra.mxu0 %v3151_v13 }
  0xf6   : > { %3008 = vmatprep.subr.bf16.mxu0 %v3191_v2  ;;  %3023 = vmatpush3.bf16.msra.mxu1 %v3154_v29 }
  0xf7   : > { %3024 = vmatprep.subr.bf16.mxu1 %v3191_v2 }
  0xf9   : > { %3009 = vmatpush3.bf16.msra.mxu0 %v3153_v9 }
  0xfa   : > { %3010 = vmatprep.subr.bf16.mxu0 %v3191_v2  ;;  %3025 = vmatpush3.bf16.msra.mxu1 %v3156_v30 }
  0xfb   : > { %3026 = vmatprep.subr.bf16.mxu1 %v3191_v2 }
  0xfd   : > { %3011 = vmatpush3.bf16.msra.mxu0 %v3155_v34 }
  0xfe   : > { %3012 = vmatprep.subr.bf16.mxu0 %v3191_v2  ;;  %3027 = vmatpush3.bf16.msra.mxu1 %v3158_v35 }
  0xff   : > { %3028 = vmatprep.subr.bf16.mxu1 %v3191_v2 }
 0x101   : > { %3013 = vmatpush3.bf16.msra.mxu0 %v3157_v37 }
 0x102   : > { %3014 = vmatprep.subr.bf16.mxu0 %v3191_v2  ;;  %3029 = vmatpush3.bf16.msra.mxu1 %v3160_v38 }
 0x103   : > { %3030 = vmatprep.subr.bf16.mxu1 %v3191_v2 }
 0x105   : > { %3015 = vmatpush3.bf16.msra.mxu0 %v3159_v40 }
 0x106   : > { %3040 = vmatprep.subr.bf16.mxu0 %v3191_v2  ;;  %3031 = vmatpush3.bf16.msra.mxu1 %v3161_v41 }
 0x107   : > { %3032 = vmatprep.subr.bf16.mxu1 %v3191_v2 }
 0x108   : > { %3017 = vmatmul.mubr.bf16.vlgmr.msra.gmra.mxu0 %v3758_v7 }
 0x109   : > { %3041 = vmatpush3.bf16.msra.mxu0 %v3162_v42  ;;  %3056 = vmatprep.mubr.msk.bf16.mxu0 %vm3192_vm3, %v3191_v2  ;;  %v2144_v42 = vstv %s2136_s12 }
 0x10a   : > { %3042 = vmatprep.subr.bf16.mxu0 %v3191_v2  ;;  %3033 = vmatpush3.bf16.msra.mxu1 %v3163_v44  ;;  %3180 = vrcp.f32 %v2144_v42 }
 0x10b   : > { %3034 = vmatprep.subr.bf16.mxu1 %v3191_v2 }
 0x10d   : > { %3043 = vmatpush3.bf16.msra.mxu0 %v3164_v46 }
 0x10e   : > { %3044 = vmatprep.subr.bf16.mxu0 %v3191_v2  ;;  %3035 = vmatpush3.bf16.msra.mxu1 %v3165_v47 }
 0x10f   : > { %3060 = vmatprep.subr.bf16.mxu1 %v3191_v2 }
 0x111   : > { %3045 = vmatpush3.bf16.msra.mxu0 %v3166_v49  ;;  %3037 = vmatmul.mubr.bf16.vlgmr.msra.gmra.mxu1 %v2725_v39  ;;  %v3171_v39 = vld [vmem:[%s3991_s5 + $0x210] sm:$0xff]  }
 0x112   : > { %3046 = vmatprep.subr.bf16.mxu0 %v3191_v2  ;;  %3061 = vmatpush3.bf16.msra.mxu1 %v3168_v50 }
 0x113   : > { %3062 = vmatprep.subr.bf16.mxu1 %v3191_v2  ;;  %3076 = vmatprep.mubr.msk.bf16.mxu1 %vm3192_vm3, %v3191_v2  ;;  %vm2170_vm3 = vcmask 1040384  }
 0x115   : > { %3047 = vmatpush3.bf16.msra.mxu0 %v3167_v54 }
 0x116   : > { %3048 = vmatprep.subr.bf16.mxu0 %v3191_v2  ;;  %3063 = vmatpush3.bf16.msra.mxu1 %v3170_v51 }
 0x117   : > { %3064 = vmatprep.subr.bf16.mxu1 %v3191_v2 }
 0x119   : > { %3049 = vmatpush3.bf16.msra.mxu0 %v3169_v33 }
 0x11a   : > { %3050 = vmatprep.subr.bf16.mxu0 %v3191_v2  ;;  %3065 = vmatpush3.bf16.msra.mxu1 %v3172_v28 }
 0x11b   : > { %3066 = vmatprep.subr.bf16.mxu1 %v3191_v2 }
 0x11d   : > { %3051 = vmatpush3.bf16.msra.mxu0 %v3171_v39 }
 0x11e   : > { %3052 = vmatprep.subr.bf16.mxu0 %v3191_v2  ;;  %3067 = vmatpush3.bf16.msra.mxu1 %v3174_v16 }
 0x11f   : > { %3068 = vmatprep.subr.bf16.mxu1 %v3191_v2 }
 0x121   : > { %3053 = vmatpush3.bf16.msra.mxu0 %v3173_v31 }
 0x122   : > { %3054 = vmatprep.subr.bf16.mxu0 %v3191_v2  ;;  %3069 = vmatpush3.bf16.msra.mxu1 %v3176_v52 }
 0x123   : > { %3070 = vmatprep.subr.bf16.mxu1 %v3191_v2 }
 0x125   : > { %3055 = vmatpush3.bf16.msra.mxu0 %v3175_v53 }
 0x126   : > { %3071 = vmatpush3.bf16.msra.mxu1 %v3177_v55 }
 0x127   : > { %3072 = vmatprep.subr.bf16.mxu1 %v3191_v2 }
 0x128   : > { %3057 = vmatmul.mubr.bf16.vlgmr.msra.gmra.mxu0 %v3768_v19 }
 0x12a   : > { %3073 = vmatpush3.bf16.msra.mxu1 %v3178_v56 }
 0x12b   : > { %3074 = vmatprep.subr.bf16.mxu1 %v3191_v2 }
 0x12e   : > { %3075 = vmatpush3.bf16.msra.mxu1 %v3179_v57 }
 0x131   : > { %3077 = vmatmul.mubr.bf16.vlgmr.msra.gmra.mxu1 %v3709_v18 }
 0x162   : > { %v770_v58 = vpop.f32.mrf.mxu0 }
 0x164   : > { %v2898_v32 = vpop.f32.mrf.mxu0 }
 0x166   : > { %v773_v61 = vpop.f32.mrf.mxu0 }
 0x168   : > { %v2899_v62 = vpop.f32.mrf.mxu0 }
 0x169   : > { %v3181_v62 = vpop.eup %3180 }
 0x16f   : > { %v886_v0 = vpop.f32.mrf.mxu1 }
 0x170   : > { %v887_v1 = vadd.f32 %v886_v0, %v770_v58 }
 0x171   : > { %v2918_v48 = vpop.f32.mrf.mxu1 }
 0x172   : > { %v3097_v48 = vpop.permute.xlu1 %3096 }
 0x173   : > { %v889_v3 = vpop.f32.mrf.mxu1 }
 0x174   : > { %v890_v5 = vadd.f32 %v889_v3, %v773_v61 }
 0x175   : > { %v2919_v6 = vpop.f32.mrf.mxu1 }
 0x188   : > { %v1075_v59 = vpop.f32.mrf.mxu0 }
 0x189   : > { %v1082_v7 = vadd.f32 %v1075_v59, %v887_v1  ;;  %v3099_v59 = vunpack.i.h.bf16 %v3097_v48 }
 0x18a   : > { %v2938_v8 = vpop.f32.mrf.mxu0 }
 0x18c   : > { %v1078_v17 = vpop.f32.mrf.mxu0 }
 0x18d   : > { %v1083_v60 = vadd.f32 %v1078_v17, %v890_v5 }
 0x18e   : > { %v2939_v11 = vpop.f32.mrf.mxu0 }
 0x191   : > { %v1268_v2 = vpop.f32.mrf.mxu1 }
 0x192   : > { %v1275_v19 = vadd.f32 %v1268_v2, %v1082_v7  ;;  %v3098_v7 = vunpack.i.l.bf16 %v3097_v48 }
 0x193   : > { %v2958_v20 = vpop.f32.mrf.mxu1 }
 0x195   : > { %v1271_v18 = vpop.f32.mrf.mxu1 }
 0x196   : > { %v1276_v23 = vadd.f32 %v1271_v18, %v1083_v60 }
 0x197   : > { %v2959_v36 = vpop.f32.mrf.mxu1 }
 0x1a8   : > { %v1412_v21 = vpop.f32.mrf.mxu0 }
 0x1a9   : > { %v1419_v9 = vadd.f32 %v1412_v21, %v1275_v19 }
 0x1aa   : > { %v2978_v22 = vpop.f32.mrf.mxu0 }
 0x1ac   : > { %v1415_v45 = vpop.f32.mrf.mxu0 }
 0x1ad   : > { %v1420_v30 = vadd.f32 %v1415_v45, %v1276_v23 }
 0x1ae   : > { %v2979_v10 = vpop.f32.mrf.mxu0 }
 0x1b1   : > { %v1593_v12 = vpop.f32.mrf.mxu1 }
 0x1b2   : > { %v1600_v34 = vadd.f32 %v1593_v12, %v1419_v9 }
 0x1b3   : > { %v2998_v24 = vpop.f32.mrf.mxu1 }
 0x1b5   : > { %v1596_v4 = vpop.f32.mrf.mxu1 }
 0x1b6   : > { %v1601_v35 = vadd.f32 %v1596_v4, %v1420_v30 }
 0x1b7   : > { %v2999_v15 = vpop.f32.mrf.mxu1 }
 0x1c8   : > { %v1788_v14 = vpop.f32.mrf.mxu0 }
 0x1c9   : > { %v1795_v38 = vadd.f32 %v1788_v14, %v1600_v34 }
 0x1ca   : > { %v3018_v25 = vpop.f32.mrf.mxu0 }
 0x1cc   : > { %v1791_v26 = vpop.f32.mrf.mxu0 }
 0x1cd   : > { %v1796_v40 = vadd.f32 %v1791_v26, %v1601_v35 }
 0x1ce   : > { %v3019_v43 = vpop.f32.mrf.mxu0 }
 0x1d1   : > { %v1932_v63 = vpop.f32.mrf.mxu1 }
 0x1d2   : > { %v1939_v44 = vadd.f32 %v1932_v63, %v1795_v38 }
 0x1d3   : > { %v3038_v27 = vpop.f32.mrf.mxu1 }
 0x1d5   : > { %v1935_v13 = vpop.f32.mrf.mxu1 }
 0x1d6   : > { %v1940_v46 = vadd.f32 %v1935_v13, %v1796_v40 }
 0x1d7   : > { %v3039_v29 = vpop.f32.mrf.mxu1 }
 0x1e8   : > { %v2113_v37 = vpop.f32.mrf.mxu0 }
 0x1e9   : > { %v2120_v49 = vadd.f32 %v2113_v37, %v1939_v44 }
 0x1ea   : > { %v3058_v41 = vpop.f32.mrf.mxu0 }
 0x1ec   : > { %v2116_v47 = vpop.f32.mrf.mxu0 }
 0x1ed   : > { %v2121_v50 = vadd.f32 %v2116_v47, %v1940_v46 }
 0x1ee   : > { %v3059_v54 = vpop.f32.mrf.mxu0 }
 0x1ef   : > { %v2783_v51 = vpack.c.bf16 %v2121_v50, %v2120_v49  ;;  %v2137_v33 = vadd.f32 %v2121_v50, %v2120_v49 }
 0x1f1   : > { %2784 = vst [vmem:[%s511_s17] sm:$0xff] %v2783_v51   ;;  %v2138_v28 = vrot.slane %v2137_v33, 4  ;;  %v2281_v39 = vpop.f32.mrf.mxu1 }
 0x1f3   : > { %v2139_v16 = vadd.f32 %v2138_v28, %v2137_v33  ;;  %v3078_v31 = vpop.f32.mrf.mxu1 }
 0x1f5   : > { %v2140_v52 = vrot.slane %v2139_v16, 2  ;;  %v2284_v53 = vpop.f32.mrf.mxu1 }
 0x1f6   : > { %v2788_v55 = vpack.c.bf16 %v2284_v53, %v2281_v39  ;;  %v2298_v56 = vadd.f32 %v2284_v53, %v2281_v39 }
 0x1f7   : > { %v2141_v57 = vadd.f32 %v2140_v52, %v2139_v16  ;;  %v3079_v58 = vpop.f32.mrf.mxu1 }
 0x1f8   : > { %2789 = vst [vmem:[%s517_s21] sm:$0xff] %v2788_v55   ;;  %v2299_v32 = vrot.slane %v2298_v56, 4 }
 0x1f9   : > { %v2142_v61 = vrot.slane %v2141_v57, 1 }
 0x1fa   : > { %v2300_v0 = vadd.f32 %v2299_v32, %v2298_v56 }
 0x1fb   : > { %v2143_v1 = vadd.f32 %v2142_v61, %v2141_v57 }
 0x1fc   : > { %v2301_v3 = vrot.slane %v2300_v0, 2 }
 0x1fd   : > { %v2146_v5 = vmul.f32 %v3181_v62, %v2143_v1 }
 0x1fe   : > { %v2302_v6 = vadd.f32 %v2301_v3, %v2300_v0 }
 0x1ff   : > { %v2147_v8 = vsub.f32 %v2120_v49, %v2146_v5  ;;  %v2148_v17 = vsub.f32 %v2121_v50, %v2146_v5 }
 0x200   : > { %v2303_v60 = vrot.slane %v2302_v6, 1 }
 0x201   : > { %v2159_v11 = vmul.f32 %v3098_v7, %v2147_v8  ;;  %v2160_v2 = vmul.f32 %v3099_v59, %v2148_v17 }
 0x202   : > { %v2304_v19 = vadd.f32 %v2303_v60, %v2302_v6 }
 0x203   : > { %v2161_v20 = vmul.f32 %v2159_v11, %v2159_v11  ;;  %v2162_v18 = vmul.f32 %v2160_v2, %v2160_v2 }
 0x204   : > { %v2305_v23 = vmul.f32 %v3181_v62, %v2304_v19 }
 0x205   : > { %v2163_v36 = vadd.f32 %v2162_v18, %v2161_v20 }
 0x206   : > { %v2306_v21 = vsub.f32 %v2281_v39, %v2305_v23  ;;  %v2307_v22 = vsub.f32 %v2284_v53, %v2305_v23 }
 0x207   : > { %v2164_v45 = vrot.slane %v2163_v36, 4 }
 0x208   : > { %v2308_v10 = vmul.f32 %v3098_v7, %v2306_v21  ;;  %v2309_v12 = vmul.f32 %v3099_v59, %v2307_v22 }
 0x209   : > { %v2165_v24 = vadd.f32 %v2164_v45, %v2163_v36 }
 0x20a   : > { %v2310_v4 = vmul.f32 %v2308_v10, %v2308_v10  ;;  %v2311_v15 = vmul.f32 %v2309_v12, %v2309_v12 }
 0x20b   : > { %v2166_v14 = vrot.slane %v2165_v24, 2 }
 0x20c   : > { %v2312_v25 = vadd.f32 %v2311_v15, %v2310_v4 }
 0x20d   : > { %v2167_v26 = vadd.f32 %v2166_v14, %v2165_v24 }
 0x20e   : > { %v2313_v43 = vrot.slane %v2312_v25, 4 }
 0x20f   : > { %v2168_v63 = vrot.slane %v2167_v26, 1 }
 0x210   : > { %v2314_v27 = vadd.f32 %v2313_v43, %v2312_v25 }
 0x211   : > { %v2169_v13 = vadd.f32 %v2168_v63, %v2167_v26 }
 0x212   : > { %v2315_v29 = vrot.slane %v2314_v27, 2 }
 0x213   : > { %v2171_v9 = vsel %vm2170_vm3, %v2143_v1, %v2169_v13 }
 0x214   : > { %2172 = vst [vmem:[%s522_s25] sm:$0x3] %v2171_v9  ;;  %v2316_v30 = vadd.f32 %v2315_v29, %v2314_v27 }
 0x216   : > { %v2317_v34 = vrot.slane %v2316_v30, 1 }
 0x218   : > { %v2318_v35 = vadd.f32 %v2317_v34, %v2316_v30 }
 0x21a   : > { %v2319_v37 = vsel %vm2170_vm3, %v2304_v19, %v2318_v35 }
 0x21b   : > { %2320 = vst [vmem:[%s526_s28] sm:$0x3] %v2319_v37 }
 0x21c PF: > { %s21_s13 = sadd.s32 1, %s3188_s13  }
 0x21d   : > { %p18_p10 = scmp.ge.s32.totalorder %s21_s13, 10  }
 0x21f   :  { %20 = sbr.rel (!%p18_p10) target bundleno = 1 (0x1), region = 134 }

</bundles_post_ra>
